<compile_context>
chip_gen: v7x
topology: tpu7x:2x2x1
jax: 0.10.0
libtpu: 0.0.40
codegen_flags: <defaults>
</compile_context>

<pallas_src>
import math

import jax
import jax.numpy as jnp
from jax.experimental import pallas as pl
from jax.experimental.pallas import tpu as pltpu

NEG_SLOPE = 0.01          # PyTorch nn.LeakyReLU default negative_slope
LANE = 128                # TPU lane width
_VMEM_BUDGET = 40 * 1024 * 1024   # per-step VMEM budget (fits v7x 64 MiB)


def _pad_to(n, m):
    return ((n + m - 1) // m) * m


# ------------------------------ fused kernel ------------------------------- #

def _make_cvae_kernel(enc_meta, dec_meta, forced_log_var, lat_p, tgt_p):
    n_enc = enc_meta["n_refs"]
    n_dec = dec_meta["n_refs"]

    def gaussian(c_bf, inp_bf, refs, meta, forced):
        """One GaussianModule; refs = [W0_c, W0_in, (W_hidden_stack), W_mu,
        (W_lv), bias_stack].  All weights bf16, biases f32, f32 accumulate."""
        idx = 0
        w0_c = refs[idx]; idx += 1
        w0_in = refs[idx]; idx += 1
        w_hid = None
        if meta["n_hidden"] > 1:
            w_hid = refs[idx]; idx += 1
        w_mu = refs[idx]; idx += 1
        w_lv = None
        if meta["has_lv"]:
            w_lv = refs[idx]; idx += 1
        b = refs[idx]

        width_p = meta["width_p"]
        out_p = meta["out_p"]
        n_hidden = meta["n_hidden"]

        # first hidden layer: concat(c, in) @ W0 == c @ W0_c + in @ W0_in
        h = (jnp.dot(c_bf, w0_c[...], preferred_element_type=jnp.float32)
             + jnp.dot(inp_bf, w0_in[...], preferred_element_type=jnp.float32)
             + b[0:1, 0:width_p])
        h = jnp.maximum(h, NEG_SLOPE * h)                       # LeakyReLU (f32)

        for l in range(n_hidden - 1):
            h = (jnp.dot(h.astype(jnp.bfloat16), w_hid[l],
                         preferred_element_type=jnp.float32)
                 + b[l + 1:l + 2, 0:width_p])
            h = jnp.maximum(h, NEG_SLOPE * h)

        h_bf = h.astype(jnp.bfloat16)
        mu = (jnp.dot(h_bf, w_mu[...], preferred_element_type=jnp.float32)
              + b[n_hidden:n_hidden + 1, 0:out_p])
        if forced is not None:
            # construction-time constant -> folded at trace time
            log_var = jnp.full_like(mu, float(forced))
        else:
            log_var = (jnp.dot(h_bf, w_lv[...],
                               preferred_element_type=jnp.float32)
                       + b[n_hidden + 1:n_hidden + 2, 0:out_p])
        return mu, log_var

    def kernel(*refs):
        c_ref, x_ref, eps_ref = refs[0], refs[1], refs[2]
        enc_refs = refs[3:3 + n_enc]
        dec_refs = refs[3 + n_enc:3 + n_enc + n_dec]
        out_ref = refs[3 + n_enc + n_dec]

        c_bf = c_ref[...].astype(jnp.bfloat16)
        x_bf = x_ref[...].astype(jnp.bfloat16)

        # encoder p(z | c, x)
        z_mu, z_lv = gaussian(c_bf, x_bf, enc_refs, enc_meta, None)
        # reparameterization (f32): z = mu + exp(0.5*log_var) * eps
        z = z_mu + jnp.exp(0.5 * z_lv) * eps_ref[...]
        # decoder p(x | c, z)
        x_mu, x_lv = gaussian(c_bf, z.astype(jnp.bfloat16), dec_refs, dec_meta,
                              forced_log_var)

        # single lane-dense output slab; every segment is a 128-multiple and
        # 128-aligned so all stores are full-vreg (no masked vst).
        dt = out_ref.dtype
        out_ref[:, 0:lat_p] = z_mu.astype(dt)
        out_ref[:, lat_p:2 * lat_p] = z_lv.astype(dt)
        out_ref[:, 2 * lat_p:3 * lat_p] = z.astype(dt)
        out_ref[:, 3 * lat_p:3 * lat_p + tgt_p] = x_mu.astype(dt)
        out_ref[:, 3 * lat_p + tgt_p:3 * lat_p + 2 * tgt_p] = x_lv.astype(dt)

    return kernel


# --------------------------- parameter building ---------------------------- #

def _uniform(key, shape, bound):
    return jax.random.uniform(key, shape, jnp.float32, -bound, bound)


def init_gaussian_module(key, condition_dim, input_dim, output_dim, width,
                         depth, has_log_var_head=True,
                         weight_dtype=jnp.bfloat16):
    """GaussianModule params, zero-padded to 128-lane multiples, packed into a
    small number of large arrays (kernel ref order)."""
    assert depth >= 1, "GaussianModule needs at least one hidden layer"
    cond_p = _pad_to(condition_dim, LANE)
    in_p = _pad_to(input_dim, LANE)
    out_p = _pad_to(output_dim, LANE)
    width_p = _pad_to(width, LANE)
    max_b = max(width_p, out_p)
    keys = jax.random.split(key, depth + 2)

    def pad_w(w, rp, cp):
        return (jnp.zeros((rp, cp), jnp.float32)
                .at[:w.shape[0], :w.shape[1]].set(w).astype(weight_dtype))

    def pad_b(b):
        return jnp.zeros((max_b,), jnp.float32).at[:b.shape[0]].set(b)

    refs = []
    bias_rows = []

    # first hidden layer: init as one torch-Linear over concat(c, in), then
    # split its rows so the concat is never materialized.
    kw, kb = jax.random.split(keys[0])
    bound0 = 1.0 / math.sqrt(condition_dim + input_dim)
    w0 = _uniform(kw, (condition_dim + input_dim, width), bound0)
    refs.append(pad_w(w0[:condition_dim], cond_p, width_p))        # W0_c
    refs.append(pad_w(w0[condition_dim:], in_p, width_p))          # W0_in
    bias_rows.append(pad_b(_uniform(kb, (width,), bound0)))

    # remaining hidden layers, stacked into one (depth-1, width_p, width_p)
    boundw = 1.0 / math.sqrt(width)
    if depth > 1:
        hid = []
        for i in range(1, depth):
            kw, kb = jax.random.split(keys[i])
            hid.append(pad_w(_uniform(kw, (width, width), boundw),
                             width_p, width_p))
            bias_rows.append(pad_b(_uniform(kb, (width,), boundw)))
        refs.append(jnp.stack(hid, axis=0))                        # W_hidden

    # mu head
    kw, kb = jax.random.split(keys[depth])
    refs.append(pad_w(_uniform(kw, (width, output_dim), boundw),
                      width_p, out_p))                             # W_mu
    bias_rows.append(pad_b(_uniform(kb, (output_dim,), boundw)))

    # log_var head (absent when forced_log_var is used)
    if has_log_var_head:
        kw, kb = jax.random.split(keys[depth + 1])
        refs.append(pad_w(_uniform(kw, (width, output_dim), boundw),
                          width_p, out_p))                         # W_lv
        bias_rows.append(pad_b(_uniform(kb, (output_dim,), boundw)))

    refs.append(jnp.stack(bias_rows, axis=0))                      # biases f32

    meta = dict(n_hidden=depth, width_p=width_p, out_p=out_p,
                has_lv=has_log_var_head, n_refs=len(refs))
    return refs, meta


def init_cvae(key, condition_dim, target_dim, latent_dim, width, depth,
              forced_log_var=None):
    k_enc, k_dec = jax.random.split(key)
    enc_refs, enc_meta = init_gaussian_module(
        k_enc, condition_dim, target_dim, latent_dim, width, depth * 2)
    dec_refs, dec_meta = init_gaussian_module(
        k_dec, condition_dim, latent_dim, target_dim, width, depth,
        has_log_var_head=(forced_log_var is None))
    return dict(encoder_refs=enc_refs, encoder_meta=enc_meta,
                decoder_refs=dec_refs, decoder_meta=dec_meta,
                forced_log_var=forced_log_var,
                dims=dict(condition_dim=condition_dim, target_dim=target_dim,
                          latent_dim=latent_dim, width=width, depth=depth))


# ------------------------------ model forward ------------------------------ #

def _pick_batch_tile(B):
    """>=2 grid steps when possible (v7x megacore), >=128-row tiles preferred,
    multiple of 8 sublanes (f32 I/O)."""
    if B % 8 != 0:
        return B                                 # full-array block (exempt)
    for t in (1024, 512, 256, 128):              # tall MXU-friendly tiles
        if B % t == 0 and B // t >= 2:
            return t
    half = B // 2
    if B >= 16 and half % 8 == 0:
        return half
    return B


def cvae_forward(params, c, x, eps, batch_tile=None):
    """Returns [z_mu, z_log_var, z, x_mu, x_log_var] (matches torch forward)."""
    dims = params["dims"]
    B = c.shape[0]
    cond, tgt, lat = dims["condition_dim"], dims["target_dim"], dims["latent_dim"]
    cond_p, tgt_p, lat_p = (_pad_to(cond, LANE), _pad_to(tgt, LANE),
                            _pad_to(lat, LANE))
    slab_w = 3 * lat_p + 2 * tgt_p

    # zero-pad the feature (lane) axis of the batch inputs; I/O stays f32.
    def pad_lanes(a, n_p):
        a = a.astype(jnp.float32)
        n = a.shape[1]
        return a if n == n_p else jnp.pad(a, ((0, 0), (0, n_p - n)))

    c_p = pad_lanes(c, cond_p)
    x_p = pad_lanes(x, tgt_p)
    eps_p = pad_lanes(eps, lat_p)

    enc_refs, dec_refs = params["encoder_refs"], params["decoder_refs"]
    weight_bytes = sum(int(w.size) * w.dtype.itemsize
                       for w in (*enc_refs, *dec_refs))

    # --- batch tiling & explicit VMEM budget -------------------------------
    bt = batch_tile
    if bt is None or B % bt != 0 or (bt % 8 != 0 and bt != B):
        bt = _pick_batch_tile(B)

    def est_vmem(t):
        io = 2 * 4 * t * (cond_p + tgt_p + lat_p + slab_w)  # dbl-buffered f32 I/O
        return io + 2 * weight_bytes                        # conservative weights

    while est_vmem(bt) > _VMEM_BUDGET and bt % 16 == 0 and bt > 8:
        bt //= 2
    vmem_limit = int(min(max(est_vmem(bt) * 1.25, 16 << 20), 48 << 20))

    grid = (B // bt,)

    def batch_spec(w):
        return pl.BlockSpec((bt, w), lambda i: (i, 0))

    def const_spec(shape, single_buffer):
        nd = len(shape)
        idx_map = lambda i, _nd=nd: (0,) * _nd
        if single_buffer:
            # constant index map across the grid -> nothing to prefetch
            return pl.BlockSpec(shape, idx_map, pipeline_mode=pl.Buffered(1))
        return pl.BlockSpec(shape, idx_map)

    kernel = _make_cvae_kernel(params["encoder_meta"], params["decoder_meta"],
                               params["forced_log_var"], lat_p, tgt_p)
    out_shape = jax.ShapeDtypeStruct((B, slab_w), jnp.float32)
    out_spec = batch_spec(slab_w)

    def build_call(single_buffer):
        in_specs = [batch_spec(cond_p), batch_spec(tgt_p), batch_spec(lat_p)]
        in_specs += [const_spec(w.shape, single_buffer) for w in enc_refs]
        in_specs += [const_spec(w.shape, single_buffer) for w in dec_refs]
        return pl.pallas_call(
            kernel,
            out_shape=out_shape,
            grid=grid,
            in_specs=in_specs,
            out_specs=out_spec,
            compiler_params=pltpu.CompilerParams(
                dimension_semantics=("parallel",),
                vmem_limit_bytes=vmem_limit),
        )

    args = (c_p, x_p, eps_p, *enc_refs, *dec_refs)
    try:
        slab = build_call(single_buffer=True)(*args)
    except Exception:
        # Fallback if this jax/Mosaic version rejects Buffered(1) weight refs.
        slab = build_call(single_buffer=False)(*args)

    dt = c.dtype
    z_mu = slab[:, 0:lat].astype(dt)
    z_lv = slab[:, lat_p:lat_p + lat].astype(dt)
    z = slab[:, 2 * lat_p:2 * lat_p + lat].astype(dt)
    x_mu = slab[:, 3 * lat_p:3 * lat_p + tgt].astype(dt)
    x_lv = slab[:, 3 * lat_p + tgt_p:3 * lat_p + tgt_p + tgt].astype(dt)
    return [z_mu, z_lv, z, x_mu, x_lv]


# ---------------------------------- main ----------------------------------- #

if __name__ == "__main__":
    # Small, shape-consistent configuration.
    batch = 8
    condition_dim = 8
    target_dim = 8
    latent_dim = 4
    width = 32
    depth = 2

    key = jax.random.PRNGKey(0)
    k_params, k_c, k_x, k_eps, k_params2 = jax.random.split(key, 5)

    c = jax.random.normal(k_c, (batch, condition_dim), jnp.float32)
    x = jax.random.normal(k_x, (batch, target_dim), jnp.float32)
    # eps drawn host-side (torch.randn_like equivalent inside P_MODEL.sample).
    eps = jax.random.normal(k_eps, (batch, latent_dim), jnp.float32)

    # Default model (learned log_var head on the decoder).
    params = init_cvae(k_params, condition_dim, target_dim, latent_dim,
                       width, depth)
    outs = jax.block_until_ready(cvae_forward(params, c, x, eps))

    z_mu, z_log_var, z, x_mu, x_log_var = outs
    assert z_mu.shape == (batch, latent_dim)
    assert z_log_var.shape == (batch, latent_dim)
    assert z.shape == (batch, latent_dim)
    assert x_mu.shape == (batch, target_dim)
    assert x_log_var.shape == (batch, target_dim)
    assert all(bool(jnp.all(jnp.isfinite(o))) for o in outs)

    # Slab-packing / reparameterization consistency check (f32 in-kernel math).
    z_check = z_mu + jnp.exp(0.5 * z_log_var) * eps
    assert bool(jnp.allclose(z, z_check, atol=1e-3, rtol=1e-3))

    # Exercise the forced_log_var path (constant folded into the kernel).
    params_f = init_cvae(k_params2, condition_dim, target_dim, latent_dim,
                         width, depth, forced_log_var=-2.0)
    outs_f = jax.block_until_ready(cvae_forward(params_f, c, x, eps))
    assert bool(jnp.all(outs_f[4] == -2.0))

    print("KERNEL_OK")
</pallas_src>

<mosaic_0001>
module attributes {stable_mosaic.version = 11 : i64} {
  func.func @kernel(%arg0: i32, %arg1: memref<8x128xf32, #tpu.memory_space<vmem>>, %arg2: memref<8x128xf32, #tpu.memory_space<vmem>>, %arg3: memref<8x128xf32, #tpu.memory_space<vmem>>, %arg4: memref<128x128xbf16, #tpu.memory_space<vmem>>, %arg5: memref<128x128xbf16, #tpu.memory_space<vmem>>, %arg6: memref<3x128x128xbf16, #tpu.memory_space<vmem>>, %arg7: memref<128x128xbf16, #tpu.memory_space<vmem>>, %arg8: memref<128x128xbf16, #tpu.memory_space<vmem>>, %arg9: memref<6x128xf32, #tpu.memory_space<vmem>>, %arg10: memref<128x128xbf16, #tpu.memory_space<vmem>>, %arg11: memref<128x128xbf16, #tpu.memory_space<vmem>>, %arg12: memref<1x128x128xbf16, #tpu.memory_space<vmem>>, %arg13: memref<128x128xbf16, #tpu.memory_space<vmem>>, %arg14: memref<128x128xbf16, #tpu.memory_space<vmem>>, %arg15: memref<4x128xf32, #tpu.memory_space<vmem>>, %arg16: memref<8x640xf32, #tpu.memory_space<vmem>>) attributes {dimension_semantics = [#tpu.dimension_semantics<parallel>], iteration_bounds = array<i64: 1>, scalar_prefetch = 0 : i64, scratch_operands = 0 : i64, tpu.core_type = #tpu.core_type<tc>, window_params = [{transform_indices = @transform_0, window_bounds = array<i64: 8, 128>}, {transform_indices = @transform_1, window_bounds = array<i64: 8, 128>}, {transform_indices = @transform_2, window_bounds = array<i64: 8, 128>}, {pipeline_mode = #tpu.pipeline_mode<synchronous>, transform_indices = @transform_3, window_bounds = array<i64: 128, 128>}, {pipeline_mode = #tpu.pipeline_mode<synchronous>, transform_indices = @transform_4, window_bounds = array<i64: 128, 128>}, {pipeline_mode = #tpu.pipeline_mode<synchronous>, transform_indices = @transform_5, window_bounds = array<i64: 3, 128, 128>}, {pipeline_mode = #tpu.pipeline_mode<synchronous>, transform_indices = @transform_6, window_bounds = array<i64: 128, 128>}, {pipeline_mode = #tpu.pipeline_mode<synchronous>, transform_indices = @transform_7, window_bounds = array<i64: 128, 128>}, {pipeline_mode = #tpu.pipeline_mode<synchronous>, transform_indices = @transform_8, window_bounds = array<i64: 6, 128>}, {pipeline_mode = #tpu.pipeline_mode<synchronous>, transform_indices = @transform_9, window_bounds = array<i64: 128, 128>}, {pipeline_mode = #tpu.pipeline_mode<synchronous>, transform_indices = @transform_10, window_bounds = array<i64: 128, 128>}, {pipeline_mode = #tpu.pipeline_mode<synchronous>, transform_indices = @transform_11, window_bounds = array<i64: 1, 128, 128>}, {pipeline_mode = #tpu.pipeline_mode<synchronous>, transform_indices = @transform_12, window_bounds = array<i64: 128, 128>}, {pipeline_mode = #tpu.pipeline_mode<synchronous>, transform_indices = @transform_13, window_bounds = array<i64: 128, 128>}, {pipeline_mode = #tpu.pipeline_mode<synchronous>, transform_indices = @transform_14, window_bounds = array<i64: 4, 128>}, {transform_indices = @transform_15, window_bounds = array<i64: 8, 640>}]} {
    %c0 = arith.constant 0 : index
    %c0_0 = arith.constant 0 : index
    %0 = vector.load %arg1[%c0, %c0_0] : memref<8x128xf32, #tpu.memory_space<vmem>>, vector<8x128xf32>
    %1 = arith.truncf %0 : vector<8x128xf32> to vector<8x128xbf16>
    %c0_1 = arith.constant 0 : index
    %c0_2 = arith.constant 0 : index
    %2 = vector.load %arg2[%c0_1, %c0_2] : memref<8x128xf32, #tpu.memory_space<vmem>>, vector<8x128xf32>
    %3 = arith.truncf %2 : vector<8x128xf32> to vector<8x128xbf16>
    %c0_3 = arith.constant 0 : index
    %c0_4 = arith.constant 0 : index
    %4 = vector.load %arg4[%c0_3, %c0_4] : memref<128x128xbf16, #tpu.memory_space<vmem>>, vector<128x128xbf16>
    %cst = arith.constant dense<0.000000e+00> : vector<8x128xf32>
    %5 = tpu.matmul %1, %4, %cst {dimension_numbers = #tpu.dot_dimension_numbers<[1], [0], [0], [1], [0, 0, 1, 1], [], []>} : vector<8x128xbf16>, vector<128x128xbf16>, vector<8x128xf32> -> vector<8x128xf32>
    %c0_5 = arith.constant 0 : index
    %c0_6 = arith.constant 0 : index
    %6 = vector.load %arg5[%c0_5, %c0_6] : memref<128x128xbf16, #tpu.memory_space<vmem>>, vector<128x128xbf16>
    %cst_7 = arith.constant dense<0.000000e+00> : vector<8x128xf32>
    %7 = tpu.matmul %3, %6, %cst_7 {dimension_numbers = #tpu.dot_dimension_numbers<[1], [0], [0], [1], [0, 0, 1, 1], [], []>} : vector<8x128xbf16>, vector<128x128xbf16>, vector<8x128xf32> -> vector<8x128xf32>
    %8 = arith.addf %5, %7 : vector<8x128xf32>
    %c0_8 = arith.constant 0 : index
    %c0_9 = arith.constant 0 : index
    %9 = vector.load %arg9[%c0_8, %c0_9] : memref<6x128xf32, #tpu.memory_space<vmem>>, vector<1x128xf32>
    %10 = vector.broadcast %9 : vector<1x128xf32> to vector<8x128xf32>
    %11 = arith.addf %8, %10 : vector<8x128xf32>
    %cst_10 = arith.constant 0.00999999977 : f32
    %12 = vector.broadcast %cst_10 : f32 to vector<8x128xf32>
    %13 = arith.mulf %12, %11 : vector<8x128xf32>
    %14 = arith.maximumf %11, %13 : vector<8x128xf32>
    %15 = arith.truncf %14 : vector<8x128xf32> to vector<8x128xbf16>
    %c0_11 = arith.constant 0 : index
    %c0_12 = arith.constant 0 : index
    %c0_13 = arith.constant 0 : index
    %16 = vector.load %arg6[%c0_11, %c0_12, %c0_13] : memref<3x128x128xbf16, #tpu.memory_space<vmem>>, vector<1x128x128xbf16>
    %17 = vector.shape_cast %16 : vector<1x128x128xbf16> to vector<128x128xbf16>
    %cst_14 = arith.constant dense<0.000000e+00> : vector<8x128xf32>
    %18 = tpu.matmul %15, %17, %cst_14 {dimension_numbers = #tpu.dot_dimension_numbers<[1], [0], [0], [1], [0, 0, 1, 1], [], []>} : vector<8x128xbf16>, vector<128x128xbf16>, vector<8x128xf32> -> vector<8x128xf32>
    %c1 = arith.constant 1 : index
    %c0_15 = arith.constant 0 : index
    %19 = vector.load %arg9[%c1, %c0_15] : memref<6x128xf32, #tpu.memory_space<vmem>>, vector<1x128xf32>
    %20 = vector.broadcast %19 : vector<1x128xf32> to vector<8x128xf32>
    %21 = arith.addf %18, %20 : vector<8x128xf32>
    %cst_16 = arith.constant 0.00999999977 : f32
    %22 = vector.broadcast %cst_16 : f32 to vector<8x128xf32>
    %23 = arith.mulf %22, %21 : vector<8x128xf32>
    %24 = arith.maximumf %21, %23 : vector<8x128xf32>
    %25 = arith.truncf %24 : vector<8x128xf32> to vector<8x128xbf16>
    %c1_17 = arith.constant 1 : index
    %c0_18 = arith.constant 0 : index
    %c0_19 = arith.constant 0 : index
    %26 = vector.load %arg6[%c1_17, %c0_18, %c0_19] : memref<3x128x128xbf16, #tpu.memory_space<vmem>>, vector<1x128x128xbf16>
    %27 = vector.shape_cast %26 : vector<1x128x128xbf16> to vector<128x128xbf16>
    %cst_20 = arith.constant dense<0.000000e+00> : vector<8x128xf32>
    %28 = tpu.matmul %25, %27, %cst_20 {dimension_numbers = #tpu.dot_dimension_numbers<[1], [0], [0], [1], [0, 0, 1, 1], [], []>} : vector<8x128xbf16>, vector<128x128xbf16>, vector<8x128xf32> -> vector<8x128xf32>
    %c2 = arith.constant 2 : index
    %c0_21 = arith.constant 0 : index
    %29 = vector.load %arg9[%c2, %c0_21] : memref<6x128xf32, #tpu.memory_space<vmem>>, vector<1x128xf32>
    %30 = vector.broadcast %29 : vector<1x128xf32> to vector<8x128xf32>
    %31 = arith.addf %28, %30 : vector<8x128xf32>
    %cst_22 = arith.constant 0.00999999977 : f32
    %32 = vector.broadcast %cst_22 : f32 to vector<8x128xf32>
    %33 = arith.mulf %32, %31 : vector<8x128xf32>
    %34 = arith.maximumf %31, %33 : vector<8x128xf32>
    %35 = arith.truncf %34 : vector<8x128xf32> to vector<8x128xbf16>
    %c2_23 = arith.constant 2 : index
    %c0_24 = arith.constant 0 : index
    %c0_25 = arith.constant 0 : index
    %36 = vector.load %arg6[%c2_23, %c0_24, %c0_25] : memref<3x128x128xbf16, #tpu.memory_space<vmem>>, vector<1x128x128xbf16>
    %37 = vector.shape_cast %36 : vector<1x128x128xbf16> to vector<128x128xbf16>
    %cst_26 = arith.constant dense<0.000000e+00> : vector<8x128xf32>
    %38 = tpu.matmul %35, %37, %cst_26 {dimension_numbers = #tpu.dot_dimension_numbers<[1], [0], [0], [1], [0, 0, 1, 1], [], []>} : vector<8x128xbf16>, vector<128x128xbf16>, vector<8x128xf32> -> vector<8x128xf32>
    %c3 = arith.constant 3 : index
    %c0_27 = arith.constant 0 : index
    %39 = vector.load %arg9[%c3, %c0_27] : memref<6x128xf32, #tpu.memory_space<vmem>>, vector<1x128xf32>
    %40 = vector.broadcast %39 : vector<1x128xf32> to vector<8x128xf32>
    %41 = arith.addf %38, %40 : vector<8x128xf32>
    %cst_28 = arith.constant 0.00999999977 : f32
    %42 = vector.broadcast %cst_28 : f32 to vector<8x128xf32>
    %43 = arith.mulf %42, %41 : vector<8x128xf32>
    %44 = arith.maximumf %41, %43 : vector<8x128xf32>
    %45 = arith.truncf %44 : vector<8x128xf32> to vector<8x128xbf16>
    %c0_29 = arith.constant 0 : index
    %c0_30 = arith.constant 0 : index
    %46 = vector.load %arg7[%c0_29, %c0_30] : memref<128x128xbf16, #tpu.memory_space<vmem>>, vector<128x128xbf16>
    %cst_31 = arith.constant dense<0.000000e+00> : vector<8x128xf32>
    %47 = tpu.matmul %45, %46, %cst_31 {dimension_numbers = #tpu.dot_dimension_numbers<[1], [0], [0], [1], [0, 0, 1, 1], [], []>} : vector<8x128xbf16>, vector<128x128xbf16>, vector<8x128xf32> -> vector<8x128xf32>
    %c4 = arith.constant 4 : index
    %c0_32 = arith.constant 0 : index
    %48 = vector.load %arg9[%c4, %c0_32] : memref<6x128xf32, #tpu.memory_space<vmem>>, vector<1x128xf32>
    %49 = vector.broadcast %48 : vector<1x128xf32> to vector<8x128xf32>
    %50 = arith.addf %47, %49 : vector<8x128xf32>
    %c0_33 = arith.constant 0 : index
    %c0_34 = arith.constant 0 : index
    %51 = vector.load %arg8[%c0_33, %c0_34] : memref<128x128xbf16, #tpu.memory_space<vmem>>, vector<128x128xbf16>
    %cst_35 = arith.constant dense<0.000000e+00> : vector<8x128xf32>
    %52 = tpu.matmul %45, %51, %cst_35 {dimension_numbers = #tpu.dot_dimension_numbers<[1], [0], [0], [1], [0, 0, 1, 1], [], []>} : vector<8x128xbf16>, vector<128x128xbf16>, vector<8x128xf32> -> vector<8x128xf32>
    %c5 = arith.constant 5 : index
    %c0_36 = arith.constant 0 : index
    %53 = vector.load %arg9[%c5, %c0_36] : memref<6x128xf32, #tpu.memory_space<vmem>>, vector<1x128xf32>
    %54 = vector.broadcast %53 : vector<1x128xf32> to vector<8x128xf32>
    %55 = arith.addf %52, %54 : vector<8x128xf32>
    %cst_37 = arith.constant 5.000000e-01 : f32
    %56 = vector.broadcast %cst_37 : f32 to vector<8x128xf32>
    %57 = arith.mulf %56, %55 : vector<8x128xf32>
    %58 = math.exp %57 : vector<8x128xf32>
    %c0_38 = arith.constant 0 : index
    %c0_39 = arith.constant 0 : index
    %59 = vector.load %arg3[%c0_38, %c0_39] : memref<8x128xf32, #tpu.memory_space<vmem>>, vector<8x128xf32>
    %60 = arith.mulf %58, %59 : vector<8x128xf32>
    %61 = arith.addf %50, %60 : vector<8x128xf32>
    %62 = arith.truncf %61 : vector<8x128xf32> to vector<8x128xbf16>
    %c0_40 = arith.constant 0 : index
    %c0_41 = arith.constant 0 : index
    %63 = vector.load %arg10[%c0_40, %c0_41] : memref<128x128xbf16, #tpu.memory_space<vmem>>, vector<128x128xbf16>
    %cst_42 = arith.constant dense<0.000000e+00> : vector<8x128xf32>
    %64 = tpu.matmul %1, %63, %cst_42 {dimension_numbers = #tpu.dot_dimension_numbers<[1], [0], [0], [1], [0, 0, 1, 1], [], []>} : vector<8x128xbf16>, vector<128x128xbf16>, vector<8x128xf32> -> vector<8x128xf32>
    %c0_43 = arith.constant 0 : index
    %c0_44 = arith.constant 0 : index
    %65 = vector.load %arg11[%c0_43, %c0_44] : memref<128x128xbf16, #tpu.memory_space<vmem>>, vector<128x128xbf16>
    %cst_45 = arith.constant dense<0.000000e+00> : vector<8x128xf32>
    %66 = tpu.matmul %62, %65, %cst_45 {dimension_numbers = #tpu.dot_dimension_numbers<[1], [0], [0], [1], [0, 0, 1, 1], [], []>} : vector<8x128xbf16>, vector<128x128xbf16>, vector<8x128xf32> -> vector<8x128xf32>
    %67 = arith.addf %64, %66 : vector<8x128xf32>
    %c0_46 = arith.constant 0 : index
    %c0_47 = arith.constant 0 : index
    %68 = vector.load %arg15[%c0_46, %c0_47] : memref<4x128xf32, #tpu.memory_space<vmem>>, vector<1x128xf32>
    %69 = vector.broadcast %68 : vector<1x128xf32> to vector<8x128xf32>
    %70 = arith.addf %67, %69 : vector<8x128xf32>
    %cst_48 = arith.constant 0.00999999977 : f32
    %71 = vector.broadcast %cst_48 : f32 to vector<8x128xf32>
    %72 = arith.mulf %71, %70 : vector<8x128xf32>
    %73 = arith.maximumf %70, %72 : vector<8x128xf32>
    %74 = arith.truncf %73 : vector<8x128xf32> to vector<8x128xbf16>
    %c0_49 = arith.constant 0 : index
    %c0_50 = arith.constant 0 : index
    %c0_51 = arith.constant 0 : index
    %75 = vector.load %arg12[%c0_49, %c0_50, %c0_51] : memref<1x128x128xbf16, #tpu.memory_space<vmem>>, vector<1x128x128xbf16>
    %76 = vector.shape_cast %75 : vector<1x128x128xbf16> to vector<128x128xbf16>
    %cst_52 = arith.constant dense<0.000000e+00> : vector<8x128xf32>
    %77 = tpu.matmul %74, %76, %cst_52 {dimension_numbers = #tpu.dot_dimension_numbers<[1], [0], [0], [1], [0, 0, 1, 1], [], []>} : vector<8x128xbf16>, vector<128x128xbf16>, vector<8x128xf32> -> vector<8x128xf32>
    %c1_53 = arith.constant 1 : index
    %c0_54 = arith.constant 0 : index
    %78 = vector.load %arg15[%c1_53, %c0_54] : memref<4x128xf32, #tpu.memory_space<vmem>>, vector<1x128xf32>
    %79 = vector.broadcast %78 : vector<1x128xf32> to vector<8x128xf32>
    %80 = arith.addf %77, %79 : vector<8x128xf32>
    %cst_55 = arith.constant 0.00999999977 : f32
    %81 = vector.broadcast %cst_55 : f32 to vector<8x128xf32>
    %82 = arith.mulf %81, %80 : vector<8x128xf32>
    %83 = arith.maximumf %80, %82 : vector<8x128xf32>
    %84 = arith.truncf %83 : vector<8x128xf32> to vector<8x128xbf16>
    %c0_56 = arith.constant 0 : index
    %c0_57 = arith.constant 0 : index
    %85 = vector.load %arg13[%c0_56, %c0_57] : memref<128x128xbf16, #tpu.memory_space<vmem>>, vector<128x128xbf16>
    %cst_58 = arith.constant dense<0.000000e+00> : vector<8x128xf32>
    %86 = tpu.matmul %84, %85, %cst_58 {dimension_numbers = #tpu.dot_dimension_numbers<[1], [0], [0], [1], [0, 0, 1, 1], [], []>} : vector<8x128xbf16>, vector<128x128xbf16>, vector<8x128xf32> -> vector<8x128xf32>
    %c2_59 = arith.constant 2 : index
    %c0_60 = arith.constant 0 : index
    %87 = vector.load %arg15[%c2_59, %c0_60] : memref<4x128xf32, #tpu.memory_space<vmem>>, vector<1x128xf32>
    %88 = vector.broadcast %87 : vector<1x128xf32> to vector<8x128xf32>
    %89 = arith.addf %86, %88 : vector<8x128xf32>
    %c0_61 = arith.constant 0 : index
    %c0_62 = arith.constant 0 : index
    %90 = vector.load %arg14[%c0_61, %c0_62] : memref<128x128xbf16, #tpu.memory_space<vmem>>, vector<128x128xbf16>
    %cst_63 = arith.constant dense<0.000000e+00> : vector<8x128xf32>
    %91 = tpu.matmul %84, %90, %cst_63 {dimension_numbers = #tpu.dot_dimension_numbers<[1], [0], [0], [1], [0, 0, 1, 1], [], []>} : vector<8x128xbf16>, vector<128x128xbf16>, vector<8x128xf32> -> vector<8x128xf32>
    %c3_64 = arith.constant 3 : index
    %c0_65 = arith.constant 0 : index
    %92 = vector.load %arg15[%c3_64, %c0_65] : memref<4x128xf32, #tpu.memory_space<vmem>>, vector<1x128xf32>
    %93 = vector.broadcast %92 : vector<1x128xf32> to vector<8x128xf32>
    %94 = arith.addf %91, %93 : vector<8x128xf32>
    %c0_66 = arith.constant 0 : index
    %c0_67 = arith.constant 0 : index
    %95 = vector.load %arg16[%c0_66, %c0_67] : memref<8x640xf32, #tpu.memory_space<vmem>>, vector<8x128xf32>
    tpu.vector_store %arg16[%c0_66, %c0_67], %50 {strides = array<i32>} : memref<8x640xf32, #tpu.memory_space<vmem>>, vector<8x128xf32>,
    %c0_68 = arith.constant 0 : index
    %c128 = arith.constant 128 : index
    %96 = vector.load %arg16[%c0_68, %c128] : memref<8x640xf32, #tpu.memory_space<vmem>>, vector<8x128xf32>
    tpu.vector_store %arg16[%c0_68, %c128], %55 {strides = array<i32>} : memref<8x640xf32, #tpu.memory_space<vmem>>, vector<8x128xf32>,
    %c0_69 = arith.constant 0 : index
    %c256 = arith.constant 256 : index
    %97 = vector.load %arg16[%c0_69, %c256] : memref<8x640xf32, #tpu.memory_space<vmem>>, vector<8x128xf32>
    tpu.vector_store %arg16[%c0_69, %c256], %61 {strides = array<i32>} : memref<8x640xf32, #tpu.memory_space<vmem>>, vector<8x128xf32>,
    %c0_70 = arith.constant 0 : index
    %c384 = arith.constant 384 : index
    %98 = vector.load %arg16[%c0_70, %c384] : memref<8x640xf32, #tpu.memory_space<vmem>>, vector<8x128xf32>
    tpu.vector_store %arg16[%c0_70, %c384], %89 {strides = array<i32>} : memref<8x640xf32, #tpu.memory_space<vmem>>, vector<8x128xf32>,
    %c0_71 = arith.constant 0 : index
    %c512 = arith.constant 512 : index
    %99 = vector.load %arg16[%c0_71, %c512] : memref<8x640xf32, #tpu.memory_space<vmem>>, vector<8x128xf32>
    tpu.vector_store %arg16[%c0_71, %c512], %94 {strides = array<i32>} : memref<8x640xf32, #tpu.memory_space<vmem>>, vector<8x128xf32>,
    return
  }
  func.func @transform_0(%arg0: i32) -> (i32, i32) {
    %c0_i32 = arith.constant 0 : i32
    %c0_i32_0 = arith.constant 0 : i32
    return %arg0, %c0_i32 : i32, i32
  }
  func.func @transform_1(%arg0: i32) -> (i32, i32) {
    %c0_i32 = arith.constant 0 : i32
    %c0_i32_0 = arith.constant 0 : i32
    return %arg0, %c0_i32 : i32, i32
  }
  func.func @transform_2(%arg0: i32) -> (i32, i32) {
    %c0_i32 = arith.constant 0 : i32
    %c0_i32_0 = arith.constant 0 : i32
    return %arg0, %c0_i32 : i32, i32
  }
  func.func @transform_3(%arg0: i32) -> (i32, i32) {
    %c0_i32 = arith.constant 0 : i32
    %c0_i32_0 = arith.constant 0 : i32
    %c0_i32_1 = arith.constant 0 : i32
    return %c0_i32, %c0_i32_0 : i32, i32
  }
  func.func @transform_4(%arg0: i32) -> (i32, i32) {
    %c0_i32 = arith.constant 0 : i32
    %c0_i32_0 = arith.constant 0 : i32
    %c0_i32_1 = arith.constant 0 : i32
    return %c0_i32, %c0_i32_0 : i32, i32
  }
  func.func @transform_5(%arg0: i32) -> (i32, i32, i32) {
    %c0_i32 = arith.constant 0 : i32
    %c0_i32_0 = arith.constant 0 : i32
    %c0_i32_1 = arith.constant 0 : i32
    %c0_i32_2 = arith.constant 0 : i32
    return %c0_i32, %c0_i32_0, %c0_i32_1 : i32, i32, i32
  }
  func.func @transform_6(%arg0: i32) -> (i32, i32) {
    %c0_i32 = arith.constant 0 : i32
    %c0_i32_0 = arith.constant 0 : i32
    %c0_i32_1 = arith.constant 0 : i32
    return %c0_i32, %c0_i32_0 : i32, i32
  }
  func.func @transform_7(%arg0: i32) -> (i32, i32) {
    %c0_i32 = arith.constant 0 : i32
    %c0_i32_0 = arith.constant 0 : i32
    %c0_i32_1 = arith.constant 0 : i32
    return %c0_i32, %c0_i32_0 : i32, i32
  }
  func.func @transform_8(%arg0: i32) -> (i32, i32) {
    %c0_i32 = arith.constant 0 : i32
    %c0_i32_0 = arith.constant 0 : i32
    %c0_i32_1 = arith.constant 0 : i32
    return %c0_i32, %c0_i32_0 : i32, i32
  }
  func.func @transform_9(%arg0: i32) -> (i32, i32) {
    %c0_i32 = arith.constant 0 : i32
    %c0_i32_0 = arith.constant 0 : i32
    %c0_i32_1 = arith.constant 0 : i32
    return %c0_i32, %c0_i32_0 : i32, i32
  }
  func.func @transform_10(%arg0: i32) -> (i32, i32) {
    %c0_i32 = arith.constant 0 : i32
    %c0_i32_0 = arith.constant 0 : i32
    %c0_i32_1 = arith.constant 0 : i32
    return %c0_i32, %c0_i32_0 : i32, i32
  }
  func.func @transform_11(%arg0: i32) -> (i32, i32, i32) {
    %c0_i32 = arith.constant 0 : i32
    %c0_i32_0 = arith.constant 0 : i32
    %c0_i32_1 = arith.constant 0 : i32
    %c0_i32_2 = arith.constant 0 : i32
    return %c0_i32, %c0_i32_0, %c0_i32_1 : i32, i32, i32
  }
  func.func @transform_12(%arg0: i32) -> (i32, i32) {
    %c0_i32 = arith.constant 0 : i32
    %c0_i32_0 = arith.constant 0 : i32
    %c0_i32_1 = arith.constant 0 : i32
    return %c0_i32, %c0_i32_0 : i32, i32
  }
  func.func @transform_13(%arg0: i32) -> (i32, i32) {
    %c0_i32 = arith.constant 0 : i32
    %c0_i32_0 = arith.constant 0 : i32
    %c0_i32_1 = arith.constant 0 : i32
    return %c0_i32, %c0_i32_0 : i32, i32
  }
  func.func @transform_14(%arg0: i32) -> (i32, i32) {
    %c0_i32 = arith.constant 0 : i32
    %c0_i32_0 = arith.constant 0 : i32
    %c0_i32_1 = arith.constant 0 : i32
    return %c0_i32, %c0_i32_0 : i32, i32
  }
  func.func @transform_15(%arg0: i32) -> (i32, i32) {
    %c0_i32 = arith.constant 0 : i32
    %c0_i32_0 = arith.constant 0 : i32
    return %arg0, %c0_i32 : i32, i32
  }
}

module attributes {stable_mosaic.version = 11 : i64} {
  func.func @kernel(%arg0: i32, %arg1: memref<8x128xf32, #tpu.memory_space<vmem>>, %arg2: memref<8x128xf32, #tpu.memory_space<vmem>>, %arg3: memref<8x128xf32, #tpu.memory_space<vmem>>, %arg4: memref<128x128xbf16, #tpu.memory_space<vmem>>, %arg5: memref<128x128xbf16, #tpu.memory_space<vmem>>, %arg6: memref<3x128x128xbf16, #tpu.memory_space<vmem>>, %arg7: memref<128x128xbf16, #tpu.memory_space<vmem>>, %arg8: memref<128x128xbf16, #tpu.memory_space<vmem>>, %arg9: memref<6x128xf32, #tpu.memory_space<vmem>>, %arg10: memref<128x128xbf16, #tpu.memory_space<vmem>>, %arg11: memref<128x128xbf16, #tpu.memory_space<vmem>>, %arg12: memref<1x128x128xbf16, #tpu.memory_space<vmem>>, %arg13: memref<128x128xbf16, #tpu.memory_space<vmem>>, %arg14: memref<128x128xbf16, #tpu.memory_space<vmem>>, %arg15: memref<4x128xf32, #tpu.memory_space<vmem>>, %arg16: memref<8x640xf32, #tpu.memory_space<vmem>>) attributes {dimension_semantics = [#tpu.dimension_semantics<parallel>], iteration_bounds = array<i64: 1>, scalar_prefetch = 0 : i64, scratch_operands = 0 : i64, tpu.core_type = #tpu.core_type<tc>, window_params = [{transform_indices = @transform_0, window_bounds = array<i64: 8, 128>}, {transform_indices = @transform_1, window_bounds = array<i64: 8, 128>}, {transform_indices = @transform_2, window_bounds = array<i64: 8, 128>}, {pipeline_mode = #tpu.pipeline_mode<synchronous>, transform_indices = @transform_3, window_bounds = array<i64: 128, 128>}, {pipeline_mode = #tpu.pipeline_mode<synchronous>, transform_indices = @transform_4, window_bounds = array<i64: 128, 128>}, {pipeline_mode = #tpu.pipeline_mode<synchronous>, transform_indices = @transform_5, window_bounds = array<i64: 3, 128, 128>}, {pipeline_mode = #tpu.pipeline_mode<synchronous>, transform_indices = @transform_6, window_bounds = array<i64: 128, 128>}, {pipeline_mode = #tpu.pipeline_mode<synchronous>, transform_indices = @transform_7, window_bounds = array<i64: 128, 128>}, {pipeline_mode = #tpu.pipeline_mode<synchronous>, transform_indices = @transform_8, window_bounds = array<i64: 6, 128>}, {pipeline_mode = #tpu.pipeline_mode<synchronous>, transform_indices = @transform_9, window_bounds = array<i64: 128, 128>}, {pipeline_mode = #tpu.pipeline_mode<synchronous>, transform_indices = @transform_10, window_bounds = array<i64: 128, 128>}, {pipeline_mode = #tpu.pipeline_mode<synchronous>, transform_indices = @transform_11, window_bounds = array<i64: 1, 128, 128>}, {pipeline_mode = #tpu.pipeline_mode<synchronous>, transform_indices = @transform_12, window_bounds = array<i64: 128, 128>}, {pipeline_mode = #tpu.pipeline_mode<synchronous>, transform_indices = @transform_13, window_bounds = array<i64: 128, 128>}, {pipeline_mode = #tpu.pipeline_mode<synchronous>, transform_indices = @transform_14, window_bounds = array<i64: 4, 128>}, {transform_indices = @transform_15, window_bounds = array<i64: 8, 640>}]} {
    %c0 = arith.constant 0 : index
    %c0_0 = arith.constant 0 : index
    %0 = vector.load %arg1[%c0, %c0_0] : memref<8x128xf32, #tpu.memory_space<vmem>>, vector<8x128xf32>
    %1 = arith.truncf %0 : vector<8x128xf32> to vector<8x128xbf16>
    %c0_1 = arith.constant 0 : index
    %c0_2 = arith.constant 0 : index
    %2 = vector.load %arg2[%c0_1, %c0_2] : memref<8x128xf32, #tpu.memory_space<vmem>>, vector<8x128xf32>
    %3 = arith.truncf %2 : vector<8x128xf32> to vector<8x128xbf16>
    %c0_3 = arith.constant 0 : index
    %c0_4 = arith.constant 0 : index
    %4 = vector.load %arg4[%c0_3, %c0_4] : memref<128x128xbf16, #tpu.memory_space<vmem>>, vector<128x128xbf16>
    %cst = arith.constant dense<0.000000e+00> : vector<8x128xf32>
    %5 = tpu.matmul %1, %4, %cst {dimension_numbers = #tpu.dot_dimension_numbers<[1], [0], [0], [1], [0, 0, 1, 1], [], []>} : vector<8x128xbf16>, vector<128x128xbf16>, vector<8x128xf32> -> vector<8x128xf32>
    %c0_5 = arith.constant 0 : index
    %c0_6 = arith.constant 0 : index
    %6 = vector.load %arg5[%c0_5, %c0_6] : memref<128x128xbf16, #tpu.memory_space<vmem>>, vector<128x128xbf16>
    %cst_7 = arith.constant dense<0.000000e+00> : vector<8x128xf32>
    %7 = tpu.matmul %3, %6, %cst_7 {dimension_numbers = #tpu.dot_dimension_numbers<[1], [0], [0], [1], [0, 0, 1, 1], [], []>} : vector<8x128xbf16>, vector<128x128xbf16>, vector<8x128xf32> -> vector<8x128xf32>
    %8 = arith.addf %5, %7 : vector<8x128xf32>
    %c0_8 = arith.constant 0 : index
    %c0_9 = arith.constant 0 : index
    %9 = vector.load %arg9[%c0_8, %c0_9] : memref<6x128xf32, #tpu.memory_space<vmem>>, vector<1x128xf32>
    %10 = vector.broadcast %9 : vector<1x128xf32> to vector<8x128xf32>
    %11 = arith.addf %8, %10 : vector<8x128xf32>
    %cst_10 = arith.constant 0.00999999977 : f32
    %12 = vector.broadcast %cst_10 : f32 to vector<8x128xf32>
    %13 = arith.mulf %12, %11 : vector<8x128xf32>
    %14 = arith.maximumf %11, %13 : vector<8x128xf32>
    %15 = arith.truncf %14 : vector<8x128xf32> to vector<8x128xbf16>
    %c0_11 = arith.constant 0 : index
    %c0_12 = arith.constant 0 : index
    %c0_13 = arith.constant 0 : index
    %16 = vector.load %arg6[%c0_11, %c0_12, %c0_13] : memref<3x128x128xbf16, #tpu.memory_space<vmem>>, vector<1x128x128xbf16>
    %17 = vector.shape_cast %16 : vector<1x128x128xbf16> to vector<128x128xbf16>
    %cst_14 = arith.constant dense<0.000000e+00> : vector<8x128xf32>
    %18 = tpu.matmul %15, %17, %cst_14 {dimension_numbers = #tpu.dot_dimension_numbers<[1], [0], [0], [1], [0, 0, 1, 1], [], []>} : vector<8x128xbf16>, vector<128x128xbf16>, vector<8x128xf32> -> vector<8x128xf32>
    %c1 = arith.constant 1 : index
    %c0_15 = arith.constant 0 : index
    %19 = vector.load %arg9[%c1, %c0_15] : memref<6x128xf32, #tpu.memory_space<vmem>>, vector<1x128xf32>
    %20 = vector.broadcast %19 : vector<1x128xf32> to vector<8x128xf32>
    %21 = arith.addf %18, %20 : vector<8x128xf32>
    %cst_16 = arith.constant 0.00999999977 : f32
    %22 = vector.broadcast %cst_16 : f32 to vector<8x128xf32>
    %23 = arith.mulf %22, %21 : vector<8x128xf32>
    %24 = arith.maximumf %21, %23 : vector<8x128xf32>
    %25 = arith.truncf %24 : vector<8x128xf32> to vector<8x128xbf16>
    %c1_17 = arith.constant 1 : index
    %c0_18 = arith.constant 0 : index
    %c0_19 = arith.constant 0 : index
    %26 = vector.load %arg6[%c1_17, %c0_18, %c0_19] : memref<3x128x128xbf16, #tpu.memory_space<vmem>>, vector<1x128x128xbf16>
    %27 = vector.shape_cast %26 : vector<1x128x128xbf16> to vector<128x128xbf16>
    %cst_20 = arith.constant dense<0.000000e+00> : vector<8x128xf32>
    %28 = tpu.matmul %25, %27, %cst_20 {dimension_numbers = #tpu.dot_dimension_numbers<[1], [0], [0], [1], [0, 0, 1, 1], [], []>} : vector<8x128xbf16>, vector<128x128xbf16>, vector<8x128xf32> -> vector<8x128xf32>
    %c2 = arith.constant 2 : index
    %c0_21 = arith.constant 0 : index
    %29 = vector.load %arg9[%c2, %c0_21] : memref<6x128xf32, #tpu.memory_space<vmem>>, vector<1x128xf32>
    %30 = vector.broadcast %29 : vector<1x128xf32> to vector<8x128xf32>
    %31 = arith.addf %28, %30 : vector<8x128xf32>
    %cst_22 = arith.constant 0.00999999977 : f32
    %32 = vector.broadcast %cst_22 : f32 to vector<8x128xf32>
    %33 = arith.mulf %32, %31 : vector<8x128xf32>
    %34 = arith.maximumf %31, %33 : vector<8x128xf32>
    %35 = arith.truncf %34 : vector<8x128xf32> to vector<8x128xbf16>
    %c2_23 = arith.constant 2 : index
    %c0_24 = arith.constant 0 : index
    %c0_25 = arith.constant 0 : index
    %36 = vector.load %arg6[%c2_23, %c0_24, %c0_25] : memref<3x128x128xbf16, #tpu.memory_space<vmem>>, vector<1x128x128xbf16>
    %37 = vector.shape_cast %36 : vector<1x128x128xbf16> to vector<128x128xbf16>
    %cst_26 = arith.constant dense<0.000000e+00> : vector<8x128xf32>
    %38 = tpu.matmul %35, %37, %cst_26 {dimension_numbers = #tpu.dot_dimension_numbers<[1], [0], [0], [1], [0, 0, 1, 1], [], []>} : vector<8x128xbf16>, vector<128x128xbf16>, vector<8x128xf32> -> vector<8x128xf32>
    %c3 = arith.constant 3 : index
    %c0_27 = arith.constant 0 : index
    %39 = vector.load %arg9[%c3, %c0_27] : memref<6x128xf32, #tpu.memory_space<vmem>>, vector<1x128xf32>
    %40 = vector.broadcast %39 : vector<1x128xf32> to vector<8x128xf32>
    %41 = arith.addf %38, %40 : vector<8x128xf32>
    %cst_28 = arith.constant 0.00999999977 : f32
    %42 = vector.broadcast %cst_28 : f32 to vector<8x128xf32>
    %43 = arith.mulf %42, %41 : vector<8x128xf32>
    %44 = arith.maximumf %41, %43 : vector<8x128xf32>
    %45 = arith.truncf %44 : vector<8x128xf32> to vector<8x128xbf16>
    %c0_29 = arith.constant 0 : index
    %c0_30 = arith.constant 0 : index
    %46 = vector.load %arg7[%c0_29, %c0_30] : memref<128x128xbf16, #tpu.memory_space<vmem>>, vector<128x128xbf16>
    %cst_31 = arith.constant dense<0.000000e+00> : vector<8x128xf32>
    %47 = tpu.matmul %45, %46, %cst_31 {dimension_numbers = #tpu.dot_dimension_numbers<[1], [0], [0], [1], [0, 0, 1, 1], [], []>} : vector<8x128xbf16>, vector<128x128xbf16>, vector<8x128xf32> -> vector<8x128xf32>
    %c4 = arith.constant 4 : index
    %c0_32 = arith.constant 0 : index
    %48 = vector.load %arg9[%c4, %c0_32] : memref<6x128xf32, #tpu.memory_space<vmem>>, vector<1x128xf32>
    %49 = vector.broadcast %48 : vector<1x128xf32> to vector<8x128xf32>
    %50 = arith.addf %47, %49 : vector<8x128xf32>
    %c0_33 = arith.constant 0 : index
    %c0_34 = arith.constant 0 : index
    %51 = vector.load %arg8[%c0_33, %c0_34] : memref<128x128xbf16, #tpu.memory_space<vmem>>, vector<128x128xbf16>
    %cst_35 = arith.constant dense<0.000000e+00> : vector<8x128xf32>
    %52 = tpu.matmul %45, %51, %cst_35 {dimension_numbers = #tpu.dot_dimension_numbers<[1], [0], [0], [1], [0, 0, 1, 1], [], []>} : vector<8x128xbf16>, vector<128x128xbf16>, vector<8x128xf32> -> vector<8x128xf32>
    %c5 = arith.constant 5 : index
    %c0_36 = arith.constant 0 : index
    %53 = vector.load %arg9[%c5, %c0_36] : memref<6x128xf32, #tpu.memory_space<vmem>>, vector<1x128xf32>
    %54 = vector.broadcast %53 : vector<1x128xf32> to vector<8x128xf32>
    %55 = arith.addf %52, %54 : vector<8x128xf32>
    %cst_37 = arith.constant 5.000000e-01 : f32
    %56 = vector.broadcast %cst_37 : f32 to vector<8x128xf32>
    %57 = arith.mulf %56, %55 : vector<8x128xf32>
    %58 = math.exp %57 : vector<8x128xf32>
    %c0_38 = arith.constant 0 : index
    %c0_39 = arith.constant 0 : index
    %59 = vector.load %arg3[%c0_38, %c0_39] : memref<8x128xf32, #tpu.memory_space<vmem>>, vector<8x128xf32>
    %60 = arith.mulf %58, %59 : vector<8x128xf32>
    %61 = arith.addf %50, %60 : vector<8x128xf32>
    %62 = arith.truncf %61 : vector<8x128xf32> to vector<8x128xbf16>
    %c0_40 = arith.constant 0 : index
    %c0_41 = arith.constant 0 : index
    %63 = vector.load %arg10[%c0_40, %c0_41] : memref<128x128xbf16, #tpu.memory_space<vmem>>, vector<128x128xbf16>
    %cst_42 = arith.constant dense<0.000000e+00> : vector<8x128xf32>
    %64 = tpu.matmul %1, %63, %cst_42 {dimension_numbers = #tpu.dot_dimension_numbers<[1], [0], [0], [1], [0, 0, 1, 1], [], []>} : vector<8x128xbf16>, vector<128x128xbf16>, vector<8x128xf32> -> vector<8x128xf32>
    %c0_43 = arith.constant 0 : index
    %c0_44 = arith.constant 0 : index
    %65 = vector.load %arg11[%c0_43, %c0_44] : memref<128x128xbf16, #tpu.memory_space<vmem>>, vector<128x128xbf16>
    %cst_45 = arith.constant dense<0.000000e+00> : vector<8x128xf32>
    %66 = tpu.matmul %62, %65, %cst_45 {dimension_numbers = #tpu.dot_dimension_numbers<[1], [0], [0], [1], [0, 0, 1, 1], [], []>} : vector<8x128xbf16>, vector<128x128xbf16>, vector<8x128xf32> -> vector<8x128xf32>
    %67 = arith.addf %64, %66 : vector<8x128xf32>
    %c0_46 = arith.constant 0 : index
    %c0_47 = arith.constant 0 : index
    %68 = vector.load %arg15[%c0_46, %c0_47] : memref<4x128xf32, #tpu.memory_space<vmem>>, vector<1x128xf32>
    %69 = vector.broadcast %68 : vector<1x128xf32> to vector<8x128xf32>
    %70 = arith.addf %67, %69 : vector<8x128xf32>
    %cst_48 = arith.constant 0.00999999977 : f32
    %71 = vector.broadcast %cst_48 : f32 to vector<8x128xf32>
    %72 = arith.mulf %71, %70 : vector<8x128xf32>
    %73 = arith.maximumf %70, %72 : vector<8x128xf32>
    %74 = arith.truncf %73 : vector<8x128xf32> to vector<8x128xbf16>
    %c0_49 = arith.constant 0 : index
    %c0_50 = arith.constant 0 : index
    %c0_51 = arith.constant 0 : index
    %75 = vector.load %arg12[%c0_49, %c0_50, %c0_51] : memref<1x128x128xbf16, #tpu.memory_space<vmem>>, vector<1x128x128xbf16>
    %76 = vector.shape_cast %75 : vector<1x128x128xbf16> to vector<128x128xbf16>
    %cst_52 = arith.constant dense<0.000000e+00> : vector<8x128xf32>
    %77 = tpu.matmul %74, %76, %cst_52 {dimension_numbers = #tpu.dot_dimension_numbers<[1], [0], [0], [1], [0, 0, 1, 1], [], []>} : vector<8x128xbf16>, vector<128x128xbf16>, vector<8x128xf32> -> vector<8x128xf32>
    %c1_53 = arith.constant 1 : index
    %c0_54 = arith.constant 0 : index
    %78 = vector.load %arg15[%c1_53, %c0_54] : memref<4x128xf32, #tpu.memory_space<vmem>>, vector<1x128xf32>
    %79 = vector.broadcast %78 : vector<1x128xf32> to vector<8x128xf32>
    %80 = arith.addf %77, %79 : vector<8x128xf32>
    %cst_55 = arith.constant 0.00999999977 : f32
    %81 = vector.broadcast %cst_55 : f32 to vector<8x128xf32>
    %82 = arith.mulf %81, %80 : vector<8x128xf32>
    %83 = arith.maximumf %80, %82 : vector<8x128xf32>
    %84 = arith.truncf %83 : vector<8x128xf32> to vector<8x128xbf16>
    %c0_56 = arith.constant 0 : index
    %c0_57 = arith.constant 0 : index
    %85 = vector.load %arg13[%c0_56, %c0_57] : memref<128x128xbf16, #tpu.memory_space<vmem>>, vector<128x128xbf16>
    %cst_58 = arith.constant dense<0.000000e+00> : vector<8x128xf32>
    %86 = tpu.matmul %84, %85, %cst_58 {dimension_numbers = #tpu.dot_dimension_numbers<[1], [0], [0], [1], [0, 0, 1, 1], [], []>} : vector<8x128xbf16>, vector<128x128xbf16>, vector<8x128xf32> -> vector<8x128xf32>
    %c2_59 = arith.constant 2 : index
    %c0_60 = arith.constant 0 : index
    %87 = vector.load %arg15[%c2_59, %c0_60] : memref<4x128xf32, #tpu.memory_space<vmem>>, vector<1x128xf32>
    %88 = vector.broadcast %87 : vector<1x128xf32> to vector<8x128xf32>
    %89 = arith.addf %86, %88 : vector<8x128xf32>
    %c0_61 = arith.constant 0 : index
    %c0_62 = arith.constant 0 : index
    %90 = vector.load %arg14[%c0_61, %c0_62] : memref<128x128xbf16, #tpu.memory_space<vmem>>, vector<128x128xbf16>
    %cst_63 = arith.constant dense<0.000000e+00> : vector<8x128xf32>
    %91 = tpu.matmul %84, %90, %cst_63 {dimension_numbers = #tpu.dot_dimension_numbers<[1], [0], [0], [1], [0, 0, 1, 1], [], []>} : vector<8x128xbf16>, vector<128x128xbf16>, vector<8x128xf32> -> vector<8x128xf32>
    %c3_64 = arith.constant 3 : index
    %c0_65 = arith.constant 0 : index
    %92 = vector.load %arg15[%c3_64, %c0_65] : memref<4x128xf32, #tpu.memory_space<vmem>>, vector<1x128xf32>
    %93 = vector.broadcast %92 : vector<1x128xf32> to vector<8x128xf32>
    %94 = arith.addf %91, %93 : vector<8x128xf32>
    %c0_66 = arith.constant 0 : index
    %c0_67 = arith.constant 0 : index
    %95 = vector.load %arg16[%c0_66, %c0_67] : memref<8x640xf32, #tpu.memory_space<vmem>>, vector<8x128xf32>
    tpu.vector_store %arg16[%c0_66, %c0_67], %50 {strides = array<i32>} : memref<8x640xf32, #tpu.memory_space<vmem>>, vector<8x128xf32>,
    %c0_68 = arith.constant 0 : index
    %c128 = arith.constant 128 : index
    %96 = vector.load %arg16[%c0_68, %c128] : memref<8x640xf32, #tpu.memory_space<vmem>>, vector<8x128xf32>
    tpu.vector_store %arg16[%c0_68, %c128], %55 {strides = array<i32>} : memref<8x640xf32, #tpu.memory_space<vmem>>, vector<8x128xf32>,
    %c0_69 = arith.constant 0 : index
    %c256 = arith.constant 256 : index
    %97 = vector.load %arg16[%c0_69, %c256] : memref<8x640xf32, #tpu.memory_space<vmem>>, vector<8x128xf32>
    tpu.vector_store %arg16[%c0_69, %c256], %61 {strides = array<i32>} : memref<8x640xf32, #tpu.memory_space<vmem>>, vector<8x128xf32>,
    %c0_70 = arith.constant 0 : index
    %c384 = arith.constant 384 : index
    %98 = vector.load %arg16[%c0_70, %c384] : memref<8x640xf32, #tpu.memory_space<vmem>>, vector<8x128xf32>
    tpu.vector_store %arg16[%c0_70, %c384], %89 {strides = array<i32>} : memref<8x640xf32, #tpu.memory_space<vmem>>, vector<8x128xf32>,
    %c0_71 = arith.constant 0 : index
    %c512 = arith.constant 512 : index
    %99 = vector.load %arg16[%c0_71, %c512] : memref<8x640xf32, #tpu.memory_space<vmem>>, vector<8x128xf32>
    tpu.vector_store %arg16[%c0_71, %c512], %94 {strides = array<i32>} : memref<8x640xf32, #tpu.memory_space<vmem>>, vector<8x128xf32>,
    return
  }
  func.func @transform_0(%arg0: i32) -> (i32, i32) {
    %c0_i32 = arith.constant 0 : i32
    %c0_i32_0 = arith.constant 0 : i32
    return %arg0, %c0_i32 : i32, i32
  }
  func.func @transform_1(%arg0: i32) -> (i32, i32) {
    %c0_i32 = arith.constant 0 : i32
    %c0_i32_0 = arith.constant 0 : i32
    return %arg0, %c0_i32 : i32, i32
  }
  func.func @transform_2(%arg0: i32) -> (i32, i32) {
    %c0_i32 = arith.constant 0 : i32
    %c0_i32_0 = arith.constant 0 : i32
    return %arg0, %c0_i32 : i32, i32
  }
  func.func @transform_3(%arg0: i32) -> (i32, i32) {
    %c0_i32 = arith.constant 0 : i32
    %c0_i32_0 = arith.constant 0 : i32
    %c0_i32_1 = arith.constant 0 : i32
    return %c0_i32, %c0_i32_0 : i32, i32
  }
  func.func @transform_4(%arg0: i32) -> (i32, i32) {
    %c0_i32 = arith.constant 0 : i32
    %c0_i32_0 = arith.constant 0 : i32
    %c0_i32_1 = arith.constant 0 : i32
    return %c0_i32, %c0_i32_0 : i32, i32
  }
  func.func @transform_5(%arg0: i32) -> (i32, i32, i32) {
    %c0_i32 = arith.constant 0 : i32
    %c0_i32_0 = arith.constant 0 : i32
    %c0_i32_1 = arith.constant 0 : i32
    %c0_i32_2 = arith.constant 0 : i32
    return %c0_i32, %c0_i32_0, %c0_i32_1 : i32, i32, i32
  }
  func.func @transform_6(%arg0: i32) -> (i32, i32) {
    %c0_i32 = arith.constant 0 : i32
    %c0_i32_0 = arith.constant 0 : i32
    %c0_i32_1 = arith.constant 0 : i32
    return %c0_i32, %c0_i32_0 : i32, i32
  }
  func.func @transform_7(%arg0: i32) -> (i32, i32) {
    %c0_i32 = arith.constant 0 : i32
    %c0_i32_0 = arith.constant 0 : i32
    %c0_i32_1 = arith.constant 0 : i32
    return %c0_i32, %c0_i32_0 : i32, i32
  }
  func.func @transform_8(%arg0: i32) -> (i32, i32) {
    %c0_i32 = arith.constant 0 : i32
    %c0_i32_0 = arith.constant 0 : i32
    %c0_i32_1 = arith.constant 0 : i32
    return %c0_i32, %c0_i32_0 : i32, i32
  }
  func.func @transform_9(%arg0: i32) -> (i32, i32) {
    %c0_i32 = arith.constant 0 : i32
    %c0_i32_0 = arith.constant 0 : i32
    %c0_i32_1 = arith.constant 0 : i32
    return %c0_i32, %c0_i32_0 : i32, i32
  }
  func.func @transform_10(%arg0: i32) -> (i32, i32) {
    %c0_i32 = arith.constant 0 : i32
    %c0_i32_0 = arith.constant 0 : i32
    %c0_i32_1 = arith.constant 0 : i32
    return %c0_i32, %c0_i32_0 : i32, i32
  }
  func.func @transform_11(%arg0: i32) -> (i32, i32, i32) {
    %c0_i32 = arith.constant 0 : i32
    %c0_i32_0 = arith.constant 0 : i32
    %c0_i32_1 = arith.constant 0 : i32
    %c0_i32_2 = arith.constant 0 : i32
    return %c0_i32, %c0_i32_0, %c0_i32_1 : i32, i32, i32
  }
  func.func @transform_12(%arg0: i32) -> (i32, i32) {
    %c0_i32 = arith.constant 0 : i32
    %c0_i32_0 = arith.constant 0 : i32
    %c0_i32_1 = arith.constant 0 : i32
    return %c0_i32, %c0_i32_0 : i32, i32
  }
  func.func @transform_13(%arg0: i32) -> (i32, i32) {
    %c0_i32 = arith.constant 0 : i32
    %c0_i32_0 = arith.constant 0 : i32
    %c0_i32_1 = arith.constant 0 : i32
    return %c0_i32, %c0_i32_0 : i32, i32
  }
  func.func @transform_14(%arg0: i32) -> (i32, i32) {
    %c0_i32 = arith.constant 0 : i32
    %c0_i32_0 = arith.constant 0 : i32
    %c0_i32_1 = arith.constant 0 : i32
    return %c0_i32, %c0_i32_0 : i32, i32
  }
  func.func @transform_15(%arg0: i32) -> (i32, i32) {
    %c0_i32 = arith.constant 0 : i32
    %c0_i32_0 = arith.constant 0 : i32
    return %arg0, %c0_i32 : i32, i32
  }
}

</mosaic_0001>

<bundles_post_ra>
// kernel: tpu_custom_call.1
= control target key start
LH: loop header
LB: loop body
LE: loop exit
PB: predicated region body
PF: predicated region fallthrough
CT: control target
= control target key end

     0   :  { %20 = vsyncpa [#allocation3], 0  ;;  %s2958_s0 = inlined_call_operand.hbm [shape: f32[8,128], index: 0, kind: input, shape index: {}]   ;;  %s2959_s1 = inlined_call_operand.hbm [shape: f32[8,128], index: 1, kind: input, shape index: {}]   ;;  %s2960_s2 = inlined_call_operand.hbm [shape: f32[8,128], index: 2, kind: input, shape index: {}]   ;;  %s2961_s3 = inlined_call_operand.hbm [shape: bf16[128,128], index: 3, kind: input, shape index: {}]   ;;  %s2962_s4 = inlined_call_operand.hbm [shape: bf16[128,128], index: 4, kind: input, shape index: {}]   ;;  %s2963_s5 = inlined_call_operand.hbm [shape: bf16[3,128,128], index: 5, kind: input, shape index: {}]   ;;  %s2964_s6 = inlined_call_operand.hbm [shape: bf16[128,128], index: 6, kind: input, shape index: {}]   ;;  %s2965_s7 = inlined_call_operand.hbm [shape: bf16[128,128], index: 7, kind: input, shape index: {}]   ;;  %s2966_s8 = inlined_call_operand.vmem [shape: f32[6,128], index: 8, kind: input, shape index: {}]   ;;  %s2967_s9 = inlined_call_operand.hbm [shape: bf16[128,128], index: 9, kind: input, shape index: {}]   ;;  %s2968_s10 = inlined_call_operand.hbm [shape: bf16[128,128], index: 10, kind: input, shape index: {}]   ;;  %s2969_s11 = inlined_call_operand.hbm [shape: bf16[1,128,128], index: 11, kind: input, shape index: {}]   ;;  %s2970_s12 = inlined_call_operand.hbm [shape: bf16[128,128], index: 12, kind: input, shape index: {}]   ;;  %s2971_s13 = inlined_call_operand.hbm [shape: bf16[128,128], index: 13, kind: input, shape index: {}]   ;;  %s2972_s14 = inlined_call_operand.vmem [shape: f32[4,128], index: 14, kind: input, shape index: {}]   ;;  %s2973_s15 = inlined_call_operand.hbm [shape: f32[8,640], index: 15, kind: output, shape index: {}]  }
   0x1   :  { %21 = vsyncpa [#allocation6], 0 }
   0x2   :  { %22 = vsyncpa [#allocation9], 0 }
   0x3   :  { %23 = vsyncpa [#allocation12], 0 }
   0x4   :  { %24 = vsyncpa [#allocation15], 0 }
   0x5   :  { %25 = vsyncpa [#allocation18], 0 }
   0x6   :  { %26 = vsyncpa [#allocation21], 0 }
   0x7   :  { %27 = vsyncpa [#allocation4], 0  ;;  %s2473_s18 = smov [#allocation5]   ;;  %s2474_s20 = smov [#allocation8]  }
   0x8   :  { %s44_s19 = sshll.u32 %s2473_s18, 4  ;;  %s63_s21 = sshll.u32 %s2474_s20, 4  ;;  %s45_s19 = int_to_ptr.vmem [resolvable:$true] %s44_s19  ;;  %s2571_s21 = int_to_ptr.vmem [resolvable:$true] %s63_s21 }
   0x9   :  { %s2149_s24 = scalar_lea.hbm %s2959_s1, 128 }
   0xa   :  { %p2150_p0 = scmp.ne.s32.totalorder %s2959_s1, %s2149_s24  ;;  %p2153_p1 = scmp.lt.u32.totalorder %s2149_s24, %s2959_s1 }
   0xc   :  { %p2155_p2 = pnand %p2153_p1, %p2150_p0 }
   0xe   :  { %2158 = shalt.err (!%p2155_p2)
}
   0xf   :  { %s2159_s29 = scalar_lea.vmem %s45_s19, 128  ;;  %p2164_p4 = scmp.lt.s32.totalorder %s45_s19, %s45_s19 }
  0x10   :  { %p2160_p3 = scmp.ne.s32.totalorder %s45_s19, %s2159_s29  ;;  %p2165_p5 = scmp.lt.s32.totalorder %s2159_s29, %s2159_s29 }
  0x12   :  { %p2166_p6 = por %p2165_p5, %p2164_p4 }
  0x14   :  { %p2167_p7 = pnand %p2166_p6, %p2160_p3 }
  0x16   :  { %2170 = shalt.err (!%p2167_p7)
}
  0x17   :  { %47 = dma.hbm_to_vmem [thread:$0]  %s2959_s1, 128, %s45_s19, [#allocation6]  }
  0x18   :  { %s2171_s20 = scalar_lea.hbm %s2961_s3, 1024 }
  0x19   :  { %p2172_p8 = scmp.ne.s32.totalorder %s2961_s3, %s2171_s20  ;;  %p2175_p9 = scmp.lt.u32.totalorder %s2171_s20, %s2961_s3 }
  0x1b   :  { %p2177_p10 = pnand %p2175_p9, %p2172_p8 }
  0x1d   :  { %2180 = shalt.err (!%p2177_p10)
}
  0x1e   :  { %s2181_s26 = scalar_lea.vmem %s2571_s21, 1024  ;;  %p2186_p12 = scmp.lt.s32.totalorder %s2571_s21, %s2571_s21 }
  0x1f   :  { %p2182_p11 = scmp.ne.s32.totalorder %s2571_s21, %s2181_s26  ;;  %p2187_p13 = scmp.lt.s32.totalorder %s2181_s26, %s2181_s26 }
  0x21   :  { %p2188_p0 = por %p2187_p13, %p2186_p12 }
  0x23   :  { %p2189_p1 = pnand %p2188_p0, %p2182_p11 }
  0x25   :  { %2192 = shalt.err (!%p2189_p1)
}
  0x26   :  { %s2475_s1 = smov 64   ;;  %s2476_s19 = smov 4  }
  0x27   :  { %69 = dma.hbm_to_vmem [thread:$0]  %s2961_s3, 1024, %s2571_s21, [#allocation9], %s2475_s1, %s2475_s1, %s2476_s19  }
  0x28   :  { %s2477_s29 = smov [#allocation11]   ;;  %s2478_s16 = smov [#allocation14]  }
  0x29   :  { %s87_s30 = sshll.u32 %s2477_s29, 4  ;;  %s111_s17 = sshll.u32 %s2478_s16, 4  ;;  %s88_s30 = int_to_ptr.vmem [resolvable:$true] %s87_s30  ;;  %s2605_s17 = int_to_ptr.vmem [resolvable:$true] %s111_s17 }
  0x2a   :  { %s2193_s22 = scalar_lea.hbm %s2963_s5, 3072 }
  0x2b   :  { %p2194_p2 = scmp.ne.s32.totalorder %s2963_s5, %s2193_s22  ;;  %p2197_p3 = scmp.lt.u32.totalorder %s2193_s22, %s2963_s5 }
  0x2d   :  { %p2199_p4 = pnand %p2197_p3, %p2194_p2 }
  0x2f   :  { %2202 = shalt.err (!%p2199_p4)
}
  0x30   :  { %s2203_s3 = scalar_lea.vmem %s88_s30, 3072  ;;  %p2208_p6 = scmp.lt.s32.totalorder %s88_s30, %s88_s30 }
  0x31   :  { %p2204_p5 = scmp.ne.s32.totalorder %s88_s30, %s2203_s3  ;;  %p2209_p7 = scmp.lt.s32.totalorder %s2203_s3, %s2203_s3 }
  0x33   :  { %p2210_p8 = por %p2209_p7, %p2208_p6 }
  0x35   :  { %p2211_p9 = pnand %p2210_p8, %p2204_p5 }
  0x37   :  { %2214 = shalt.err (!%p2211_p9)
}
  0x38   :  { %93 = dma.hbm_to_vmem [thread:$0]  %s2963_s5, 3072, %s88_s30, [#allocation12], %s2475_s1, %s2475_s1, %s2476_s19  }
  0x39   :  { %s2215_s16 = scalar_lea.hbm %s2965_s7, 1024 }
  0x3a   :  { %p2216_p10 = scmp.ne.s32.totalorder %s2965_s7, %s2215_s16  ;;  %p2219_p11 = scmp.lt.u32.totalorder %s2215_s16, %s2965_s7 }
  0x3c   :  { %p2221_p12 = pnand %p2219_p11, %p2216_p10 }
  0x3e   :  { %2224 = shalt.err (!%p2221_p12)
}
  0x3f   :  { %s2225_s24 = scalar_lea.vmem %s2605_s17, 1024  ;;  %p2230_p0 = scmp.lt.s32.totalorder %s2605_s17, %s2605_s17 }
  0x40   :  { %p2226_p13 = scmp.ne.s32.totalorder %s2605_s17, %s2225_s24  ;;  %p2231_p1 = scmp.lt.s32.totalorder %s2225_s24, %s2225_s24 }
  0x42   :  { %p2232_p2 = por %p2231_p1, %p2230_p0 }
  0x44   :  { %p2233_p3 = pnand %p2232_p2, %p2226_p13 }
  0x46   :  { %2236 = shalt.err (!%p2233_p3)
}
  0x47   :  { %117 = dma.hbm_to_vmem [thread:$0]  %s2965_s7, 1024, %s2605_s17, [#allocation15], %s2475_s1, %s2475_s1, %s2476_s19  }
  0x48   :  { %s2479_s25 = smov [#allocation17]   ;;  %s2480_s3 = smov [#allocation20]  }
  0x49   :  { %s137_s26 = sshll.u32 %s2479_s25, 4  ;;  %s161_s21 = sshll.u32 %s2480_s3, 4  ;;  %s138_s26 = int_to_ptr.vmem [resolvable:$true] %s137_s26  ;;  %s2642_s21 = int_to_ptr.vmem [resolvable:$true] %s161_s21 }
  0x4a   :  { %s2237_s29 = scalar_lea.hbm %s2968_s10, 1024 }
  0x4b   :  { %p2238_p4 = scmp.ne.s32.totalorder %s2968_s10, %s2237_s29  ;;  %p2241_p5 = scmp.lt.u32.totalorder %s2237_s29, %s2968_s10 }
  0x4d   :  { %p2243_p6 = pnand %p2241_p5, %p2238_p4 }
  0x4f   :  { %2246 = shalt.err (!%p2243_p6)
}
  0x50   :  { %s2247_s7 = scalar_lea.vmem %s138_s26, 1024  ;;  %p2252_p8 = scmp.lt.s32.totalorder %s138_s26, %s138_s26 }
  0x51   :  { %p2248_p7 = scmp.ne.s32.totalorder %s138_s26, %s2247_s7  ;;  %p2253_p9 = scmp.lt.s32.totalorder %s2247_s7, %s2247_s7 }
  0x53   :  { %p2254_p10 = por %p2253_p9, %p2252_p8 }
  0x55   :  { %p2255_p11 = pnand %p2254_p10, %p2248_p7 }
  0x57   :  { %2258 = shalt.err (!%p2255_p11)
}
  0x58   :  { %143 = dma.hbm_to_vmem [thread:$0]  %s2968_s10, 1024, %s138_s26, [#allocation18], %s2475_s1, %s2475_s1, %s2476_s19  }
  0x59   :  { %s2259_s30 = scalar_lea.hbm %s2970_s12, 1024 }
  0x5a   :  { %p2260_p12 = scmp.ne.s32.totalorder %s2970_s12, %s2259_s30  ;;  %p2263_p13 = scmp.lt.u32.totalorder %s2259_s30, %s2970_s12 }
  0x5c   :  { %p2265_p0 = pnand %p2263_p13, %p2260_p12 }
  0x5e   :  { %2268 = shalt.err (!%p2265_p0)
}
  0x5f   :  { %s2269_s29 = scalar_lea.vmem %s2642_s21, 1024  ;;  %p2274_p2 = scmp.lt.s32.totalorder %s2642_s21, %s2642_s21 }
  0x60   :  { %p2270_p1 = scmp.ne.s32.totalorder %s2642_s21, %s2269_s29  ;;  %p2275_p3 = scmp.lt.s32.totalorder %s2269_s29, %s2269_s29 }
  0x62   :  { %p2276_p4 = por %p2275_p3, %p2274_p2 }
  0x64   :  { %p2277_p5 = pnand %p2276_p4, %p2270_p1 }
  0x66   :  { %2280 = shalt.err (!%p2277_p5)
}
  0x67   :  { %167 = dma.hbm_to_vmem [thread:$0]  %s2970_s12, 1024, %s2642_s21, [#allocation21], %s2475_s1, %s2475_s1, %s2476_s19  }
  0x68   :  { %s2481_s16 = smov [#allocation2]   ;;  %s2482_s20 = smov [#allocation7]  }
  0x69   :  { %s34_s18 = sshll.u32 %s2481_s16, 4  ;;  %s54_s22 = sshll.u32 %s2482_s20, 4  ;;  %s35_s18 = int_to_ptr.vmem [resolvable:$true] %s34_s18  ;;  %s55_s22 = int_to_ptr.vmem [resolvable:$true] %s54_s22 }
  0x6a   :  { %s2281_s23 = scalar_lea.hbm %s2958_s0, 128 }
  0x6b   :  { %p2282_p6 = scmp.ne.s32.totalorder %s2958_s0, %s2281_s23  ;;  %p2285_p7 = scmp.lt.u32.totalorder %s2281_s23, %s2958_s0 }
  0x6d   :  { %p2287_p8 = pnand %p2285_p7, %p2282_p6 }
  0x6f   :  { %2290 = shalt.err (!%p2287_p8)
}
  0x70   :  { %s2291_s12 = scalar_lea.vmem %s35_s18, 128  ;;  %p2296_p10 = scmp.lt.s32.totalorder %s35_s18, %s35_s18 }
  0x71   :  { %p2292_p9 = scmp.ne.s32.totalorder %s35_s18, %s2291_s12  ;;  %p2297_p11 = scmp.lt.s32.totalorder %s2291_s12, %s2291_s12 }
  0x73   :  { %p2298_p12 = por %p2297_p11, %p2296_p10 }
  0x75   :  { %p2299_p13 = pnand %p2298_p12, %p2292_p9 }
  0x77   :  { %2302 = shalt.err (!%p2299_p13)
}
  0x78   :  { %37 = dma.hbm_to_vmem [thread:$0]  %s2958_s0, 128, %s35_s18, [#allocation3]  }
  0x79   :  { %s2303_s29 = scalar_lea.hbm %s2960_s2, 128 }
  0x7a   :  { %p2304_p0 = scmp.ne.s32.totalorder %s2960_s2, %s2303_s29  ;;  %p2307_p1 = scmp.lt.u32.totalorder %s2303_s29, %s2960_s2 }
  0x7c   :  { %p2309_p2 = pnand %p2307_p1, %p2304_p0 }
  0x7e   :  { %2312 = shalt.err (!%p2309_p2)
}
  0x7f   :  { %s2313_s7 = scalar_lea.vmem %s55_s22, 128  ;;  %p2318_p4 = scmp.lt.s32.totalorder %s55_s22, %s55_s22 }
  0x80   :  { %p2314_p3 = scmp.ne.s32.totalorder %s55_s22, %s2313_s7  ;;  %p2319_p5 = scmp.lt.s32.totalorder %s2313_s7, %s2313_s7 }
  0x82   :  { %p2320_p6 = por %p2319_p5, %p2318_p4 }
  0x84   :  { %p2321_p7 = pnand %p2320_p6, %p2314_p3 }
  0x86   :  { %2324 = shalt.err (!%p2321_p7)
}
  0x87   :  { %57 = dma.hbm_to_vmem [thread:$0]  %s2960_s2, 128, %s55_s22, [#allocation6]  }
  0x88   :  { %s2483_s17 = smov [#allocation10]   ;;  %s2484_s24 = smov [#allocation13]  }
  0x89   :  { %s75_s23 = sshll.u32 %s2483_s17, 4  ;;  %s99_s5 = sshll.u32 %s2484_s24, 4  ;;  %s76_s23 = int_to_ptr.vmem [resolvable:$true] %s75_s23  ;;  %s2703_s5 = int_to_ptr.vmem [resolvable:$true] %s99_s5 }
  0x8a   :  { %s2325_s12 = scalar_lea.hbm %s2962_s4, 1024 }
  0x8b   :  { %p2326_p8 = scmp.ne.s32.totalorder %s2962_s4, %s2325_s12  ;;  %p2329_p9 = scmp.lt.u32.totalorder %s2325_s12, %s2962_s4 }
  0x8d   :  { %p2331_p10 = pnand %p2329_p9, %p2326_p8 }
  0x8f   :  { %2334 = shalt.err (!%p2331_p10)
}
  0x90   :  { %s2335_s2 = scalar_lea.vmem %s76_s23, 1024  ;;  %p2340_p12 = scmp.lt.s32.totalorder %s76_s23, %s76_s23 }
  0x91   :  { %p2336_p11 = scmp.ne.s32.totalorder %s76_s23, %s2335_s2  ;;  %p2341_p13 = scmp.lt.s32.totalorder %s2335_s2, %s2335_s2 }
  0x93   :  { %p2342_p0 = por %p2341_p13, %p2340_p12 }
  0x95   :  { %p2343_p1 = pnand %p2342_p0, %p2336_p11 }
  0x97   :  { %2346 = shalt.err (!%p2343_p1)
}
  0x98   :  { %81 = dma.hbm_to_vmem [thread:$0]  %s2962_s4, 1024, %s76_s23, [#allocation9], %s2475_s1, %s2475_s1, %s2476_s19  }
  0x99   :  { %s2347_s16 = scalar_lea.hbm %s2964_s6, 1024 }
  0x9a   :  { %p2348_p2 = scmp.ne.s32.totalorder %s2964_s6, %s2347_s16  ;;  %p2351_p3 = scmp.lt.u32.totalorder %s2347_s16, %s2964_s6 }
  0x9c   :  { %p2353_p4 = pnand %p2351_p3, %p2348_p2 }
  0x9e   :  { %2356 = shalt.err (!%p2353_p4)
}
  0x9f   :  { %s2357_s17 = scalar_lea.vmem %s2703_s5, 1024  ;;  %p2362_p6 = scmp.lt.s32.totalorder %s2703_s5, %s2703_s5 }
  0xa0   :  { %p2358_p5 = scmp.ne.s32.totalorder %s2703_s5, %s2357_s17  ;;  %p2363_p7 = scmp.lt.s32.totalorder %s2357_s17, %s2357_s17 }
  0xa2   :  { %p2364_p8 = por %p2363_p7, %p2362_p6 }
  0xa4   :  { %p2365_p9 = pnand %p2364_p8, %p2358_p5 }
  0xa6   :  { %2368 = shalt.err (!%p2365_p9)
}
  0xa7   :  { %105 = dma.hbm_to_vmem [thread:$0]  %s2964_s6, 1024, %s2703_s5, [#allocation12], %s2475_s1, %s2475_s1, %s2476_s19  }
  0xa8   :  { %s2485_s24 = smov [#allocation16]   ;;  %s2486_s25 = smov [#allocation19]  }
  0xa9   :  { %s125_s30 = sshll.u32 %s2485_s24, 4  ;;  %s149_s12 = sshll.u32 %s2486_s25, 4  ;;  %s126_s30 = int_to_ptr.vmem [resolvable:$true] %s125_s30  ;;  %s2740_s12 = int_to_ptr.vmem [resolvable:$true] %s149_s12 }
  0xaa   :  { %s2369_s27 = scalar_lea.hbm %s2967_s9, 1024 }
  0xab   :  { %p2370_p10 = scmp.ne.s32.totalorder %s2967_s9, %s2369_s27  ;;  %p2373_p11 = scmp.lt.u32.totalorder %s2369_s27, %s2967_s9 }
  0xad   :  { %p2375_p12 = pnand %p2373_p11, %p2370_p10 }
  0xaf   :  { %2378 = shalt.err (!%p2375_p12)
}
  0xb0   :  { %s2379_s6 = scalar_lea.vmem %s126_s30, 1024  ;;  %p2384_p0 = scmp.lt.s32.totalorder %s126_s30, %s126_s30 }
  0xb1   :  { %p2380_p13 = scmp.ne.s32.totalorder %s126_s30, %s2379_s6  ;;  %p2385_p1 = scmp.lt.s32.totalorder %s2379_s6, %s2379_s6 }
  0xb3   :  { %p2386_p2 = por %p2385_p1, %p2384_p0 }
  0xb5   :  { %p2387_p3 = pnand %p2386_p2, %p2380_p13 }
  0xb7   :  { %2390 = shalt.err (!%p2387_p3)
}
  0xb8   :  { %131 = dma.hbm_to_vmem [thread:$0]  %s2967_s9, 1024, %s126_s30, [#allocation15], %s2475_s1, %s2475_s1, %s2476_s19  }
  0xb9   :  { %s2391_s20 = scalar_lea.hbm %s2969_s11, 1024 }
  0xba   :  { %p2392_p4 = scmp.ne.s32.totalorder %s2969_s11, %s2391_s20  ;;  %p2395_p5 = scmp.lt.u32.totalorder %s2391_s20, %s2969_s11 }
  0xbc   :  { %p2397_p6 = pnand %p2395_p5, %p2392_p4 }
  0xbe   :  { %2400 = shalt.err (!%p2397_p6)
}
  0xbf   :  { %s2401_s4 = scalar_lea.vmem %s2740_s12, 1024  ;;  %p2406_p8 = scmp.lt.s32.totalorder %s2740_s12, %s2740_s12 }
  0xc0   :  { %p2402_p7 = scmp.ne.s32.totalorder %s2740_s12, %s2401_s4  ;;  %p2407_p9 = scmp.lt.s32.totalorder %s2401_s4, %s2401_s4 }
  0xc2   :  { %p2408_p10 = por %p2407_p9, %p2406_p8 }
  0xc4   :  { %p2409_p11 = pnand %p2408_p10, %p2402_p7 }
  0xc6   :  { %2412 = shalt.err (!%p2409_p11)
}
  0xc7   :  { %155 = dma.hbm_to_vmem [thread:$0]  %s2969_s11, 1024, %s2740_s12, [#allocation18], %s2475_s1, %s2475_s1, %s2476_s19  }
  0xc8   :  { %s2487_s24 = smov [#allocation22]   ;;  %s2413_s3 = scalar_lea.hbm %s2971_s13, 1024 }
  0xc9   :  { %s173_s30 = sshll.u32 %s2487_s24, 4  ;;  %p2414_p12 = scmp.ne.s32.totalorder %s2971_s13, %s2413_s3  ;;  %s174_s30 = int_to_ptr.vmem [resolvable:$true] %s173_s30 }
  0xca   :  { %p2417_p13 = scmp.lt.u32.totalorder %s2413_s3, %s2971_s13 }
  0xcc   :  { %p2419_p0 = pnand %p2417_p13, %p2414_p12 }
  0xce   :  { %2422 = shalt.err (!%p2419_p0)
}
  0xcf   :  { %s2423_s29 = scalar_lea.vmem %s174_s30, 1024  ;;  %p2428_p2 = scmp.lt.s32.totalorder %s174_s30, %s174_s30 }
  0xd0   :  { %p2424_p1 = scmp.ne.s32.totalorder %s174_s30, %s2423_s29  ;;  %p2429_p3 = scmp.lt.s32.totalorder %s2423_s29, %s2423_s29 }
  0xd2   :  { %p2430_p4 = por %p2429_p3, %p2428_p2 }
  0xd4   :  { %p2431_p5 = pnand %p2430_p4, %p2424_p1 }
  0xd6   :  { %2434 = shalt.err (!%p2431_p5)
}
  0xd7   :  { %179 = dma.hbm_to_vmem [thread:$0]  %s2971_s13, 1024, %s174_s30, [#allocation21], %s2475_s1, %s2475_s1, %s2476_s19  }
  0xd8   :  { %2457 = dma.done.wait [#allocation3], 128  }
  0xd9   :  { %2458 = vsyncadd [#allocation3], 4294967168 }
  0xda   :  { %2459 = dma.done.wait [#allocation6], 256  }
  0xdb   :  { %2460 = vsyncadd [#allocation6], 4294967040 }
  0xdc   :  { %2461 = dma.done.wait [#allocation9], 2048  }
  0xdd   :  { %2462 = vsyncadd [#allocation9], 4294965248 }
  0xde   :  { %2463 = dma.done.wait [#allocation12], 4096  }
  0xdf   :  { %2464 = vsyncadd [#allocation12], 4294963200 }
  0xe0   :  { %2465 = dma.done.wait [#allocation15], 2048  }
  0xe1   :  { %2466 = vsyncadd [#allocation15], 4294965248 }
  0xe2   :  { %2467 = dma.done.wait [#allocation18], 2048  }
  0xe3   :  { %2468 = vsyncadd [#allocation18], 4294965248 }
  0xe4   :  { %2469 = dma.done.wait [#allocation21], 2048  }
  0xe5   :  { %2470 = vsyncadd [#allocation21], 4294965248  ;;  %v2488_v0 = vmov 0.0   ;;  %vm2489_vm0 = vmmov 0   ;;  %v2051_v1 = vld [vmem:[#allocation10] sm:$0xff]   ;;  %v2053_v3 = vld [vmem:[#allocation10 + $0x8] sm:$0xff]  }
  0xe6   :  { %1793 = vmatprep.subr.bf16.mxu0 %v2488_v0  ;;  %1813 = vmatprep.subr.bf16.mxu1 %v2488_v0  ;;  %v2052_v2 = vld [vmem:[#allocation8] sm:$0xff]   ;;  %v2054_v4 = vld [vmem:[#allocation8 + $0x8] sm:$0xff]   ;;  %v2055_v5 = vld [vmem:[#allocation10 + $0x10] sm:$0xff]   ;;  %s2490_s21 = smov [#allocation23]  }
  0xe7   :  { %1809 = vmatprep.mubr.msk.bf16.mxu0 %vm2489_vm0, %v2488_v0  ;;  %1829 = vmatprep.mubr.msk.bf16.mxu1 %vm2489_vm0, %v2488_v0  ;;  %v2056_v6 = vld [vmem:[#allocation8 + $0x10] sm:$0xff]   ;;  %v2057_v7 = vld [vmem:[#allocation10 + $0x18] sm:$0xff]   ;;  %v2059_v9 = vld [vmem:[#allocation10 + $0x20] sm:$0xff]   ;;  %s1564_s3 = sshll.u32 %s2490_s21, 4  ;;  %s1565_s3 = int_to_ptr.vmem [resolvable:$true] %s1564_s3 }
  0xe8   :  { %1794 = vmatpush3.bf16.msra.mxu0 %v2051_v1  ;;  %1814 = vmatpush3.bf16.msra.mxu1 %v2052_v2  ;;  %v2058_v8 = vld [vmem:[#allocation8 + $0x18] sm:$0xff]   ;;  %v2060_v10 = vld [vmem:[#allocation8 + $0x20] sm:$0xff]   ;;  %v2061_v11 = vld [vmem:[#allocation10 + $0x28] sm:$0xff]   ;;  %s2435_s27 = scalar_lea.vmem %s1565_s3, 640  ;;  %p2440_p7 = scmp.lt.s32.totalorder %s1565_s3, %s1565_s3 }
  0xe9   :  { %1795 = vmatprep.subr.bf16.mxu0 %v2488_v0  ;;  %1815 = vmatprep.subr.bf16.mxu1 %v2488_v0  ;;  %v2062_v12 = vld [vmem:[#allocation8 + $0x28] sm:$0xff]   ;;  %v2063_v13 = vld [vmem:[#allocation10 + $0x30] sm:$0xff]   ;;  %v2065_v15 = vld [vmem:[#allocation10 + $0x38] sm:$0xff]   ;;  %p2436_p6 = scmp.ne.s32.totalorder %s1565_s3, %s2435_s27  ;;  %p2441_p8 = scmp.lt.s32.totalorder %s2435_s27, %s2435_s27 }
  0xea   :  { %v2064_v14 = vld [vmem:[#allocation8 + $0x30] sm:$0xff]   ;;  %v2066_v17 = vld [vmem:[#allocation8 + $0x38] sm:$0xff]   ;;  %v222_v18 = vld [vmem:[#allocation2] sm:$0xff] }
  0xeb   :  { %v224_v16 = vld [vmem:[#allocation5] sm:$0xff]  ;;  %v2067_v19 = vld [vmem:[#allocation11] sm:$0xff]   ;;  %v2812_v21 = vpack.c.bf16 %v222_v18, %v222_v18  ;;  %v2068_v22 = vld [vmem:[#allocation11 + $0x8] sm:$0xff]   ;;  %p2442_p9 = por %p2441_p8, %p2440_p7 }
  0xec   :  { %1796 = vmatpush3.bf16.msra.mxu0 %v2053_v3  ;;  %1816 = vmatpush3.bf16.msra.mxu1 %v2054_v4  ;;  %v225_v20 = vpack.c.bf16 %v224_v16, %v224_v16  ;;  %v2069_v23 = vld [vmem:[#allocation11 + $0x10] sm:$0xff]   ;;  %v2070_v24 = vld [vmem:[#allocation11 + $0x18] sm:$0xff]   ;;  %v2071_v25 = vld [vmem:[#allocation11 + $0x20] sm:$0xff]  }
  0xed   :  { %1797 = vmatprep.subr.bf16.mxu0 %v2488_v0  ;;  %1817 = vmatprep.subr.bf16.mxu1 %v2488_v0  ;;  %v2072_v26 = vld [vmem:[#allocation11 + $0x28] sm:$0xff]   ;;  %v2073_v27 = vld [vmem:[#allocation11 + $0x30] sm:$0xff]   ;;  %v2074_v28 = vld [vmem:[#allocation11 + $0x38] sm:$0xff]   ;;  %p2443_p10 = pnand %p2442_p9, %p2436_p6 }
  0xee   :  { %v2075_v29 = vld [vmem:[#allocation11 + $0x40] sm:$0xff]   ;;  %v2076_v30 = vld [vmem:[#allocation11 + $0x48] sm:$0xff]   ;;  %v2077_v31 = vld [vmem:[#allocation11 + $0x50] sm:$0xff]  }
  0xef   :  { %v2078_v32 = vld [vmem:[#allocation11 + $0x58] sm:$0xff]   ;;  %v2079_v33 = vld [vmem:[#allocation11 + $0x60] sm:$0xff]   ;;  %v2080_v34 = vld [vmem:[#allocation11 + $0x68] sm:$0xff]  }
  0xf0   :  { %1798 = vmatpush3.bf16.msra.mxu0 %v2055_v5  ;;  %1818 = vmatpush3.bf16.msra.mxu1 %v2056_v6  ;;  %v1595_v37 = vld [vmem:[%s2966_s8] ss:$0 sm:$0xff]  ;;  %v2081_v49 = vld [vmem:[#allocation11 + $0x70] sm:$0xff]   ;;  %v2082_v50 = vld [vmem:[#allocation11 + $0x78] sm:$0xff]  }
  0xf1   :  { %1799 = vmatprep.subr.bf16.mxu0 %v2488_v0  ;;  %1819 = vmatprep.subr.bf16.mxu1 %v2488_v0  ;;  %v2083_v51 = vld [vmem:[#allocation11 + $0x80] sm:$0xff]   ;;  %v2084_v52 = vld [vmem:[#allocation11 + $0x88] sm:$0xff]   ;;  %v2085_v53 = vld [vmem:[#allocation11 + $0x90] sm:$0xff]  }
  0xf2   :  { %v2086_v54 = vld [vmem:[#allocation11 + $0x98] sm:$0xff]   ;;  %v2087_v55 = vld [vmem:[#allocation11 + $0xa0] sm:$0xff]   ;;  %v2088_v56 = vld [vmem:[#allocation11 + $0xa8] sm:$0xff]  }
  0xf3   :  { %v1596_v57 = vld [vmem:[%s2966_s8 + $0x1] ss:$0 sm:$0xff]  ;;  %v2089_v3 = vld [vmem:[#allocation11 + $0xb0] sm:$0xff]   ;;  %v2090_v4 = vld [vmem:[#allocation11 + $0xb8] sm:$0xff]  }
  0xf4   :  { %1800 = vmatpush3.bf16.msra.mxu0 %v2057_v7  ;;  %1820 = vmatpush3.bf16.msra.mxu1 %v2058_v8  ;;  %v2091_v5 = vld [vmem:[#allocation13] sm:$0xff]   ;;  %v2093_v6 = vld [vmem:[#allocation13 + $0x8] sm:$0xff]   ;;  %v2095_v7 = vld [vmem:[#allocation13 + $0x10] sm:$0xff]  }
  0xf5   :  { %1801 = vmatprep.subr.bf16.mxu0 %v2488_v0  ;;  %1821 = vmatprep.subr.bf16.mxu1 %v2488_v0  ;;  %v2097_v8 = vld [vmem:[#allocation13 + $0x18] sm:$0xff]  }
  0xf8   :  { %1802 = vmatpush3.bf16.msra.mxu0 %v2059_v9  ;;  %1822 = vmatpush3.bf16.msra.mxu1 %v2060_v10  ;;  %v2099_v9 = vld [vmem:[#allocation13 + $0x20] sm:$0xff]   ;;  %v2101_v10 = vld [vmem:[#allocation13 + $0x28] sm:$0xff]  }
  0xf9   :  { %1803 = vmatprep.subr.bf16.mxu0 %v2488_v0  ;;  %1823 = vmatprep.subr.bf16.mxu1 %v2488_v0 }
  0xfc   :  { %1804 = vmatpush3.bf16.msra.mxu0 %v2061_v11  ;;  %1824 = vmatpush3.bf16.msra.mxu1 %v2062_v12  ;;  %v1605_v11 = vld [vmem:[%s2966_s8 + $0x2] ss:$0 sm:$0xff] }
  0xfd   :  { %1805 = vmatprep.subr.bf16.mxu0 %v2488_v0  ;;  %1825 = vmatprep.subr.bf16.mxu1 %v2488_v0 }
 0x100   :  { %1806 = vmatpush3.bf16.msra.mxu0 %v2063_v13  ;;  %1826 = vmatpush3.bf16.msra.mxu1 %v2064_v14 }
 0x101   :  { %1807 = vmatprep.subr.bf16.mxu0 %v2488_v0  ;;  %1827 = vmatprep.subr.bf16.mxu1 %v2488_v0 }
 0x104   :  { %1808 = vmatpush3.bf16.msra.mxu0 %v2065_v15  ;;  %1828 = vmatpush3.bf16.msra.mxu1 %v2066_v17 }
 0x105   :  { %1833 = vmatprep.subr.bf16.mxu0 %v2488_v0  ;;  %1853 = vmatprep.subr.bf16.mxu1 %v2488_v0 }
 0x107   :  { %1810 = vmatmul.mubr.bf16.vlgmr.msra.gmra.mrb[0].mxu0 %v225_v20  ;;  %1830 = vmatmul.mubr.bf16.vlgmr.msra.gmra.mrb[0].mxu1 %v2812_v21 }
 0x108   :  { %1834 = vmatpush3.bf16.msra.mxu0 %v2067_v19  ;;  %1849 = vmatprep.mubr.msk.bf16.mxu0 %vm2489_vm0, %v2488_v0  ;;  %v2092_v19 = vld [vmem:[#allocation14] sm:$0xff]  }
 0x109   :  { %1835 = vmatprep.subr.bf16.mxu0 %v2488_v0  ;;  %1869 = vmatprep.mubr.msk.bf16.mxu1 %vm2489_vm0, %v2488_v0 }
 0x10a   :  { %1854 = vmatpush3.bf16.msra.mxu1 %v2075_v29  ;;  %v2105_v29 = vld [vmem:[#allocation13 + $0x38] sm:$0xff]  }
 0x10b   :  { %1855 = vmatprep.subr.bf16.mxu1 %v2488_v0 }
 0x10c   :  { %1836 = vmatpush3.bf16.msra.mxu0 %v2068_v22  ;;  %v2094_v22 = vld [vmem:[#allocation14 + $0x8] sm:$0xff]  }
 0x10d   :  { %1837 = vmatprep.subr.bf16.mxu0 %v2488_v0 }
 0x10e   :  { %1856 = vmatpush3.bf16.msra.mxu1 %v2076_v30  ;;  %v2106_v30 = vld [vmem:[#allocation14 + $0x38] sm:$0xff]  }
 0x10f   :  { %1857 = vmatprep.subr.bf16.mxu1 %v2488_v0 }
 0x110   :  { %1838 = vmatpush3.bf16.msra.mxu0 %v2069_v23  ;;  %v2096_v23 = vld [vmem:[#allocation14 + $0x10] sm:$0xff]  }
 0x111   :  { %1839 = vmatprep.subr.bf16.mxu0 %v2488_v0 }
 0x112   :  { %1858 = vmatpush3.bf16.msra.mxu1 %v2077_v31  ;;  %v1614_v31 = vld [vmem:[%s2966_s8 + $0x3] ss:$0 sm:$0xff] }
 0x113   :  { %1859 = vmatprep.subr.bf16.mxu1 %v2488_v0 }
 0x114   :  { %1840 = vmatpush3.bf16.msra.mxu0 %v2070_v24  ;;  %v2098_v24 = vld [vmem:[#allocation14 + $0x18] sm:$0xff]  }
 0x115   :  { %1841 = vmatprep.subr.bf16.mxu0 %v2488_v0 }
 0x116   :  { %1860 = vmatpush3.bf16.msra.mxu1 %v2078_v32 }
 0x117   :  { %1861 = vmatprep.subr.bf16.mxu1 %v2488_v0 }
 0x118   :  { %1842 = vmatpush3.bf16.msra.mxu0 %v2071_v25  ;;  %v2100_v25 = vld [vmem:[#allocation14 + $0x20] sm:$0xff]  }
 0x119   :  { %1843 = vmatprep.subr.bf16.mxu0 %v2488_v0 }
 0x11a   :  { %1862 = vmatpush3.bf16.msra.mxu1 %v2079_v33 }
 0x11b   :  { %1863 = vmatprep.subr.bf16.mxu1 %v2488_v0 }
 0x11c   :  { %1844 = vmatpush3.bf16.msra.mxu0 %v2072_v26  ;;  %v2102_v26 = vld [vmem:[#allocation14 + $0x28] sm:$0xff]  }
 0x11d   :  { %1845 = vmatprep.subr.bf16.mxu0 %v2488_v0 }
 0x11e   :  { %1864 = vmatpush3.bf16.msra.mxu1 %v2080_v34 }
 0x11f   :  { %1865 = vmatprep.subr.bf16.mxu1 %v2488_v0 }
 0x120   :  { %1846 = vmatpush3.bf16.msra.mxu0 %v2073_v27  ;;  %v2103_v27 = vld [vmem:[#allocation13 + $0x30] sm:$0xff]  }
 0x121   :  { %1847 = vmatprep.subr.bf16.mxu0 %v2488_v0 }
 0x122   :  { %1866 = vmatpush3.bf16.msra.mxu1 %v2081_v49  ;;  %v2116_v49 = vld [vmem:[#allocation17 + $0x20] sm:$0xff]  }
 0x123   :  { %1867 = vmatprep.subr.bf16.mxu1 %v2488_v0 }
 0x124   :  { %1848 = vmatpush3.bf16.msra.mxu0 %v2074_v28  ;;  %v2104_v28 = vld [vmem:[#allocation14 + $0x30] sm:$0xff]  }
 0x125   :  { %1873 = vmatprep.subr.bf16.mxu0 %v2488_v0 }
 0x126   :  { %1868 = vmatpush3.bf16.msra.mxu1 %v2082_v50  ;;  %v2117_v50 = vld [vmem:[#allocation16 + $0x28] sm:$0xff]  }
 0x127   :  { %1893 = vmatprep.subr.bf16.mxu1 %v2488_v0 }
 0x1da   :  { %v340_v35 = vpop.f32.mrb[0].mxu0  ;;  %v428_v36 = vpop.f32.mrb[0].mxu1 }
 0x1db   :  { %v1811_v38 = vpop.f32.mrb[1].mxu0  ;;  %v429_v39 = vadd.f32 %v428_v36, %v340_v35  ;;  %v1831_v40 = vpop.f32.mrb[1].mxu1 }
 0x1dc   :  { %v343_v41 = vpop.f32.mrb[2].mxu0  ;;  %v431_v42 = vpop.f32.mrb[2].mxu1  ;;  %v2108_v40 = vld [vmem:[#allocation17] sm:$0xff]  }
 0x1dd   :  { %v1812_v43 = vpop.f32.mrb[3].mxu0  ;;  %v439_v44 = vadd.f32 %v1595_v37, %v429_v39  ;;  %v1832_v45 = vpop.f32.mrb[3].mxu1  ;;  %v2107_v39 = vld [vmem:[#allocation16] sm:$0xff]   ;;  %v2109_v42 = vld [vmem:[#allocation16 + $0x8] sm:$0xff]  }
 0x1de   :  { %v2110_v43 = vld [vmem:[#allocation17 + $0x8] sm:$0xff]   ;;  %v2112_v45 = vld [vmem:[#allocation17 + $0x10] sm:$0xff]  }
 0x1df   :  { %v440_v46 = vmul.f32 0.01, %v439_v44 }
 0x1e1   :  { %v441_v47 = vmax.f32 %v439_v44, %v440_v46  ;;  %v2111_v44 = vld [vmem:[#allocation16 + $0x10] sm:$0xff]   ;;  %v2113_v46 = vld [vmem:[#allocation16 + $0x18] sm:$0xff]  }
 0x1e3   :  { %v442_v48 = vpack.c.bf16 %v441_v47, %v441_v47  ;;  %v2114_v47 = vld [vmem:[#allocation17 + $0x18] sm:$0xff]  }
 0x1e5   :  { %1850 = vmatmul.mubr.bf16.vlgmr.msra.gmra.mrb[4].mxu0 %v442_v48  ;;  %v2115_v48 = vld [vmem:[#allocation16 + $0x20] sm:$0xff]  }
 0x1e6   :  { %1889 = vmatprep.mubr.msk.bf16.mxu0 %vm2489_vm0, %v2488_v0  ;;  %1874 = vmatpush3.bf16.msra.mxu0 %v2083_v51  ;;  %v2118_v51 = vld [vmem:[#allocation17 + $0x28] sm:$0xff]  }
 0x1e7   :  { %1875 = vmatprep.subr.bf16.mxu0 %v2488_v0 }
 0x1ea   :  { %1876 = vmatpush3.bf16.msra.mxu0 %v2084_v52  ;;  %v2119_v52 = vld [vmem:[#allocation16 + $0x30] sm:$0xff]  }
 0x1eb   :  { %1877 = vmatprep.subr.bf16.mxu0 %v2488_v0 }
 0x1ee   :  { %1878 = vmatpush3.bf16.msra.mxu0 %v2085_v53  ;;  %v2120_v53 = vld [vmem:[#allocation17 + $0x30] sm:$0xff]  }
 0x1ef   :  { %1879 = vmatprep.subr.bf16.mxu0 %v2488_v0 }
 0x1f2   :  { %1880 = vmatpush3.bf16.msra.mxu0 %v2086_v54  ;;  %v2121_v54 = vld [vmem:[#allocation16 + $0x38] sm:$0xff]  }
 0x1f3   :  { %1881 = vmatprep.subr.bf16.mxu0 %v2488_v0 }
 0x1f6   :  { %1882 = vmatpush3.bf16.msra.mxu0 %v2087_v55  ;;  %v2122_v55 = vld [vmem:[#allocation17 + $0x38] sm:$0xff]  }
 0x1f7   :  { %1883 = vmatprep.subr.bf16.mxu0 %v2488_v0 }
 0x1fa   :  { %1884 = vmatpush3.bf16.msra.mxu0 %v2088_v56  ;;  %v1623_v56 = vld [vmem:[%s2966_s8 + $0x4] ss:$0 sm:$0xff] }
 0x1fb   :  { %1885 = vmatprep.subr.bf16.mxu0 %v2488_v0 }
 0x1fe   :  { %1886 = vmatpush3.bf16.msra.mxu0 %v2089_v3 }
 0x1ff   :  { %1887 = vmatprep.subr.bf16.mxu0 %v2488_v0 }
 0x202   :  { %1888 = vmatpush3.bf16.msra.mxu0 %v2090_v4 }
 0x203   :  { %1913 = vmatprep.subr.bf16.mxu0 %v2488_v0 }
 0x2b8   :  { %v546_v58 = vpop.f32.mrb[4].mxu0 }
 0x2b9   :  { %v547_v59 = vadd.f32 %v1596_v57, %v546_v58  ;;  %v1851_v60 = vpop.f32.mrb[5].mxu0  ;;  %v1632_v57 = vld [vmem:[%s2966_s8 + $0x5] ss:$0 sm:$0xff] }
 0x2ba   :  { %v549_v61 = vpop.f32.mrb[6].mxu0 }
 0x2bb   :  { %v552_v62 = vmul.f32 0.01, %v547_v59  ;;  %v1852_v63 = vpop.f32.mrb[7].mxu0 }
 0x2bd   :  { %v553_v1 = vmax.f32 %v547_v59, %v552_v62 }
 0x2bf   :  { %v554_v2 = vpack.c.bf16 %v553_v1, %v553_v1 }
 0x2c1   :  { %1870 = vmatmul.mubr.bf16.vlgmr.msra.gmra.mrb[4].mxu1 %v554_v2 }
 0x2c2   :  { %1909 = vmatprep.mubr.msk.bf16.mxu1 %vm2489_vm0, %v2488_v0  ;;  %1894 = vmatpush3.bf16.msra.mxu1 %v2091_v5 }
 0x2c3   :  { %1895 = vmatprep.subr.bf16.mxu1 %v2488_v0 }
 0x2c6   :  { %1896 = vmatpush3.bf16.msra.mxu1 %v2093_v6  ;;  %v1002_v6 = vld [vmem:[#allocation7] sm:$0xff] }
 0x2c7   :  { %1897 = vmatprep.subr.bf16.mxu1 %v2488_v0 }
 0x2ca   :  { %1898 = vmatpush3.bf16.msra.mxu1 %v2095_v7 }
 0x2cb   :  { %1899 = vmatprep.subr.bf16.mxu1 %v2488_v0 }
 0x2ce   :  { %1900 = vmatpush3.bf16.msra.mxu1 %v2097_v8 }
 0x2cf   :  { %1901 = vmatprep.subr.bf16.mxu1 %v2488_v0 }
 0x2d2   :  { %1902 = vmatpush3.bf16.msra.mxu1 %v2099_v9 }
 0x2d3   :  { %1903 = vmatprep.subr.bf16.mxu1 %v2488_v0 }
 0x2d6   :  { %1904 = vmatpush3.bf16.msra.mxu1 %v2101_v10  ;;  %v2123_v10 = vld [vmem:[#allocation19] sm:$0xff]  }
 0x2d7   :  { %1905 = vmatprep.subr.bf16.mxu1 %v2488_v0 }
 0x2da   :  { %1906 = vmatpush3.bf16.msra.mxu1 %v2103_v27  ;;  %v2137_v27 = vld [vmem:[#allocation20 + $0x18] sm:$0xff]  }
 0x2db   :  { %1907 = vmatprep.subr.bf16.mxu1 %v2488_v0 }
 0x2de   :  { %1908 = vmatpush3.bf16.msra.mxu1 %v2105_v29  ;;  %v2141_v29 = vld [vmem:[#allocation20 + $0x28] sm:$0xff]  }
 0x2df   :  { %1933 = vmatprep.subr.bf16.mxu1 %v2488_v0 }
 0x394   :  { %v659_v12 = vpop.f32.mrb[4].mxu1 }
 0x395   :  { %v660_v13 = vadd.f32 %v1605_v11, %v659_v12  ;;  %v1871_v14 = vpop.f32.mrb[5].mxu1  ;;  %v2124_v12 = vld [vmem:[#allocation19 + $0x8] sm:$0xff]  }
 0x396   :  { %v662_v15 = vpop.f32.mrb[6].mxu1  ;;  %v2126_v14 = vld [vmem:[#allocation19 + $0x18] sm:$0xff]  }
 0x397   :  { %v665_v16 = vmul.f32 0.01, %v660_v13  ;;  %v1872_v17 = vpop.f32.mrb[7].mxu1  ;;  %v2127_v15 = vld [vmem:[#allocation19 + $0x20] sm:$0xff]  }
 0x399   :  { %v666_v18 = vmax.f32 %v660_v13, %v665_v16  ;;  %v2125_v13 = vld [vmem:[#allocation19 + $0x10] sm:$0xff]  }
 0x39b   :  { %v667_v20 = vpack.c.bf16 %v666_v18, %v666_v18  ;;  %v2128_v18 = vld [vmem:[#allocation19 + $0x28] sm:$0xff]  }
 0x39d   :  { %1890 = vmatmul.mubr.bf16.vlgmr.msra.gmra.mrb[8].mxu0 %v667_v20 }
 0x39e   :  { %1914 = vmatpush3.bf16.msra.mxu0 %v2092_v19  ;;  %1929 = vmatprep.mubr.msk.bf16.mxu0 %vm2489_vm0, %v2488_v0 }
 0x39f   :  { %1915 = vmatprep.subr.bf16.mxu0 %v2488_v0 }
 0x3a2   :  { %1916 = vmatpush3.bf16.msra.mxu0 %v2094_v22  ;;  %v2129_v22 = vld [vmem:[#allocation19 + $0x30] sm:$0xff]  }
 0x3a3   :  { %1917 = vmatprep.subr.bf16.mxu0 %v2488_v0 }
 0x3a6   :  { %1918 = vmatpush3.bf16.msra.mxu0 %v2096_v23  ;;  %v2130_v23 = vld [vmem:[#allocation19 + $0x38] sm:$0xff]  }
 0x3a7   :  { %1919 = vmatprep.subr.bf16.mxu0 %v2488_v0 }
 0x3aa   :  { %1920 = vmatpush3.bf16.msra.mxu0 %v2098_v24  ;;  %v2131_v24 = vld [vmem:[#allocation20] sm:$0xff]  }
 0x3ab   :  { %1921 = vmatprep.subr.bf16.mxu0 %v2488_v0 }
 0x3ae   :  { %1922 = vmatpush3.bf16.msra.mxu0 %v2100_v25  ;;  %v2133_v25 = vld [vmem:[#allocation20 + $0x8] sm:$0xff]  }
 0x3af   :  { %1923 = vmatprep.subr.bf16.mxu0 %v2488_v0 }
 0x3b2   :  { %1924 = vmatpush3.bf16.msra.mxu0 %v2102_v26  ;;  %v2135_v26 = vld [vmem:[#allocation20 + $0x10] sm:$0xff]  }
 0x3b3   :  { %1925 = vmatprep.subr.bf16.mxu0 %v2488_v0 }
 0x3b6   :  { %1926 = vmatpush3.bf16.msra.mxu0 %v2104_v28  ;;  %v2139_v28 = vld [vmem:[#allocation20 + $0x20] sm:$0xff]  }
 0x3b7   :  { %1927 = vmatprep.subr.bf16.mxu0 %v2488_v0 }
 0x3ba   :  { %1928 = vmatpush3.bf16.msra.mxu0 %v2106_v30 }
 0x3bb   :  { %1953 = vmatprep.subr.bf16.mxu0 %v2488_v0 }
 0x470   :  { %v772_v32 = vpop.f32.mrb[8].mxu0 }
 0x471   :  { %v773_v33 = vadd.f32 %v1614_v31, %v772_v32  ;;  %v1891_v34 = vpop.f32.mrb[9].mxu0  ;;  %v1657_v31 = vld [vmem:[%s2972_s14] ss:$0 sm:$0xff] }
 0x472   :  { %v775_v35 = vpop.f32.mrb[10].mxu0 }
 0x473   :  { %v778_v36 = vmul.f32 0.01, %v773_v33  ;;  %v1892_v37 = vpop.f32.mrb[11].mxu0 }
 0x475   :  { %v779_v38 = vmax.f32 %v773_v33, %v778_v36 }
 0x477   :  { %v780_v41 = vpack.c.bf16 %v779_v38, %v779_v38 }
 0x479   :  { %1910 = vmatmul.mubr.bf16.vlgmr.msra.gmra.mrb[8].mxu1 %v780_v41  ;;  %1930 = vmatmul.mubr.bf16.vlgmr.msra.gmra.mrb[12].mxu0 %v780_v41  ;;  %v2134_v41 = vld [vmem:[#allocation22 + $0x8] sm:$0xff]  }
 0x47a   :  { %1954 = vmatpush3.bf16.msra.mxu0 %v2107_v39  ;;  %1934 = vmatpush3.bf16.msra.mxu1 %v2108_v40  ;;  %v2132_v39 = vld [vmem:[#allocation22] sm:$0xff]  }
 0x47b   :  { %1955 = vmatprep.subr.bf16.mxu0 %v2488_v0  ;;  %1935 = vmatprep.subr.bf16.mxu1 %v2488_v0 }
 0x47c   :  { %1969 = vmatprep.mubr.msk.bf16.mxu0 %vm2489_vm0, %v2488_v0  ;;  %1949 = vmatprep.mubr.msk.bf16.mxu1 %vm2489_vm0, %v2488_v0 }
 0x47e   :  { %1956 = vmatpush3.bf16.msra.mxu0 %v2109_v42  ;;  %1936 = vmatpush3.bf16.msra.mxu1 %v2110_v43  ;;  %v2136_v42 = vld [vmem:[#allocation22 + $0x10] sm:$0xff]   ;;  %v2138_v43 = vld [vmem:[#allocation22 + $0x18] sm:$0xff]  }
 0x47f   :  { %1957 = vmatprep.subr.bf16.mxu0 %v2488_v0  ;;  %1937 = vmatprep.subr.bf16.mxu1 %v2488_v0 }
 0x482   :  { %1958 = vmatpush3.bf16.msra.mxu0 %v2111_v44  ;;  %1938 = vmatpush3.bf16.msra.mxu1 %v2112_v45  ;;  %v2140_v44 = vld [vmem:[#allocation22 + $0x20] sm:$0xff]   ;;  %v2142_v45 = vld [vmem:[#allocation22 + $0x28] sm:$0xff]  }
 0x483   :  { %1959 = vmatprep.subr.bf16.mxu0 %v2488_v0  ;;  %1939 = vmatprep.subr.bf16.mxu1 %v2488_v0 }
 0x486   :  { %1960 = vmatpush3.bf16.msra.mxu0 %v2113_v46  ;;  %1940 = vmatpush3.bf16.msra.mxu1 %v2114_v47  ;;  %v2143_v46 = vld [vmem:[#allocation20 + $0x30] sm:$0xff]  }
 0x487   :  { %1961 = vmatprep.subr.bf16.mxu0 %v2488_v0  ;;  %1941 = vmatprep.subr.bf16.mxu1 %v2488_v0  ;;  %v2144_v47 = vld [vmem:[#allocation22 + $0x30] sm:$0xff]  }
 0x48a   :  { %1962 = vmatpush3.bf16.msra.mxu0 %v2115_v48  ;;  %1942 = vmatpush3.bf16.msra.mxu1 %v2116_v49  ;;  %v2145_v48 = vld [vmem:[#allocation20 + $0x38] sm:$0xff]  }
 0x48b   :  { %1963 = vmatprep.subr.bf16.mxu0 %v2488_v0  ;;  %1943 = vmatprep.subr.bf16.mxu1 %v2488_v0  ;;  %v2146_v49 = vld [vmem:[#allocation22 + $0x38] sm:$0xff]  }
 0x48e   :  { %1964 = vmatpush3.bf16.msra.mxu0 %v2117_v50  ;;  %1944 = vmatpush3.bf16.msra.mxu1 %v2118_v51  ;;  %v1658_v50 = vld [vmem:[%s2972_s14 + $0x1] ss:$0 sm:$0xff] }
 0x48f   :  { %1965 = vmatprep.subr.bf16.mxu0 %v2488_v0  ;;  %1945 = vmatprep.subr.bf16.mxu1 %v2488_v0 }
 0x492   :  { %1966 = vmatpush3.bf16.msra.mxu0 %v2119_v52  ;;  %1946 = vmatpush3.bf16.msra.mxu1 %v2120_v53 }
 0x493   :  { %1967 = vmatprep.subr.bf16.mxu0 %v2488_v0  ;;  %1947 = vmatprep.subr.bf16.mxu1 %v2488_v0 }
 0x496   :  { %1968 = vmatpush3.bf16.msra.mxu0 %v2121_v54  ;;  %1948 = vmatpush3.bf16.msra.mxu1 %v2122_v55 }
 0x497   :  { %1993 = vmatprep.subr.bf16.mxu0 %v2488_v0  ;;  %1973 = vmatprep.subr.bf16.mxu1 %v2488_v0 }
 0x499   :  { %1970 = vmatmul.mubr.bf16.vlgmr.msra.gmra.mrb[16].mxu0 %v2812_v21 }
 0x49a   :  { %2009 = vmatprep.mubr.msk.bf16.mxu0 %vm2489_vm0, %v2488_v0  ;;  %1994 = vmatpush3.bf16.msra.mxu0 %v2131_v24 }
 0x49b   :  { %1995 = vmatprep.subr.bf16.mxu0 %v2488_v0 }
 0x49e   :  { %1996 = vmatpush3.bf16.msra.mxu0 %v2133_v25 }
 0x49f   :  { %1997 = vmatprep.subr.bf16.mxu0 %v2488_v0 }
 0x4a2   :  { %1998 = vmatpush3.bf16.msra.mxu0 %v2135_v26 }
 0x4a3   :  { %1999 = vmatprep.subr.bf16.mxu0 %v2488_v0 }
 0x4a6   :  { %2000 = vmatpush3.bf16.msra.mxu0 %v2137_v27 }
 0x4a7   :  { %2001 = vmatprep.subr.bf16.mxu0 %v2488_v0 }
 0x4aa   :  { %2002 = vmatpush3.bf16.msra.mxu0 %v2139_v28 }
 0x4ab   :  { %2003 = vmatprep.subr.bf16.mxu0 %v2488_v0 }
 0x4ae   :  { %2004 = vmatpush3.bf16.msra.mxu0 %v2141_v29 }
 0x4af   :  { %2005 = vmatprep.subr.bf16.mxu0 %v2488_v0 }
 0x4b2   :  { %2006 = vmatpush3.bf16.msra.mxu0 %v2143_v46 }
 0x4b3   :  { %2007 = vmatprep.subr.bf16.mxu0 %v2488_v0 }
 0x4b6   :  { %2008 = vmatpush3.bf16.msra.mxu0 %v2145_v48 }
 0x54c   :  { %v884_v58 = vpop.f32.mrb[8].mxu1  ;;  %v993_v59 = vpop.f32.mrb[12].mxu0 }
 0x54d   :  { %v885_v60 = vadd.f32 %v1623_v56, %v884_v58  ;;  %v994_v61 = vadd.f32 %v1632_v57, %v993_v59  ;;  %v1911_v62 = vpop.f32.mrb[9].mxu1  ;;  %v1931_v63 = vpop.f32.mrb[13].mxu0  ;;  %v1676_v59 = vld [vmem:[%s2972_s14 + $0x3] ss:$0 sm:$0xff] }
 0x54e   :  { %v887_v21 = vpop.f32.mrb[10].mxu1  ;;  %v996_v1 = vpop.f32.mrb[14].mxu0 }
 0x54f   :  { %1553 = vst [vmem:[#allocation23] sm:$0xff] %v885_v60  ;;  %v999_v2 = vmul.f32 0.5, %v994_v61  ;;  %1554 = vst [vmem:[#allocation23 + $0x8] sm:$0xff] %v994_v61  ;;  %v1912_v3 = vpop.f32.mrb[11].mxu1  ;;  %v1932_v4 = vpop.f32.mrb[15].mxu0 }
 0x551   :  { %v1000_v5 = vmul.f32 1.442695, %v999_v2 }
 0x553   :  { %2147 = vpow2.f32 %v1000_v5 }
 0x55d   :  { %v2148_v7 = vpop.eup %2147 }
 0x55e   :  { %v1003_v8 = vmul.f32 %v2148_v7, %v1002_v6 }
 0x560   :  { %v1004_v9 = vadd.f32 %v1003_v8, %v885_v60 }
 0x562   :  { %v1005_v11 = vpack.c.bf16 %v1004_v9, %v1004_v9  ;;  %1555 = vst [vmem:[#allocation23 + $0x10] sm:$0xff] %v1004_v9 }
 0x564   :  { %1950 = vmatmul.mubr.bf16.vlgmr.msra.gmra.mrb[12].mxu1 %v1005_v11 }
 0x565   :  { %1974 = vmatpush3.bf16.msra.mxu1 %v2123_v10  ;;  %1989 = vmatprep.mubr.msk.bf16.mxu1 %vm2489_vm0, %v2488_v0 }
 0x566   :  { %1975 = vmatprep.subr.bf16.mxu1 %v2488_v0 }
 0x569   :  { %1976 = vmatpush3.bf16.msra.mxu1 %v2124_v12 }
 0x56a   :  { %1977 = vmatprep.subr.bf16.mxu1 %v2488_v0 }
 0x56c   :  { %v1208_v16 = vpop.f32.mrb[16].mxu0 }
 0x56d   :  { %1978 = vmatpush3.bf16.msra.mxu1 %v2125_v13  ;;  %v1971_v17 = vpop.f32.mrb[17].mxu0 }
 0x56e   :  { %1979 = vmatprep.subr.bf16.mxu1 %v2488_v0  ;;  %v1211_v19 = vpop.f32.mrb[18].mxu0 }
 0x56f   :  { %v1972_v20 = vpop.f32.mrb[19].mxu0 }
 0x571   :  { %1980 = vmatpush3.bf16.msra.mxu1 %v2126_v14 }
 0x572   :  { %1981 = vmatprep.subr.bf16.mxu1 %v2488_v0 }
 0x575   :  { %1982 = vmatpush3.bf16.msra.mxu1 %v2127_v15 }
 0x576   :  { %1983 = vmatprep.subr.bf16.mxu1 %v2488_v0 }
 0x579   :  { %1984 = vmatpush3.bf16.msra.mxu1 %v2128_v18 }
 0x57a   :  { %1985 = vmatprep.subr.bf16.mxu1 %v2488_v0 }
 0x57d   :  { %1986 = vmatpush3.bf16.msra.mxu1 %v2129_v22 }
 0x57e   :  { %1987 = vmatprep.subr.bf16.mxu1 %v2488_v0 }
 0x581   :  { %1988 = vmatpush3.bf16.msra.mxu1 %v2130_v23 }
 0x582   :  { %2013 = vmatprep.subr.bf16.mxu1 %v2488_v0 }
 0x637   :  { %v1120_v30 = vpop.f32.mrb[12].mxu1 }
 0x638   :  { %v1209_v32 = vadd.f32 %v1208_v16, %v1120_v30  ;;  %v1951_v33 = vpop.f32.mrb[13].mxu1 }
 0x639   :  { %v1123_v34 = vpop.f32.mrb[14].mxu1 }
 0x63a   :  { %v1219_v35 = vadd.f32 %v1657_v31, %v1209_v32  ;;  %v1952_v36 = vpop.f32.mrb[15].mxu1 }
 0x63c   :  { %v1220_v37 = vmul.f32 0.01, %v1219_v35 }
 0x63e   :  { %v1221_v38 = vmax.f32 %v1219_v35, %v1220_v37 }
 0x640   :  { %v1222_v40 = vpack.c.bf16 %v1221_v38, %v1221_v38 }
 0x642   :  { %1990 = vmatmul.mubr.bf16.vlgmr.msra.gmra.mrb[16].mxu1 %v1222_v40 }
 0x643   :  { %2014 = vmatpush3.bf16.msra.mxu1 %v2132_v39  ;;  %2029 = vmatprep.mubr.msk.bf16.mxu1 %vm2489_vm0, %v2488_v0 }
 0x644   :  { %2015 = vmatprep.subr.bf16.mxu1 %v2488_v0 }
 0x647   :  { %2016 = vmatpush3.bf16.msra.mxu1 %v2134_v41 }
 0x648   :  { %2017 = vmatprep.subr.bf16.mxu1 %v2488_v0 }
 0x64b   :  { %2018 = vmatpush3.bf16.msra.mxu1 %v2136_v42 }
 0x64c   :  { %2019 = vmatprep.subr.bf16.mxu1 %v2488_v0 }
 0x64f   :  { %2020 = vmatpush3.bf16.msra.mxu1 %v2138_v43 }
 0x650   :  { %2021 = vmatprep.subr.bf16.mxu1 %v2488_v0 }
 0x653   :  { %2022 = vmatpush3.bf16.msra.mxu1 %v2140_v44 }
 0x654   :  { %2023 = vmatprep.subr.bf16.mxu1 %v2488_v0 }
 0x657   :  { %2024 = vmatpush3.bf16.msra.mxu1 %v2142_v45 }
 0x658   :  { %2025 = vmatprep.subr.bf16.mxu1 %v2488_v0 }
 0x65b   :  { %2026 = vmatpush3.bf16.msra.mxu1 %v2144_v47 }
 0x65c   :  { %2027 = vmatprep.subr.bf16.mxu1 %v2488_v0  ;;  %v1667_v0 = vld [vmem:[%s2972_s14 + $0x2] ss:$0 sm:$0xff] }
 0x65f   :  { %2028 = vmatpush3.bf16.msra.mxu1 %v2146_v49 }
 0x715   :  { %v1326_v51 = vpop.f32.mrb[16].mxu1 }
 0x716   :  { %v1327_v52 = vadd.f32 %v1658_v50, %v1326_v51  ;;  %v1991_v53 = vpop.f32.mrb[17].mxu1 }
 0x717   :  { %v1329_v54 = vpop.f32.mrb[18].mxu1 }
 0x718   :  { %v1332_v55 = vmul.f32 0.01, %v1327_v52  ;;  %v1992_v56 = vpop.f32.mrb[19].mxu1 }
 0x71a   :  { %v1333_v57 = vmax.f32 %v1327_v52, %v1332_v55 }
 0x71c   :  { %v1334_v58 = vpack.c.bf16 %v1333_v57, %v1333_v57 }
 0x71e   :  { %2010 = vmatmul.mubr.bf16.vlgmr.msra.gmra.mrb[20].mxu0 %v1334_v58  ;;  %2030 = vmatmul.mubr.bf16.vlgmr.msra.gmra.mrb[20].mxu1 %v1334_v58 }
 0x7f1   :  { %v1438_v60 = vpop.f32.mrb[20].mxu0  ;;  %v1547_v61 = vpop.f32.mrb[20].mxu1 }
 0x7f2   :  { %v1439_v62 = vadd.f32 %v1667_v0, %v1438_v60  ;;  %v1548_v63 = vadd.f32 %v1676_v59, %v1547_v61  ;;  %v2011_v21 = vpop.f32.mrb[21].mxu0  ;;  %v2031_v1 = vpop.f32.mrb[21].mxu1 }
 0x7f3   :  { %v1441_v2 = vpop.f32.mrb[22].mxu0  ;;  %v1550_v3 = vpop.f32.mrb[22].mxu1 }
 0x7f4   :  { %1556 = vst [vmem:[#allocation23 + $0x18] sm:$0xff] %v1439_v62  ;;  %1557 = vst [vmem:[#allocation23 + $0x20] sm:$0xff] %v1548_v63  ;;  %v2012_v4 = vpop.f32.mrb[23].mxu0  ;;  %v2032_v5 = vpop.f32.mrb[23].mxu1 }
 0x7f5   :  { %2446 = shalt.err (!%p2443_p10)
}
 0x7f6   :  { %s2447_s2 = scalar_lea.hbm %s2973_s15, 640 }
 0x7f7   :  { %p2448_p11 = scmp.ne.s32.totalorder %s2973_s15, %s2447_s2  ;;  %p2451_p12 = scmp.lt.u32.totalorder %s2447_s2, %s2973_s15 }
 0x7f9   :  { %p2453_p13 = pnand %p2451_p12, %p2448_p11 }
 0x7fb   :  { %2456 = shalt.err (!%p2453_p13)
}
 0x7fc   :  { %1567 = dma.vmem_to_hbm [thread:$0]  %s1565_s3, 640, %s2973_s15, [#allocation4]  }
 0x7fd   :  { %2471 = dma.done.wait [#allocation4], 640  }
 0x7fe   :  { %2472 = vsyncadd [#allocation4], 4294966656 }
 0x7ff   :  { %1571 = vsyncpa [#allocation3], 1 }
 0x800   :  { %1572 = vsyncpa [#allocation6], 1 }
 0x801   :  { %1573 = vsyncpa [#allocation9], 1 }
 0x802   :  { %1574 = vsyncpa [#allocation12], 1 }
 0x803   :  { %1575 = vsyncpa [#allocation15], 1 }
 0x804   :  { %1576 = vsyncpa [#allocation18], 1 }
 0x805   :  { %1577 = vsyncpa [#allocation21], 1 }
 0x806   :  { %1578 = vsyncpa [#allocation4], 1 }

// kernel: tpu_custom_call.1
= control target key start
LH: loop header
LB: loop body
LE: loop exit
PB: predicated region body
PF: predicated region fallthrough
CT: control target
= control target key end

     0   :  { %20 = vsyncpa [#allocation3], 0  ;;  %s2958_s0 = inlined_call_operand.hbm [shape: f32[8,128], index: 0, kind: input, shape index: {}]   ;;  %s2959_s1 = inlined_call_operand.hbm [shape: f32[8,128], index: 1, kind: input, shape index: {}]   ;;  %s2960_s2 = inlined_call_operand.hbm [shape: f32[8,128], index: 2, kind: input, shape index: {}]   ;;  %s2961_s3 = inlined_call_operand.hbm [shape: bf16[128,128], index: 3, kind: input, shape index: {}]   ;;  %s2962_s4 = inlined_call_operand.hbm [shape: bf16[128,128], index: 4, kind: input, shape index: {}]   ;;  %s2963_s5 = inlined_call_operand.hbm [shape: bf16[3,128,128], index: 5, kind: input, shape index: {}]   ;;  %s2964_s6 = inlined_call_operand.hbm [shape: bf16[128,128], index: 6, kind: input, shape index: {}]   ;;  %s2965_s7 = inlined_call_operand.hbm [shape: bf16[128,128], index: 7, kind: input, shape index: {}]   ;;  %s2966_s8 = inlined_call_operand.vmem [shape: f32[6,128], index: 8, kind: input, shape index: {}]   ;;  %s2967_s9 = inlined_call_operand.hbm [shape: bf16[128,128], index: 9, kind: input, shape index: {}]   ;;  %s2968_s10 = inlined_call_operand.hbm [shape: bf16[128,128], index: 10, kind: input, shape index: {}]   ;;  %s2969_s11 = inlined_call_operand.hbm [shape: bf16[1,128,128], index: 11, kind: input, shape index: {}]   ;;  %s2970_s12 = inlined_call_operand.hbm [shape: bf16[128,128], index: 12, kind: input, shape index: {}]   ;;  %s2971_s13 = inlined_call_operand.hbm [shape: bf16[128,128], index: 13, kind: input, shape index: {}]   ;;  %s2972_s14 = inlined_call_operand.vmem [shape: f32[4,128], index: 14, kind: input, shape index: {}]   ;;  %s2973_s15 = inlined_call_operand.hbm [shape: f32[8,640], index: 15, kind: output, shape index: {}]  }
   0x1   :  { %21 = vsyncpa [#allocation6], 0 }
   0x2   :  { %22 = vsyncpa [#allocation9], 0 }
   0x3   :  { %23 = vsyncpa [#allocation12], 0 }
   0x4   :  { %24 = vsyncpa [#allocation15], 0 }
   0x5   :  { %25 = vsyncpa [#allocation18], 0 }
   0x6   :  { %26 = vsyncpa [#allocation21], 0 }
   0x7   :  { %27 = vsyncpa [#allocation4], 0  ;;  %s2473_s18 = smov [#allocation5]   ;;  %s2474_s20 = smov [#allocation8]  }
   0x8   :  { %s44_s19 = sshll.u32 %s2473_s18, 4  ;;  %s63_s21 = sshll.u32 %s2474_s20, 4  ;;  %s45_s19 = int_to_ptr.vmem [resolvable:$true] %s44_s19  ;;  %s2571_s21 = int_to_ptr.vmem [resolvable:$true] %s63_s21 }
   0x9   :  { %s2149_s24 = scalar_lea.hbm %s2959_s1, 128 }
   0xa   :  { %p2150_p0 = scmp.ne.s32.totalorder %s2959_s1, %s2149_s24  ;;  %p2153_p1 = scmp.lt.u32.totalorder %s2149_s24, %s2959_s1 }
   0xc   :  { %p2155_p2 = pnand %p2153_p1, %p2150_p0 }
   0xe   :  { %2158 = shalt.err (!%p2155_p2)
}
   0xf   :  { %s2159_s29 = scalar_lea.vmem %s45_s19, 128  ;;  %p2164_p4 = scmp.lt.s32.totalorder %s45_s19, %s45_s19 }
  0x10   :  { %p2160_p3 = scmp.ne.s32.totalorder %s45_s19, %s2159_s29  ;;  %p2165_p5 = scmp.lt.s32.totalorder %s2159_s29, %s2159_s29 }
  0x12   :  { %p2166_p6 = por %p2165_p5, %p2164_p4 }
  0x14   :  { %p2167_p7 = pnand %p2166_p6, %p2160_p3 }
  0x16   :  { %2170 = shalt.err (!%p2167_p7)
}
  0x17   :  { %47 = dma.hbm_to_vmem [thread:$0]  %s2959_s1, 128, %s45_s19, [#allocation6]  }
  0x18   :  { %s2171_s20 = scalar_lea.hbm %s2961_s3, 1024 }
  0x19   :  { %p2172_p8 = scmp.ne.s32.totalorder %s2961_s3, %s2171_s20  ;;  %p2175_p9 = scmp.lt.u32.totalorder %s2171_s20, %s2961_s3 }
  0x1b   :  { %p2177_p10 = pnand %p2175_p9, %p2172_p8 }
  0x1d   :  { %2180 = shalt.err (!%p2177_p10)
}
  0x1e   :  { %s2181_s26 = scalar_lea.vmem %s2571_s21, 1024  ;;  %p2186_p12 = scmp.lt.s32.totalorder %s2571_s21, %s2571_s21 }
  0x1f   :  { %p2182_p11 = scmp.ne.s32.totalorder %s2571_s21, %s2181_s26  ;;  %p2187_p13 = scmp.lt.s32.totalorder %s2181_s26, %s2181_s26 }
  0x21   :  { %p2188_p0 = por %p2187_p13, %p2186_p12 }
  0x23   :  { %p2189_p1 = pnand %p2188_p0, %p2182_p11 }
  0x25   :  { %2192 = shalt.err (!%p2189_p1)
}
  0x26   :  { %s2475_s1 = smov 64   ;;  %s2476_s19 = smov 4  }
  0x27   :  { %69 = dma.hbm_to_vmem [thread:$0]  %s2961_s3, 1024, %s2571_s21, [#allocation9], %s2475_s1, %s2475_s1, %s2476_s19  }
  0x28   :  { %s2477_s29 = smov [#allocation11]   ;;  %s2478_s16 = smov [#allocation14]  }
  0x29   :  { %s87_s30 = sshll.u32 %s2477_s29, 4  ;;  %s111_s17 = sshll.u32 %s2478_s16, 4  ;;  %s88_s30 = int_to_ptr.vmem [resolvable:$true] %s87_s30  ;;  %s2605_s17 = int_to_ptr.vmem [resolvable:$true] %s111_s17 }
  0x2a   :  { %s2193_s22 = scalar_lea.hbm %s2963_s5, 3072 }
  0x2b   :  { %p2194_p2 = scmp.ne.s32.totalorder %s2963_s5, %s2193_s22  ;;  %p2197_p3 = scmp.lt.u32.totalorder %s2193_s22, %s2963_s5 }
  0x2d   :  { %p2199_p4 = pnand %p2197_p3, %p2194_p2 }
  0x2f   :  { %2202 = shalt.err (!%p2199_p4)
}
  0x30   :  { %s2203_s3 = scalar_lea.vmem %s88_s30, 3072  ;;  %p2208_p6 = scmp.lt.s32.totalorder %s88_s30, %s88_s30 }
  0x31   :  { %p2204_p5 = scmp.ne.s32.totalorder %s88_s30, %s2203_s3  ;;  %p2209_p7 = scmp.lt.s32.totalorder %s2203_s3, %s2203_s3 }
  0x33   :  { %p2210_p8 = por %p2209_p7, %p2208_p6 }
  0x35   :  { %p2211_p9 = pnand %p2210_p8, %p2204_p5 }
  0x37   :  { %2214 = shalt.err (!%p2211_p9)
}
  0x38   :  { %93 = dma.hbm_to_vmem [thread:$0]  %s2963_s5, 3072, %s88_s30, [#allocation12], %s2475_s1, %s2475_s1, %s2476_s19  }
  0x39   :  { %s2215_s16 = scalar_lea.hbm %s2965_s7, 1024 }
  0x3a   :  { %p2216_p10 = scmp.ne.s32.totalorder %s2965_s7, %s2215_s16  ;;  %p2219_p11 = scmp.lt.u32.totalorder %s2215_s16, %s2965_s7 }
  0x3c   :  { %p2221_p12 = pnand %p2219_p11, %p2216_p10 }
  0x3e   :  { %2224 = shalt.err (!%p2221_p12)
}
  0x3f   :  { %s2225_s24 = scalar_lea.vmem %s2605_s17, 1024  ;;  %p2230_p0 = scmp.lt.s32.totalorder %s2605_s17, %s2605_s17 }
  0x40   :  { %p2226_p13 = scmp.ne.s32.totalorder %s2605_s17, %s2225_s24  ;;  %p2231_p1 = scmp.lt.s32.totalorder %s2225_s24, %s2225_s24 }
  0x42   :  { %p2232_p2 = por %p2231_p1, %p2230_p0 }
  0x44   :  { %p2233_p3 = pnand %p2232_p2, %p2226_p13 }
  0x46   :  { %2236 = shalt.err (!%p2233_p3)
}
  0x47   :  { %117 = dma.hbm_to_vmem [thread:$0]  %s2965_s7, 1024, %s2605_s17, [#allocation15], %s2475_s1, %s2475_s1, %s2476_s19  }
  0x48   :  { %s2479_s25 = smov [#allocation17]   ;;  %s2480_s3 = smov [#allocation20]  }
  0x49   :  { %s137_s26 = sshll.u32 %s2479_s25, 4  ;;  %s161_s21 = sshll.u32 %s2480_s3, 4  ;;  %s138_s26 = int_to_ptr.vmem [resolvable:$true] %s137_s26  ;;  %s2642_s21 = int_to_ptr.vmem [resolvable:$true] %s161_s21 }
  0x4a   :  { %s2237_s29 = scalar_lea.hbm %s2968_s10, 1024 }
  0x4b   :  { %p2238_p4 = scmp.ne.s32.totalorder %s2968_s10, %s2237_s29  ;;  %p2241_p5 = scmp.lt.u32.totalorder %s2237_s29, %s2968_s10 }
  0x4d   :  { %p2243_p6 = pnand %p2241_p5, %p2238_p4 }
  0x4f   :  { %2246 = shalt.err (!%p2243_p6)
}
  0x50   :  { %s2247_s7 = scalar_lea.vmem %s138_s26, 1024  ;;  %p2252_p8 = scmp.lt.s32.totalorder %s138_s26, %s138_s26 }
  0x51   :  { %p2248_p7 = scmp.ne.s32.totalorder %s138_s26, %s2247_s7  ;;  %p2253_p9 = scmp.lt.s32.totalorder %s2247_s7, %s2247_s7 }
  0x53   :  { %p2254_p10 = por %p2253_p9, %p2252_p8 }
  0x55   :  { %p2255_p11 = pnand %p2254_p10, %p2248_p7 }
  0x57   :  { %2258 = shalt.err (!%p2255_p11)
}
  0x58   :  { %143 = dma.hbm_to_vmem [thread:$0]  %s2968_s10, 1024, %s138_s26, [#allocation18], %s2475_s1, %s2475_s1, %s2476_s19  }
  0x59   :  { %s2259_s30 = scalar_lea.hbm %s2970_s12, 1024 }
  0x5a   :  { %p2260_p12 = scmp.ne.s32.totalorder %s2970_s12, %s2259_s30  ;;  %p2263_p13 = scmp.lt.u32.totalorder %s2259_s30, %s2970_s12 }
  0x5c   :  { %p2265_p0 = pnand %p2263_p13, %p2260_p12 }
  0x5e   :  { %2268 = shalt.err (!%p2265_p0)
}
  0x5f   :  { %s2269_s29 = scalar_lea.vmem %s2642_s21, 1024  ;;  %p2274_p2 = scmp.lt.s32.totalorder %s2642_s21, %s2642_s21 }
  0x60   :  { %p2270_p1 = scmp.ne.s32.totalorder %s2642_s21, %s2269_s29  ;;  %p2275_p3 = scmp.lt.s32.totalorder %s2269_s29, %s2269_s29 }
  0x62   :  { %p2276_p4 = por %p2275_p3, %p2274_p2 }
  0x64   :  { %p2277_p5 = pnand %p2276_p4, %p2270_p1 }
  0x66   :  { %2280 = shalt.err (!%p2277_p5)
}
  0x67   :  { %167 = dma.hbm_to_vmem [thread:$0]  %s2970_s12, 1024, %s2642_s21, [#allocation21], %s2475_s1, %s2475_s1, %s2476_s19  }
  0x68   :  { %s2481_s16 = smov [#allocation2]   ;;  %s2482_s20 = smov [#allocation7]  }
  0x69   :  { %s34_s18 = sshll.u32 %s2481_s16, 4  ;;  %s54_s22 = sshll.u32 %s2482_s20, 4  ;;  %s35_s18 = int_to_ptr.vmem [resolvable:$true] %s34_s18  ;;  %s55_s22 = int_to_ptr.vmem [resolvable:$true] %s54_s22 }
  0x6a   :  { %s2281_s23 = scalar_lea.hbm %s2958_s0, 128 }
  0x6b   :  { %p2282_p6 = scmp.ne.s32.totalorder %s2958_s0, %s2281_s23  ;;  %p2285_p7 = scmp.lt.u32.totalorder %s2281_s23, %s2958_s0 }
  0x6d   :  { %p2287_p8 = pnand %p2285_p7, %p2282_p6 }
  0x6f   :  { %2290 = shalt.err (!%p2287_p8)
}
  0x70   :  { %s2291_s12 = scalar_lea.vmem %s35_s18, 128  ;;  %p2296_p10 = scmp.lt.s32.totalorder %s35_s18, %s35_s18 }
  0x71   :  { %p2292_p9 = scmp.ne.s32.totalorder %s35_s18, %s2291_s12  ;;  %p2297_p11 = scmp.lt.s32.totalorder %s2291_s12, %s2291_s12 }
  0x73   :  { %p2298_p12 = por %p2297_p11, %p2296_p10 }
  0x75   :  { %p2299_p13 = pnand %p2298_p12, %p2292_p9 }
  0x77   :  { %2302 = shalt.err (!%p2299_p13)
}
  0x78   :  { %37 = dma.hbm_to_vmem [thread:$0]  %s2958_s0, 128, %s35_s18, [#allocation3]  }
  0x79   :  { %s2303_s29 = scalar_lea.hbm %s2960_s2, 128 }
  0x7a   :  { %p2304_p0 = scmp.ne.s32.totalorder %s2960_s2, %s2303_s29  ;;  %p2307_p1 = scmp.lt.u32.totalorder %s2303_s29, %s2960_s2 }
  0x7c   :  { %p2309_p2 = pnand %p2307_p1, %p2304_p0 }
  0x7e   :  { %2312 = shalt.err (!%p2309_p2)
}
  0x7f   :  { %s2313_s7 = scalar_lea.vmem %s55_s22, 128  ;;  %p2318_p4 = scmp.lt.s32.totalorder %s55_s22, %s55_s22 }
  0x80   :  { %p2314_p3 = scmp.ne.s32.totalorder %s55_s22, %s2313_s7  ;;  %p2319_p5 = scmp.lt.s32.totalorder %s2313_s7, %s2313_s7 }
  0x82   :  { %p2320_p6 = por %p2319_p5, %p2318_p4 }
  0x84   :  { %p2321_p7 = pnand %p2320_p6, %p2314_p3 }
  0x86   :  { %2324 = shalt.err (!%p2321_p7)
}
  0x87   :  { %57 = dma.hbm_to_vmem [thread:$0]  %s2960_s2, 128, %s55_s22, [#allocation6]  }
  0x88   :  { %s2483_s17 = smov [#allocation10]   ;;  %s2484_s24 = smov [#allocation13]  }
  0x89   :  { %s75_s23 = sshll.u32 %s2483_s17, 4  ;;  %s99_s5 = sshll.u32 %s2484_s24, 4  ;;  %s76_s23 = int_to_ptr.vmem [resolvable:$true] %s75_s23  ;;  %s2703_s5 = int_to_ptr.vmem [resolvable:$true] %s99_s5 }
  0x8a   :  { %s2325_s12 = scalar_lea.hbm %s2962_s4, 1024 }
  0x8b   :  { %p2326_p8 = scmp.ne.s32.totalorder %s2962_s4, %s2325_s12  ;;  %p2329_p9 = scmp.lt.u32.totalorder %s2325_s12, %s2962_s4 }
  0x8d   :  { %p2331_p10 = pnand %p2329_p9, %p2326_p8 }
  0x8f   :  { %2334 = shalt.err (!%p2331_p10)
}
  0x90   :  { %s2335_s2 = scalar_lea.vmem %s76_s23, 1024  ;;  %p2340_p12 = scmp.lt.s32.totalorder %s76_s23, %s76_s23 }
  0x91   :  { %p2336_p11 = scmp.ne.s32.totalorder %s76_s23, %s2335_s2  ;;  %p2341_p13 = scmp.lt.s32.totalorder %s2335_s2, %s2335_s2 }
  0x93   :  { %p2342_p0 = por %p2341_p13, %p2340_p12 }
  0x95   :  { %p2343_p1 = pnand %p2342_p0, %p2336_p11 }
  0x97   :  { %2346 = shalt.err (!%p2343_p1)
}
  0x98   :  { %81 = dma.hbm_to_vmem [thread:$0]  %s2962_s4, 1024, %s76_s23, [#allocation9], %s2475_s1, %s2475_s1, %s2476_s19  }
  0x99   :  { %s2347_s16 = scalar_lea.hbm %s2964_s6, 1024 }
  0x9a   :  { %p2348_p2 = scmp.ne.s32.totalorder %s2964_s6, %s2347_s16  ;;  %p2351_p3 = scmp.lt.u32.totalorder %s2347_s16, %s2964_s6 }
  0x9c   :  { %p2353_p4 = pnand %p2351_p3, %p2348_p2 }
  0x9e   :  { %2356 = shalt.err (!%p2353_p4)
}
  0x9f   :  { %s2357_s17 = scalar_lea.vmem %s2703_s5, 1024  ;;  %p2362_p6 = scmp.lt.s32.totalorder %s2703_s5, %s2703_s5 }
  0xa0   :  { %p2358_p5 = scmp.ne.s32.totalorder %s2703_s5, %s2357_s17  ;;  %p2363_p7 = scmp.lt.s32.totalorder %s2357_s17, %s2357_s17 }
  0xa2   :  { %p2364_p8 = por %p2363_p7, %p2362_p6 }
  0xa4   :  { %p2365_p9 = pnand %p2364_p8, %p2358_p5 }
  0xa6   :  { %2368 = shalt.err (!%p2365_p9)
}
  0xa7   :  { %105 = dma.hbm_to_vmem [thread:$0]  %s2964_s6, 1024, %s2703_s5, [#allocation12], %s2475_s1, %s2475_s1, %s2476_s19  }
  0xa8   :  { %s2485_s24 = smov [#allocation16]   ;;  %s2486_s25 = smov [#allocation19]  }
  0xa9   :  { %s125_s30 = sshll.u32 %s2485_s24, 4  ;;  %s149_s12 = sshll.u32 %s2486_s25, 4  ;;  %s126_s30 = int_to_ptr.vmem [resolvable:$true] %s125_s30  ;;  %s2740_s12 = int_to_ptr.vmem [resolvable:$true] %s149_s12 }
  0xaa   :  { %s2369_s27 = scalar_lea.hbm %s2967_s9, 1024 }
  0xab   :  { %p2370_p10 = scmp.ne.s32.totalorder %s2967_s9, %s2369_s27  ;;  %p2373_p11 = scmp.lt.u32.totalorder %s2369_s27, %s2967_s9 }
  0xad   :  { %p2375_p12 = pnand %p2373_p11, %p2370_p10 }
  0xaf   :  { %2378 = shalt.err (!%p2375_p12)
}
  0xb0   :  { %s2379_s6 = scalar_lea.vmem %s126_s30, 1024  ;;  %p2384_p0 = scmp.lt.s32.totalorder %s126_s30, %s126_s30 }
  0xb1   :  { %p2380_p13 = scmp.ne.s32.totalorder %s126_s30, %s2379_s6  ;;  %p2385_p1 = scmp.lt.s32.totalorder %s2379_s6, %s2379_s6 }
  0xb3   :  { %p2386_p2 = por %p2385_p1, %p2384_p0 }
  0xb5   :  { %p2387_p3 = pnand %p2386_p2, %p2380_p13 }
  0xb7   :  { %2390 = shalt.err (!%p2387_p3)
}
  0xb8   :  { %131 = dma.hbm_to_vmem [thread:$0]  %s2967_s9, 1024, %s126_s30, [#allocation15], %s2475_s1, %s2475_s1, %s2476_s19  }
  0xb9   :  { %s2391_s20 = scalar_lea.hbm %s2969_s11, 1024 }
  0xba   :  { %p2392_p4 = scmp.ne.s32.totalorder %s2969_s11, %s2391_s20  ;;  %p2395_p5 = scmp.lt.u32.totalorder %s2391_s20, %s2969_s11 }
  0xbc   :  { %p2397_p6 = pnand %p2395_p5, %p2392_p4 }
  0xbe   :  { %2400 = shalt.err (!%p2397_p6)
}
  0xbf   :  { %s2401_s4 = scalar_lea.vmem %s2740_s12, 1024  ;;  %p2406_p8 = scmp.lt.s32.totalorder %s2740_s12, %s2740_s12 }
  0xc0   :  { %p2402_p7 = scmp.ne.s32.totalorder %s2740_s12, %s2401_s4  ;;  %p2407_p9 = scmp.lt.s32.totalorder %s2401_s4, %s2401_s4 }
  0xc2   :  { %p2408_p10 = por %p2407_p9, %p2406_p8 }
  0xc4   :  { %p2409_p11 = pnand %p2408_p10, %p2402_p7 }
  0xc6   :  { %2412 = shalt.err (!%p2409_p11)
}
  0xc7   :  { %155 = dma.hbm_to_vmem [thread:$0]  %s2969_s11, 1024, %s2740_s12, [#allocation18], %s2475_s1, %s2475_s1, %s2476_s19  }
  0xc8   :  { %s2487_s24 = smov [#allocation22]   ;;  %s2413_s3 = scalar_lea.hbm %s2971_s13, 1024 }
  0xc9   :  { %s173_s30 = sshll.u32 %s2487_s24, 4  ;;  %p2414_p12 = scmp.ne.s32.totalorder %s2971_s13, %s2413_s3  ;;  %s174_s30 = int_to_ptr.vmem [resolvable:$true] %s173_s30 }
  0xca   :  { %p2417_p13 = scmp.lt.u32.totalorder %s2413_s3, %s2971_s13 }
  0xcc   :  { %p2419_p0 = pnand %p2417_p13, %p2414_p12 }
  0xce   :  { %2422 = shalt.err (!%p2419_p0)
}
  0xcf   :  { %s2423_s29 = scalar_lea.vmem %s174_s30, 1024  ;;  %p2428_p2 = scmp.lt.s32.totalorder %s174_s30, %s174_s30 }
  0xd0   :  { %p2424_p1 = scmp.ne.s32.totalorder %s174_s30, %s2423_s29  ;;  %p2429_p3 = scmp.lt.s32.totalorder %s2423_s29, %s2423_s29 }
  0xd2   :  { %p2430_p4 = por %p2429_p3, %p2428_p2 }
  0xd4   :  { %p2431_p5 = pnand %p2430_p4, %p2424_p1 }
  0xd6   :  { %2434 = shalt.err (!%p2431_p5)
}
  0xd7   :  { %179 = dma.hbm_to_vmem [thread:$0]  %s2971_s13, 1024, %s174_s30, [#allocation21], %s2475_s1, %s2475_s1, %s2476_s19  }
  0xd8   :  { %2457 = dma.done.wait [#allocation3], 128  }
  0xd9   :  { %2458 = vsyncadd [#allocation3], 4294967168 }
  0xda   :  { %2459 = dma.done.wait [#allocation6], 256  }
  0xdb   :  { %2460 = vsyncadd [#allocation6], 4294967040 }
  0xdc   :  { %2461 = dma.done.wait [#allocation9], 2048  }
  0xdd   :  { %2462 = vsyncadd [#allocation9], 4294965248 }
  0xde   :  { %2463 = dma.done.wait [#allocation12], 4096  }
  0xdf   :  { %2464 = vsyncadd [#allocation12], 4294963200 }
  0xe0   :  { %2465 = dma.done.wait [#allocation15], 2048  }
  0xe1   :  { %2466 = vsyncadd [#allocation15], 4294965248 }
  0xe2   :  { %2467 = dma.done.wait [#allocation18], 2048  }
  0xe3   :  { %2468 = vsyncadd [#allocation18], 4294965248 }
  0xe4   :  { %2469 = dma.done.wait [#allocation21], 2048  }
  0xe5   :  { %2470 = vsyncadd [#allocation21], 4294965248  ;;  %v2488_v0 = vmov 0.0   ;;  %vm2489_vm0 = vmmov 0   ;;  %v2051_v1 = vld [vmem:[#allocation10] sm:$0xff]   ;;  %v2053_v3 = vld [vmem:[#allocation10 + $0x8] sm:$0xff]  }
  0xe6   :  { %1793 = vmatprep.subr.bf16.mxu0 %v2488_v0  ;;  %1813 = vmatprep.subr.bf16.mxu1 %v2488_v0  ;;  %v2052_v2 = vld [vmem:[#allocation8] sm:$0xff]   ;;  %v2054_v4 = vld [vmem:[#allocation8 + $0x8] sm:$0xff]   ;;  %v2055_v5 = vld [vmem:[#allocation10 + $0x10] sm:$0xff]   ;;  %s2490_s21 = smov [#allocation23]  }
  0xe7   :  { %1809 = vmatprep.mubr.msk.bf16.mxu0 %vm2489_vm0, %v2488_v0  ;;  %1829 = vmatprep.mubr.msk.bf16.mxu1 %vm2489_vm0, %v2488_v0  ;;  %v2056_v6 = vld [vmem:[#allocation8 + $0x10] sm:$0xff]   ;;  %v2057_v7 = vld [vmem:[#allocation10 + $0x18] sm:$0xff]   ;;  %v2059_v9 = vld [vmem:[#allocation10 + $0x20] sm:$0xff]   ;;  %s1564_s3 = sshll.u32 %s2490_s21, 4  ;;  %s1565_s3 = int_to_ptr.vmem [resolvable:$true] %s1564_s3 }
  0xe8   :  { %1794 = vmatpush3.bf16.msra.mxu0 %v2051_v1  ;;  %1814 = vmatpush3.bf16.msra.mxu1 %v2052_v2  ;;  %v2058_v8 = vld [vmem:[#allocation8 + $0x18] sm:$0xff]   ;;  %v2060_v10 = vld [vmem:[#allocation8 + $0x20] sm:$0xff]   ;;  %v2061_v11 = vld [vmem:[#allocation10 + $0x28] sm:$0xff]   ;;  %s2435_s27 = scalar_lea.vmem %s1565_s3, 640  ;;  %p2440_p7 = scmp.lt.s32.totalorder %s1565_s3, %s1565_s3 }
  0xe9   :  { %1795 = vmatprep.subr.bf16.mxu0 %v2488_v0  ;;  %1815 = vmatprep.subr.bf16.mxu1 %v2488_v0  ;;  %v2062_v12 = vld [vmem:[#allocation8 + $0x28] sm:$0xff]   ;;  %v2063_v13 = vld [vmem:[#allocation10 + $0x30] sm:$0xff]   ;;  %v2065_v15 = vld [vmem:[#allocation10 + $0x38] sm:$0xff]   ;;  %p2436_p6 = scmp.ne.s32.totalorder %s1565_s3, %s2435_s27  ;;  %p2441_p8 = scmp.lt.s32.totalorder %s2435_s27, %s2435_s27 }
  0xea   :  { %v2064_v14 = vld [vmem:[#allocation8 + $0x30] sm:$0xff]   ;;  %v2066_v17 = vld [vmem:[#allocation8 + $0x38] sm:$0xff]   ;;  %v222_v18 = vld [vmem:[#allocation2] sm:$0xff] }
  0xeb   :  { %v224_v16 = vld [vmem:[#allocation5] sm:$0xff]  ;;  %v2067_v19 = vld [vmem:[#allocation11] sm:$0xff]   ;;  %v2812_v21 = vpack.c.bf16 %v222_v18, %v222_v18  ;;  %v2068_v22 = vld [vmem:[#allocation11 + $0x8] sm:$0xff]   ;;  %p2442_p9 = por %p2441_p8, %p2440_p7 }
  0xec   :  { %1796 = vmatpush3.bf16.msra.mxu0 %v2053_v3  ;;  %1816 = vmatpush3.bf16.msra.mxu1 %v2054_v4  ;;  %v225_v20 = vpack.c.bf16 %v224_v16, %v224_v16  ;;  %v2069_v23 = vld [vmem:[#allocation11 + $0x10] sm:$0xff]   ;;  %v2070_v24 = vld [vmem:[#allocation11 + $0x18] sm:$0xff]   ;;  %v2071_v25 = vld [vmem:[#allocation11 + $0x20] sm:$0xff]  }
  0xed   :  { %1797 = vmatprep.subr.bf16.mxu0 %v2488_v0  ;;  %1817 = vmatprep.subr.bf16.mxu1 %v2488_v0  ;;  %v2072_v26 = vld [vmem:[#allocation11 + $0x28] sm:$0xff]   ;;  %v2073_v27 = vld [vmem:[#allocation11 + $0x30] sm:$0xff]   ;;  %v2074_v28 = vld [vmem:[#allocation11 + $0x38] sm:$0xff]   ;;  %p2443_p10 = pnand %p2442_p9, %p2436_p6 }
  0xee   :  { %v2075_v29 = vld [vmem:[#allocation11 + $0x40] sm:$0xff]   ;;  %v2076_v30 = vld [vmem:[#allocation11 + $0x48] sm:$0xff]   ;;  %v2077_v31 = vld [vmem:[#allocation11 + $0x50] sm:$0xff]  }
  0xef   :  { %v2078_v32 = vld [vmem:[#allocation11 + $0x58] sm:$0xff]   ;;  %v2079_v33 = vld [vmem:[#allocation11 + $0x60] sm:$0xff]   ;;  %v2080_v34 = vld [vmem:[#allocation11 + $0x68] sm:$0xff]  }
  0xf0   :  { %1798 = vmatpush3.bf16.msra.mxu0 %v2055_v5  ;;  %1818 = vmatpush3.bf16.msra.mxu1 %v2056_v6  ;;  %v1595_v37 = vld [vmem:[%s2966_s8] ss:$0 sm:$0xff]  ;;  %v2081_v49 = vld [vmem:[#allocation11 + $0x70] sm:$0xff]   ;;  %v2082_v50 = vld [vmem:[#allocation11 + $0x78] sm:$0xff]  }
  0xf1   :  { %1799 = vmatprep.subr.bf16.mxu0 %v2488_v0  ;;  %1819 = vmatprep.subr.bf16.mxu1 %v2488_v0  ;;  %v2083_v51 = vld [vmem:[#allocation11 + $0x80] sm:$0xff]   ;;  %v2084_v52 = vld [vmem:[#allocation11 + $0x88] sm:$0xff]   ;;  %v2085_v53 = vld [vmem:[#allocation11 + $0x90] sm:$0xff]  }
  0xf2   :  { %v2086_v54 = vld [vmem:[#allocation11 + $0x98] sm:$0xff]   ;;  %v2087_v55 = vld [vmem:[#allocation11 + $0xa0] sm:$0xff]   ;;  %v2088_v56 = vld [vmem:[#allocation11 + $0xa8] sm:$0xff]  }
  0xf3   :  { %v1596_v57 = vld [vmem:[%s2966_s8 + $0x1] ss:$0 sm:$0xff]  ;;  %v2089_v3 = vld [vmem:[#allocation11 + $0xb0] sm:$0xff]   ;;  %v2090_v4 = vld [vmem:[#allocation11 + $0xb8] sm:$0xff]  }
  0xf4   :  { %1800 = vmatpush3.bf16.msra.mxu0 %v2057_v7  ;;  %1820 = vmatpush3.bf16.msra.mxu1 %v2058_v8  ;;  %v2091_v5 = vld [vmem:[#allocation13] sm:$0xff]   ;;  %v2093_v6 = vld [vmem:[#allocation13 + $0x8] sm:$0xff]   ;;  %v2095_v7 = vld [vmem:[#allocation13 + $0x10] sm:$0xff]  }
  0xf5   :  { %1801 = vmatprep.subr.bf16.mxu0 %v2488_v0  ;;  %1821 = vmatprep.subr.bf16.mxu1 %v2488_v0  ;;  %v2097_v8 = vld [vmem:[#allocation13 + $0x18] sm:$0xff]  }
  0xf8   :  { %1802 = vmatpush3.bf16.msra.mxu0 %v2059_v9  ;;  %1822 = vmatpush3.bf16.msra.mxu1 %v2060_v10  ;;  %v2099_v9 = vld [vmem:[#allocation13 + $0x20] sm:$0xff]   ;;  %v2101_v10 = vld [vmem:[#allocation13 + $0x28] sm:$0xff]  }
  0xf9   :  { %1803 = vmatprep.subr.bf16.mxu0 %v2488_v0  ;;  %1823 = vmatprep.subr.bf16.mxu1 %v2488_v0 }
  0xfc   :  { %1804 = vmatpush3.bf16.msra.mxu0 %v2061_v11  ;;  %1824 = vmatpush3.bf16.msra.mxu1 %v2062_v12  ;;  %v1605_v11 = vld [vmem:[%s2966_s8 + $0x2] ss:$0 sm:$0xff] }
  0xfd   :  { %1805 = vmatprep.subr.bf16.mxu0 %v2488_v0  ;;  %1825 = vmatprep.subr.bf16.mxu1 %v2488_v0 }
 0x100   :  { %1806 = vmatpush3.bf16.msra.mxu0 %v2063_v13  ;;  %1826 = vmatpush3.bf16.msra.mxu1 %v2064_v14 }
 0x101   :  { %1807 = vmatprep.subr.bf16.mxu0 %v2488_v0  ;;  %1827 = vmatprep.subr.bf16.mxu1 %v2488_v0 }
 0x104   :  { %1808 = vmatpush3.bf16.msra.mxu0 %v2065_v15  ;;  %1828 = vmatpush3.bf16.msra.mxu1 %v2066_v17 }
 0x105   :  { %1833 = vmatprep.subr.bf16.mxu0 %v2488_v0  ;;  %1853 = vmatprep.subr.bf16.mxu1 %v2488_v0 }
 0x107   :  { %1810 = vmatmul.mubr.bf16.vlgmr.msra.gmra.mrb[0].mxu0 %v225_v20  ;;  %1830 = vmatmul.mubr.bf16.vlgmr.msra.gmra.mrb[0].mxu1 %v2812_v21 }
 0x108   :  { %1834 = vmatpush3.bf16.msra.mxu0 %v2067_v19  ;;  %1849 = vmatprep.mubr.msk.bf16.mxu0 %vm2489_vm0, %v2488_v0  ;;  %v2092_v19 = vld [vmem:[#allocation14] sm:$0xff]  }
 0x109   :  { %1835 = vmatprep.subr.bf16.mxu0 %v2488_v0  ;;  %1869 = vmatprep.mubr.msk.bf16.mxu1 %vm2489_vm0, %v2488_v0 }
 0x10a   :  { %1854 = vmatpush3.bf16.msra.mxu1 %v2075_v29  ;;  %v2105_v29 = vld [vmem:[#allocation13 + $0x38] sm:$0xff]  }
 0x10b   :  { %1855 = vmatprep.subr.bf16.mxu1 %v2488_v0 }
 0x10c   :  { %1836 = vmatpush3.bf16.msra.mxu0 %v2068_v22  ;;  %v2094_v22 = vld [vmem:[#allocation14 + $0x8] sm:$0xff]  }
 0x10d   :  { %1837 = vmatprep.subr.bf16.mxu0 %v2488_v0 }
 0x10e   :  { %1856 = vmatpush3.bf16.msra.mxu1 %v2076_v30  ;;  %v2106_v30 = vld [vmem:[#allocation14 + $0x38] sm:$0xff]  }
 0x10f   :  { %1857 = vmatprep.subr.bf16.mxu1 %v2488_v0 }
 0x110   :  { %1838 = vmatpush3.bf16.msra.mxu0 %v2069_v23  ;;  %v2096_v23 = vld [vmem:[#allocation14 + $0x10] sm:$0xff]  }
 0x111   :  { %1839 = vmatprep.subr.bf16.mxu0 %v2488_v0 }
 0x112   :  { %1858 = vmatpush3.bf16.msra.mxu1 %v2077_v31  ;;  %v1614_v31 = vld [vmem:[%s2966_s8 + $0x3] ss:$0 sm:$0xff] }
 0x113   :  { %1859 = vmatprep.subr.bf16.mxu1 %v2488_v0 }
 0x114   :  { %1840 = vmatpush3.bf16.msra.mxu0 %v2070_v24  ;;  %v2098_v24 = vld [vmem:[#allocation14 + $0x18] sm:$0xff]  }
 0x115   :  { %1841 = vmatprep.subr.bf16.mxu0 %v2488_v0 }
 0x116   :  { %1860 = vmatpush3.bf16.msra.mxu1 %v2078_v32 }
 0x117   :  { %1861 = vmatprep.subr.bf16.mxu1 %v2488_v0 }
 0x118   :  { %1842 = vmatpush3.bf16.msra.mxu0 %v2071_v25  ;;  %v2100_v25 = vld [vmem:[#allocation14 + $0x20] sm:$0xff]  }
 0x119   :  { %1843 = vmatprep.subr.bf16.mxu0 %v2488_v0 }
 0x11a   :  { %1862 = vmatpush3.bf16.msra.mxu1 %v2079_v33 }
 0x11b   :  { %1863 = vmatprep.subr.bf16.mxu1 %v2488_v0 }
 0x11c   :  { %1844 = vmatpush3.bf16.msra.mxu0 %v2072_v26  ;;  %v2102_v26 = vld [vmem:[#allocation14 + $0x28] sm:$0xff]  }
 0x11d   :  { %1845 = vmatprep.subr.bf16.mxu0 %v2488_v0 }
 0x11e   :  { %1864 = vmatpush3.bf16.msra.mxu1 %v2080_v34 }
 0x11f   :  { %1865 = vmatprep.subr.bf16.mxu1 %v2488_v0 }
 0x120   :  { %1846 = vmatpush3.bf16.msra.mxu0 %v2073_v27  ;;  %v2103_v27 = vld [vmem:[#allocation13 + $0x30] sm:$0xff]  }
 0x121   :  { %1847 = vmatprep.subr.bf16.mxu0 %v2488_v0 }
 0x122   :  { %1866 = vmatpush3.bf16.msra.mxu1 %v2081_v49  ;;  %v2116_v49 = vld [vmem:[#allocation17 + $0x20] sm:$0xff]  }
 0x123   :  { %1867 = vmatprep.subr.bf16.mxu1 %v2488_v0 }
 0x124   :  { %1848 = vmatpush3.bf16.msra.mxu0 %v2074_v28  ;;  %v2104_v28 = vld [vmem:[#allocation14 + $0x30] sm:$0xff]  }
 0x125   :  { %1873 = vmatprep.subr.bf16.mxu0 %v2488_v0 }
 0x126   :  { %1868 = vmatpush3.bf16.msra.mxu1 %v2082_v50  ;;  %v2117_v50 = vld [vmem:[#allocation16 + $0x28] sm:$0xff]  }
 0x127   :  { %1893 = vmatprep.subr.bf16.mxu1 %v2488_v0 }
 0x1da   :  { %v340_v35 = vpop.f32.mrb[0].mxu0  ;;  %v428_v36 = vpop.f32.mrb[0].mxu1 }
 0x1db   :  { %v1811_v38 = vpop.f32.mrb[1].mxu0  ;;  %v429_v39 = vadd.f32 %v428_v36, %v340_v35  ;;  %v1831_v40 = vpop.f32.mrb[1].mxu1 }
 0x1dc   :  { %v343_v41 = vpop.f32.mrb[2].mxu0  ;;  %v431_v42 = vpop.f32.mrb[2].mxu1  ;;  %v2108_v40 = vld [vmem:[#allocation17] sm:$0xff]  }
 0x1dd   :  { %v1812_v43 = vpop.f32.mrb[3].mxu0  ;;  %v439_v44 = vadd.f32 %v1595_v37, %v429_v39  ;;  %v1832_v45 = vpop.f32.mrb[3].mxu1  ;;  %v2107_v39 = vld [vmem:[#allocation16] sm:$0xff]   ;;  %v2109_v42 = vld [vmem:[#allocation16 + $0x8] sm:$0xff]  }
 0x1de   :  { %v2110_v43 = vld [vmem:[#allocation17 + $0x8] sm:$0xff]   ;;  %v2112_v45 = vld [vmem:[#allocation17 + $0x10] sm:$0xff]  }
 0x1df   :  { %v440_v46 = vmul.f32 0.01, %v439_v44 }
 0x1e1   :  { %v441_v47 = vmax.f32 %v439_v44, %v440_v46  ;;  %v2111_v44 = vld [vmem:[#allocation16 + $0x10] sm:$0xff]   ;;  %v2113_v46 = vld [vmem:[#allocation16 + $0x18] sm:$0xff]  }
 0x1e3   :  { %v442_v48 = vpack.c.bf16 %v441_v47, %v441_v47  ;;  %v2114_v47 = vld [vmem:[#allocation17 + $0x18] sm:$0xff]  }
 0x1e5   :  { %1850 = vmatmul.mubr.bf16.vlgmr.msra.gmra.mrb[4].mxu0 %v442_v48  ;;  %v2115_v48 = vld [vmem:[#allocation16 + $0x20] sm:$0xff]  }
 0x1e6   :  { %1889 = vmatprep.mubr.msk.bf16.mxu0 %vm2489_vm0, %v2488_v0  ;;  %1874 = vmatpush3.bf16.msra.mxu0 %v2083_v51  ;;  %v2118_v51 = vld [vmem:[#allocation17 + $0x28] sm:$0xff]  }
 0x1e7   :  { %1875 = vmatprep.subr.bf16.mxu0 %v2488_v0 }
 0x1ea   :  { %1876 = vmatpush3.bf16.msra.mxu0 %v2084_v52  ;;  %v2119_v52 = vld [vmem:[#allocation16 + $0x30] sm:$0xff]  }
 0x1eb   :  { %1877 = vmatprep.subr.bf16.mxu0 %v2488_v0 }
 0x1ee   :  { %1878 = vmatpush3.bf16.msra.mxu0 %v2085_v53  ;;  %v2120_v53 = vld [vmem:[#allocation17 + $0x30] sm:$0xff]  }
 0x1ef   :  { %1879 = vmatprep.subr.bf16.mxu0 %v2488_v0 }
 0x1f2   :  { %1880 = vmatpush3.bf16.msra.mxu0 %v2086_v54  ;;  %v2121_v54 = vld [vmem:[#allocation16 + $0x38] sm:$0xff]  }
 0x1f3   :  { %1881 = vmatprep.subr.bf16.mxu0 %v2488_v0 }
 0x1f6   :  { %1882 = vmatpush3.bf16.msra.mxu0 %v2087_v55  ;;  %v2122_v55 = vld [vmem:[#allocation17 + $0x38] sm:$0xff]  }
 0x1f7   :  { %1883 = vmatprep.subr.bf16.mxu0 %v2488_v0 }
 0x1fa   :  { %1884 = vmatpush3.bf16.msra.mxu0 %v2088_v56  ;;  %v1623_v56 = vld [vmem:[%s2966_s8 + $0x4] ss:$0 sm:$0xff] }
 0x1fb   :  { %1885 = vmatprep.subr.bf16.mxu0 %v2488_v0 }
 0x1fe   :  { %1886 = vmatpush3.bf16.msra.mxu0 %v2089_v3 }
 0x1ff   :  { %1887 = vmatprep.subr.bf16.mxu0 %v2488_v0 }
 0x202   :  { %1888 = vmatpush3.bf16.msra.mxu0 %v2090_v4 }
 0x203   :  { %1913 = vmatprep.subr.bf16.mxu0 %v2488_v0 }
 0x2b8   :  { %v546_v58 = vpop.f32.mrb[4].mxu0 }
 0x2b9   :  { %v547_v59 = vadd.f32 %v1596_v57, %v546_v58  ;;  %v1851_v60 = vpop.f32.mrb[5].mxu0  ;;  %v1632_v57 = vld [vmem:[%s2966_s8 + $0x5] ss:$0 sm:$0xff] }
 0x2ba   :  { %v549_v61 = vpop.f32.mrb[6].mxu0 }
 0x2bb   :  { %v552_v62 = vmul.f32 0.01, %v547_v59  ;;  %v1852_v63 = vpop.f32.mrb[7].mxu0 }
 0x2bd   :  { %v553_v1 = vmax.f32 %v547_v59, %v552_v62 }
 0x2bf   :  { %v554_v2 = vpack.c.bf16 %v553_v1, %v553_v1 }
 0x2c1   :  { %1870 = vmatmul.mubr.bf16.vlgmr.msra.gmra.mrb[4].mxu1 %v554_v2 }
 0x2c2   :  { %1909 = vmatprep.mubr.msk.bf16.mxu1 %vm2489_vm0, %v2488_v0  ;;  %1894 = vmatpush3.bf16.msra.mxu1 %v2091_v5 }
 0x2c3   :  { %1895 = vmatprep.subr.bf16.mxu1 %v2488_v0 }
 0x2c6   :  { %1896 = vmatpush3.bf16.msra.mxu1 %v2093_v6  ;;  %v1002_v6 = vld [vmem:[#allocation7] sm:$0xff] }
 0x2c7   :  { %1897 = vmatprep.subr.bf16.mxu1 %v2488_v0 }
 0x2ca   :  { %1898 = vmatpush3.bf16.msra.mxu1 %v2095_v7 }
 0x2cb   :  { %1899 = vmatprep.subr.bf16.mxu1 %v2488_v0 }
 0x2ce   :  { %1900 = vmatpush3.bf16.msra.mxu1 %v2097_v8 }
 0x2cf   :  { %1901 = vmatprep.subr.bf16.mxu1 %v2488_v0 }
 0x2d2   :  { %1902 = vmatpush3.bf16.msra.mxu1 %v2099_v9 }
 0x2d3   :  { %1903 = vmatprep.subr.bf16.mxu1 %v2488_v0 }
 0x2d6   :  { %1904 = vmatpush3.bf16.msra.mxu1 %v2101_v10  ;;  %v2123_v10 = vld [vmem:[#allocation19] sm:$0xff]  }
 0x2d7   :  { %1905 = vmatprep.subr.bf16.mxu1 %v2488_v0 }
 0x2da   :  { %1906 = vmatpush3.bf16.msra.mxu1 %v2103_v27  ;;  %v2137_v27 = vld [vmem:[#allocation20 + $0x18] sm:$0xff]  }
 0x2db   :  { %1907 = vmatprep.subr.bf16.mxu1 %v2488_v0 }
 0x2de   :  { %1908 = vmatpush3.bf16.msra.mxu1 %v2105_v29  ;;  %v2141_v29 = vld [vmem:[#allocation20 + $0x28] sm:$0xff]  }
 0x2df   :  { %1933 = vmatprep.subr.bf16.mxu1 %v2488_v0 }
 0x394   :  { %v659_v12 = vpop.f32.mrb[4].mxu1 }
 0x395   :  { %v660_v13 = vadd.f32 %v1605_v11, %v659_v12  ;;  %v1871_v14 = vpop.f32.mrb[5].mxu1  ;;  %v2124_v12 = vld [vmem:[#allocation19 + $0x8] sm:$0xff]  }
 0x396   :  { %v662_v15 = vpop.f32.mrb[6].mxu1  ;;  %v2126_v14 = vld [vmem:[#allocation19 + $0x18] sm:$0xff]  }
 0x397   :  { %v665_v16 = vmul.f32 0.01, %v660_v13  ;;  %v1872_v17 = vpop.f32.mrb[7].mxu1  ;;  %v2127_v15 = vld [vmem:[#allocation19 + $0x20] sm:$0xff]  }
 0x399   :  { %v666_v18 = vmax.f32 %v660_v13, %v665_v16  ;;  %v2125_v13 = vld [vmem:[#allocation19 + $0x10] sm:$0xff]  }
 0x39b   :  { %v667_v20 = vpack.c.bf16 %v666_v18, %v666_v18  ;;  %v2128_v18 = vld [vmem:[#allocation19 + $0x28] sm:$0xff]  }
 0x39d   :  { %1890 = vmatmul.mubr.bf16.vlgmr.msra.gmra.mrb[8].mxu0 %v667_v20 }
 0x39e   :  { %1914 = vmatpush3.bf16.msra.mxu0 %v2092_v19  ;;  %1929 = vmatprep.mubr.msk.bf16.mxu0 %vm2489_vm0, %v2488_v0 }
 0x39f   :  { %1915 = vmatprep.subr.bf16.mxu0 %v2488_v0 }
 0x3a2   :  { %1916 = vmatpush3.bf16.msra.mxu0 %v2094_v22  ;;  %v2129_v22 = vld [vmem:[#allocation19 + $0x30] sm:$0xff]  }
 0x3a3   :  { %1917 = vmatprep.subr.bf16.mxu0 %v2488_v0 }
 0x3a6   :  { %1918 = vmatpush3.bf16.msra.mxu0 %v2096_v23  ;;  %v2130_v23 = vld [vmem:[#allocation19 + $0x38] sm:$0xff]  }
 0x3a7   :  { %1919 = vmatprep.subr.bf16.mxu0 %v2488_v0 }
 0x3aa   :  { %1920 = vmatpush3.bf16.msra.mxu0 %v2098_v24  ;;  %v2131_v24 = vld [vmem:[#allocation20] sm:$0xff]  }
 0x3ab   :  { %1921 = vmatprep.subr.bf16.mxu0 %v2488_v0 }
 0x3ae   :  { %1922 = vmatpush3.bf16.msra.mxu0 %v2100_v25  ;;  %v2133_v25 = vld [vmem:[#allocation20 + $0x8] sm:$0xff]  }
 0x3af   :  { %1923 = vmatprep.subr.bf16.mxu0 %v2488_v0 }
 0x3b2   :  { %1924 = vmatpush3.bf16.msra.mxu0 %v2102_v26  ;;  %v2135_v26 = vld [vmem:[#allocation20 + $0x10] sm:$0xff]  }
 0x3b3   :  { %1925 = vmatprep.subr.bf16.mxu0 %v2488_v0 }
 0x3b6   :  { %1926 = vmatpush3.bf16.msra.mxu0 %v2104_v28  ;;  %v2139_v28 = vld [vmem:[#allocation20 + $0x20] sm:$0xff]  }
 0x3b7   :  { %1927 = vmatprep.subr.bf16.mxu0 %v2488_v0 }
 0x3ba   :  { %1928 = vmatpush3.bf16.msra.mxu0 %v2106_v30 }
 0x3bb   :  { %1953 = vmatprep.subr.bf16.mxu0 %v2488_v0 }
 0x470   :  { %v772_v32 = vpop.f32.mrb[8].mxu0 }
 0x471   :  { %v773_v33 = vadd.f32 %v1614_v31, %v772_v32  ;;  %v1891_v34 = vpop.f32.mrb[9].mxu0  ;;  %v1657_v31 = vld [vmem:[%s2972_s14] ss:$0 sm:$0xff] }
 0x472   :  { %v775_v35 = vpop.f32.mrb[10].mxu0 }
 0x473   :  { %v778_v36 = vmul.f32 0.01, %v773_v33  ;;  %v1892_v37 = vpop.f32.mrb[11].mxu0 }
 0x475   :  { %v779_v38 = vmax.f32 %v773_v33, %v778_v36 }
 0x477   :  { %v780_v41 = vpack.c.bf16 %v779_v38, %v779_v38 }
 0x479   :  { %1910 = vmatmul.mubr.bf16.vlgmr.msra.gmra.mrb[8].mxu1 %v780_v41  ;;  %1930 = vmatmul.mubr.bf16.vlgmr.msra.gmra.mrb[12].mxu0 %v780_v41  ;;  %v2134_v41 = vld [vmem:[#allocation22 + $0x8] sm:$0xff]  }
 0x47a   :  { %1954 = vmatpush3.bf16.msra.mxu0 %v2107_v39  ;;  %1934 = vmatpush3.bf16.msra.mxu1 %v2108_v40  ;;  %v2132_v39 = vld [vmem:[#allocation22] sm:$0xff]  }
 0x47b   :  { %1955 = vmatprep.subr.bf16.mxu0 %v2488_v0  ;;  %1935 = vmatprep.subr.bf16.mxu1 %v2488_v0 }
 0x47c   :  { %1969 = vmatprep.mubr.msk.bf16.mxu0 %vm2489_vm0, %v2488_v0  ;;  %1949 = vmatprep.mubr.msk.bf16.mxu1 %vm2489_vm0, %v2488_v0 }
 0x47e   :  { %1956 = vmatpush3.bf16.msra.mxu0 %v2109_v42  ;;  %1936 = vmatpush3.bf16.msra.mxu1 %v2110_v43  ;;  %v2136_v42 = vld [vmem:[#allocation22 + $0x10] sm:$0xff]   ;;  %v2138_v43 = vld [vmem:[#allocation22 + $0x18] sm:$0xff]  }
 0x47f   :  { %1957 = vmatprep.subr.bf16.mxu0 %v2488_v0  ;;  %1937 = vmatprep.subr.bf16.mxu1 %v2488_v0 }
 0x482   :  { %1958 = vmatpush3.bf16.msra.mxu0 %v2111_v44  ;;  %1938 = vmatpush3.bf16.msra.mxu1 %v2112_v45  ;;  %v2140_v44 = vld [vmem:[#allocation22 + $0x20] sm:$0xff]   ;;  %v2142_v45 = vld [vmem:[#allocation22 + $0x28] sm:$0xff]  }
 0x483   :  { %1959 = vmatprep.subr.bf16.mxu0 %v2488_v0  ;;  %1939 = vmatprep.subr.bf16.mxu1 %v2488_v0 }
 0x486   :  { %1960 = vmatpush3.bf16.msra.mxu0 %v2113_v46  ;;  %1940 = vmatpush3.bf16.msra.mxu1 %v2114_v47  ;;  %v2143_v46 = vld [vmem:[#allocation20 + $0x30] sm:$0xff]  }
 0x487   :  { %1961 = vmatprep.subr.bf16.mxu0 %v2488_v0  ;;  %1941 = vmatprep.subr.bf16.mxu1 %v2488_v0  ;;  %v2144_v47 = vld [vmem:[#allocation22 + $0x30] sm:$0xff]  }
 0x48a   :  { %1962 = vmatpush3.bf16.msra.mxu0 %v2115_v48  ;;  %1942 = vmatpush3.bf16.msra.mxu1 %v2116_v49  ;;  %v2145_v48 = vld [vmem:[#allocation20 + $0x38] sm:$0xff]  }
 0x48b   :  { %1963 = vmatprep.subr.bf16.mxu0 %v2488_v0  ;;  %1943 = vmatprep.subr.bf16.mxu1 %v2488_v0  ;;  %v2146_v49 = vld [vmem:[#allocation22 + $0x38] sm:$0xff]  }
 0x48e   :  { %1964 = vmatpush3.bf16.msra.mxu0 %v2117_v50  ;;  %1944 = vmatpush3.bf16.msra.mxu1 %v2118_v51  ;;  %v1658_v50 = vld [vmem:[%s2972_s14 + $0x1] ss:$0 sm:$0xff] }
 0x48f   :  { %1965 = vmatprep.subr.bf16.mxu0 %v2488_v0  ;;  %1945 = vmatprep.subr.bf16.mxu1 %v2488_v0 }
 0x492   :  { %1966 = vmatpush3.bf16.msra.mxu0 %v2119_v52  ;;  %1946 = vmatpush3.bf16.msra.mxu1 %v2120_v53 }
 0x493   :  { %1967 = vmatprep.subr.bf16.mxu0 %v2488_v0  ;;  %1947 = vmatprep.subr.bf16.mxu1 %v2488_v0 }
 0x496   :  { %1968 = vmatpush3.bf16.msra.mxu0 %v2121_v54  ;;  %1948 = vmatpush3.bf16.msra.mxu1 %v2122_v55 }
 0x497   :  { %1993 = vmatprep.subr.bf16.mxu0 %v2488_v0  ;;  %1973 = vmatprep.subr.bf16.mxu1 %v2488_v0 }
 0x499   :  { %1970 = vmatmul.mubr.bf16.vlgmr.msra.gmra.mrb[16].mxu0 %v2812_v21 }
 0x49a   :  { %2009 = vmatprep.mubr.msk.bf16.mxu0 %vm2489_vm0, %v2488_v0  ;;  %1994 = vmatpush3.bf16.msra.mxu0 %v2131_v24 }
 0x49b   :  { %1995 = vmatprep.subr.bf16.mxu0 %v2488_v0 }
 0x49e   :  { %1996 = vmatpush3.bf16.msra.mxu0 %v2133_v25 }
 0x49f   :  { %1997 = vmatprep.subr.bf16.mxu0 %v2488_v0 }
 0x4a2   :  { %1998 = vmatpush3.bf16.msra.mxu0 %v2135_v26 }
 0x4a3   :  { %1999 = vmatprep.subr.bf16.mxu0 %v2488_v0 }
 0x4a6   :  { %2000 = vmatpush3.bf16.msra.mxu0 %v2137_v27 }
 0x4a7   :  { %2001 = vmatprep.subr.bf16.mxu0 %v2488_v0 }
 0x4aa   :  { %2002 = vmatpush3.bf16.msra.mxu0 %v2139_v28 }
 0x4ab   :  { %2003 = vmatprep.subr.bf16.mxu0 %v2488_v0 }
 0x4ae   :  { %2004 = vmatpush3.bf16.msra.mxu0 %v2141_v29 }
 0x4af   :  { %2005 = vmatprep.subr.bf16.mxu0 %v2488_v0 }
 0x4b2   :  { %2006 = vmatpush3.bf16.msra.mxu0 %v2143_v46 }
 0x4b3   :  { %2007 = vmatprep.subr.bf16.mxu0 %v2488_v0 }
 0x4b6   :  { %2008 = vmatpush3.bf16.msra.mxu0 %v2145_v48 }
 0x54c   :  { %v884_v58 = vpop.f32.mrb[8].mxu1  ;;  %v993_v59 = vpop.f32.mrb[12].mxu0 }
 0x54d   :  { %v885_v60 = vadd.f32 %v1623_v56, %v884_v58  ;;  %v994_v61 = vadd.f32 %v1632_v57, %v993_v59  ;;  %v1911_v62 = vpop.f32.mrb[9].mxu1  ;;  %v1931_v63 = vpop.f32.mrb[13].mxu0  ;;  %v1676_v59 = vld [vmem:[%s2972_s14 + $0x3] ss:$0 sm:$0xff] }
 0x54e   :  { %v887_v21 = vpop.f32.mrb[10].mxu1  ;;  %v996_v1 = vpop.f32.mrb[14].mxu0 }
 0x54f   :  { %1553 = vst [vmem:[#allocation23] sm:$0xff] %v885_v60  ;;  %v999_v2 = vmul.f32 0.5, %v994_v61  ;;  %1554 = vst [vmem:[#allocation23 + $0x8] sm:$0xff] %v994_v61  ;;  %v1912_v3 = vpop.f32.mrb[11].mxu1  ;;  %v1932_v4 = vpop.f32.mrb[15].mxu0 }
 0x551   :  { %v1000_v5 = vmul.f32 1.442695, %v999_v2 }
 0x553   :  { %2147 = vpow2.f32 %v1000_v5 }
 0x55d   :  { %v2148_v7 = vpop.eup %2147 }
 0x55e   :  { %v1003_v8 = vmul.f32 %v2148_v7, %v1002_v6 }
 0x560   :  { %v1004_v9 = vadd.f32 %v1003_v8, %v885_v60 }
 0x562   :  { %v1005_v11 = vpack.c.bf16 %v1004_v9, %v1004_v9  ;;  %1555 = vst [vmem:[#allocation23 + $0x10] sm:$0xff] %v1004_v9 }
 0x564   :  { %1950 = vmatmul.mubr.bf16.vlgmr.msra.gmra.mrb[12].mxu1 %v1005_v11 }
 0x565   :  { %1974 = vmatpush3.bf16.msra.mxu1 %v2123_v10  ;;  %1989 = vmatprep.mubr.msk.bf16.mxu1 %vm2489_vm0, %v2488_v0 }
 0x566   :  { %1975 = vmatprep.subr.bf16.mxu1 %v2488_v0 }
 0x569   :  { %1976 = vmatpush3.bf16.msra.mxu1 %v2124_v12 }
 0x56a   :  { %1977 = vmatprep.subr.bf16.mxu1 %v2488_v0 }
 0x56c   :  { %v1208_v16 = vpop.f32.mrb[16].mxu0 }
 0x56d   :  { %1978 = vmatpush3.bf16.msra.mxu1 %v2125_v13  ;;  %v1971_v17 = vpop.f32.mrb[17].mxu0 }
 0x56e   :  { %1979 = vmatprep.subr.bf16.mxu1 %v2488_v0  ;;  %v1211_v19 = vpop.f32.mrb[18].mxu0 }
 0x56f   :  { %v1972_v20 = vpop.f32.mrb[19].mxu0 }
 0x571   :  { %1980 = vmatpush3.bf16.msra.mxu1 %v2126_v14 }
 0x572   :  { %1981 = vmatprep.subr.bf16.mxu1 %v2488_v0 }
 0x575   :  { %1982 = vmatpush3.bf16.msra.mxu1 %v2127_v15 }
 0x576   :  { %1983 = vmatprep.subr.bf16.mxu1 %v2488_v0 }
 0x579   :  { %1984 = vmatpush3.bf16.msra.mxu1 %v2128_v18 }
 0x57a   :  { %1985 = vmatprep.subr.bf16.mxu1 %v2488_v0 }
 0x57d   :  { %1986 = vmatpush3.bf16.msra.mxu1 %v2129_v22 }
 0x57e   :  { %1987 = vmatprep.subr.bf16.mxu1 %v2488_v0 }
 0x581   :  { %1988 = vmatpush3.bf16.msra.mxu1 %v2130_v23 }
 0x582   :  { %2013 = vmatprep.subr.bf16.mxu1 %v2488_v0 }
 0x637   :  { %v1120_v30 = vpop.f32.mrb[12].mxu1 }
 0x638   :  { %v1209_v32 = vadd.f32 %v1208_v16, %v1120_v30  ;;  %v1951_v33 = vpop.f32.mrb[13].mxu1 }
 0x639   :  { %v1123_v34 = vpop.f32.mrb[14].mxu1 }
 0x63a   :  { %v1219_v35 = vadd.f32 %v1657_v31, %v1209_v32  ;;  %v1952_v36 = vpop.f32.mrb[15].mxu1 }
 0x63c   :  { %v1220_v37 = vmul.f32 0.01, %v1219_v35 }
 0x63e   :  { %v1221_v38 = vmax.f32 %v1219_v35, %v1220_v37 }
 0x640   :  { %v1222_v40 = vpack.c.bf16 %v1221_v38, %v1221_v38 }
 0x642   :  { %1990 = vmatmul.mubr.bf16.vlgmr.msra.gmra.mrb[16].mxu1 %v1222_v40 }
 0x643   :  { %2014 = vmatpush3.bf16.msra.mxu1 %v2132_v39  ;;  %2029 = vmatprep.mubr.msk.bf16.mxu1 %vm2489_vm0, %v2488_v0 }
 0x644   :  { %2015 = vmatprep.subr.bf16.mxu1 %v2488_v0 }
 0x647   :  { %2016 = vmatpush3.bf16.msra.mxu1 %v2134_v41 }
 0x648   :  { %2017 = vmatprep.subr.bf16.mxu1 %v2488_v0 }
 0x64b   :  { %2018 = vmatpush3.bf16.msra.mxu1 %v2136_v42 }
 0x64c   :  { %2019 = vmatprep.subr.bf16.mxu1 %v2488_v0 }
 0x64f   :  { %2020 = vmatpush3.bf16.msra.mxu1 %v2138_v43 }
 0x650   :  { %2021 = vmatprep.subr.bf16.mxu1 %v2488_v0 }
 0x653   :  { %2022 = vmatpush3.bf16.msra.mxu1 %v2140_v44 }
 0x654   :  { %2023 = vmatprep.subr.bf16.mxu1 %v2488_v0 }
 0x657   :  { %2024 = vmatpush3.bf16.msra.mxu1 %v2142_v45 }
 0x658   :  { %2025 = vmatprep.subr.bf16.mxu1 %v2488_v0 }
 0x65b   :  { %2026 = vmatpush3.bf16.msra.mxu1 %v2144_v47 }
 0x65c   :  { %2027 = vmatprep.subr.bf16.mxu1 %v2488_v0  ;;  %v1667_v0 = vld [vmem:[%s2972_s14 + $0x2] ss:$0 sm:$0xff] }
 0x65f   :  { %2028 = vmatpush3.bf16.msra.mxu1 %v2146_v49 }
 0x715   :  { %v1326_v51 = vpop.f32.mrb[16].mxu1 }
 0x716   :  { %v1327_v52 = vadd.f32 %v1658_v50, %v1326_v51  ;;  %v1991_v53 = vpop.f32.mrb[17].mxu1 }
 0x717   :  { %v1329_v54 = vpop.f32.mrb[18].mxu1 }
 0x718   :  { %v1332_v55 = vmul.f32 0.01, %v1327_v52  ;;  %v1992_v56 = vpop.f32.mrb[19].mxu1 }
 0x71a   :  { %v1333_v57 = vmax.f32 %v1327_v52, %v1332_v55 }
 0x71c   :  { %v1334_v58 = vpack.c.bf16 %v1333_v57, %v1333_v57 }
 0x71e   :  { %2010 = vmatmul.mubr.bf16.vlgmr.msra.gmra.mrb[20].mxu0 %v1334_v58  ;;  %2030 = vmatmul.mubr.bf16.vlgmr.msra.gmra.mrb[20].mxu1 %v1334_v58 }
 0x7f1   :  { %v1438_v60 = vpop.f32.mrb[20].mxu0  ;;  %v1547_v61 = vpop.f32.mrb[20].mxu1 }
 0x7f2   :  { %v1439_v62 = vadd.f32 %v1667_v0, %v1438_v60  ;;  %v1548_v63 = vadd.f32 %v1676_v59, %v1547_v61  ;;  %v2011_v21 = vpop.f32.mrb[21].mxu0  ;;  %v2031_v1 = vpop.f32.mrb[21].mxu1 }
 0x7f3   :  { %v1441_v2 = vpop.f32.mrb[22].mxu0  ;;  %v1550_v3 = vpop.f32.mrb[22].mxu1 }
 0x7f4   :  { %1556 = vst [vmem:[#allocation23 + $0x18] sm:$0xff] %v1439_v62  ;;  %1557 = vst [vmem:[#allocation23 + $0x20] sm:$0xff] %v1548_v63  ;;  %v2012_v4 = vpop.f32.mrb[23].mxu0  ;;  %v2032_v5 = vpop.f32.mrb[23].mxu1 }
 0x7f5   :  { %2446 = shalt.err (!%p2443_p10)
}
 0x7f6   :  { %s2447_s2 = scalar_lea.hbm %s2973_s15, 640 }
 0x7f7   :  { %p2448_p11 = scmp.ne.s32.totalorder %s2973_s15, %s2447_s2  ;;  %p2451_p12 = scmp.lt.u32.totalorder %s2447_s2, %s2973_s15 }
 0x7f9   :  { %p2453_p13 = pnand %p2451_p12, %p2448_p11 }
 0x7fb   :  { %2456 = shalt.err (!%p2453_p13)
}
 0x7fc   :  { %1567 = dma.vmem_to_hbm [thread:$0]  %s1565_s3, 640, %s2973_s15, [#allocation4]  }
 0x7fd   :  { %2471 = dma.done.wait [#allocation4], 640  }
 0x7fe   :  { %2472 = vsyncadd [#allocation4], 4294966656 }
 0x7ff   :  { %1571 = vsyncpa [#allocation3], 1 }
 0x800   :  { %1572 = vsyncpa [#allocation6], 1 }
 0x801   :  { %1573 = vsyncpa [#allocation9], 1 }
 0x802   :  { %1574 = vsyncpa [#allocation12], 1 }
 0x803   :  { %1575 = vsyncpa [#allocation15], 1 }
 0x804   :  { %1576 = vsyncpa [#allocation18], 1 }
 0x805   :  { %1577 = vsyncpa [#allocation21], 1 }
 0x806   :  { %1578 = vsyncpa [#allocation4], 1 }

</bundles_post_ra>
